<compile_context>
chip_gen: v7x
topology: tpu7x:2x2x1
jax: 0.10.0
libtpu: 0.0.40
codegen_flags: <defaults>
</compile_context>

<pallas_src>
import jax
import jax.numpy as jnp
from jax import lax
from jax.experimental import pallas as pl
from jax.experimental.pallas import tpu as pltpu

LN_EPS = 1e-5      # torch.nn.LayerNorm default
CHUNK = 8          # timesteps per recurrence chunk = f32 sublanes per vreg


def _erf_poly(x):
    # Abramowitz & Stegun 7.1.26 (max abs err ~1.5e-7). exp -> EUP; the divide uses
    # the EUP approx reciprocal + one Newton refinement step (off the VALU slot).
    a1, a2, a3, a4, a5 = (0.254829592, -0.284496736, 1.421413741,
                          -1.453152027, 1.061405429)
    p = 0.3275911
    s = jnp.where(x >= 0.0, 1.0, -1.0)
    ax = jnp.abs(x)
    den = 1.0 + p * ax
    t = pl.reciprocal(den, approx=True)
    t = t * (2.0 - den * t)                       # Newton step: rel err ~ eps^2
    poly = ((((a5 * t + a4) * t + a3) * t + a2) * t + a1) * t
    return s * (1.0 - poly * jnp.exp(-ax * ax))


def _gelu_kernel(x):
    # Exact (erf-based) GELU, matching torch.nn.functional.gelu default.
    return 0.5 * x * (1.0 + _erf_poly(x * 0.7071067811865476))


def _layernorm(x, gamma, beta):
    mu = jnp.mean(x, axis=-1, keepdims=True)
    xc = x - mu
    var = jnp.mean(xc * xc, axis=-1, keepdims=True)
    return xc * lax.rsqrt(var + LN_EPS) * gamma + beta


def _hgru_kernel(lb_ref,                                   # scalar prefetch (SMEM)
                 x_ref,
                 w3_ref, b3_ref,                           # fused in/lambda/gate proj
                 wo_ref, bo_ref,                           # out_proj
                 g1_ref, be1_ref, g2_ref, be2_ref,         # norm / norm2
                 out_ref,
                 u_scr, lam_scr, gate_scr, h_scr):
    si = pl.program_id(1)                                  # seq-tile index
    lb = lb_ref[0]
    mdt = w3_ref.dtype                                     # MXU operand dtype

    x = x_ref[0].astype(jnp.float32)                       # (tq, d)
    tq, d = x.shape
    xm = x.astype(mdt)

    # ---- projections: three MXU dots against static slices of the fused weight,
    #      each consumed immediately (no (tq, 3d) intermediate kept live) ----
    gate_scr[...] = jnp.dot(xm, w3_ref[2],
                            preferred_element_type=jnp.float32) + b3_ref[2:3, :]
    lam = jax.nn.sigmoid(jnp.dot(xm, w3_ref[1],
                                 preferred_element_type=jnp.float32) + b3_ref[1:2, :])
    lam = lb + (1.0 - lb) * lam
    lam_scr[...] = lam
    inp = jnp.dot(xm, w3_ref[0],
                  preferred_element_type=jnp.float32) + b3_ref[0:1, :]
    u_scr[...] = (1.0 - lam) * _gelu_kernel(inp)           # overwritten with h below

    # ---- causal recurrence h_t = lam_t*h_{t-1} + u_t, CHUNK timesteps / iter ----
    @pl.when(si == 0)
    def _():
        h_scr[...] = jnp.zeros_like(h_scr)                 # reset per batch row

    nchunks = tq // CHUNK

    def chunk_body(c, carry):                              # carry: (1, d) h state
        idx = pl.multiple_of(c * CHUNK, CHUNK)
        a = lam_scr[pl.ds(idx, CHUNK), :]                  # decay lambda_t
        b = u_scr[pl.ds(idx, CHUNK), :]                    # (1-lambda_t)*input_t
        row = lax.broadcasted_iota(jnp.int32, (CHUNK, d), 0)
        # Hillis-Steele inclusive scan of (a, b) pairs along the sublane axis.
        # compose(earlier=(a1,b1), later=(a2,b2)) = (a2*a1, a2*b1 + b2).
        for s in (1, 2, 4):
            keep = row >= s
            a_sh = jnp.where(keep, pltpu.roll(a, s, 0), 1.0)
            b_sh = jnp.where(keep, pltpu.roll(b, s, 0), 0.0)
            b = a * b_sh + b
            a = a * a_sh
        h = a * carry + b                                  # fold in running state
        u_scr[pl.ds(idx, CHUNK), :] = h                    # hiddens in place
        return h[CHUNK - 1:CHUNK, :]                       # new carry (last row)

    carry = lax.fori_loop(0, nchunks, chunk_body, h_scr[...],
                          unroll=min(4, nchunks))
    h_scr[...] = carry                                     # persists to next seq tile

    # ---- norm, gate, out_proj, norm2, residual ----
    hid = _layernorm(u_scr[...], g1_ref[...], be1_ref[...])
    gate = _gelu_kernel(gate_scr[...])
    out = jnp.dot((hid * gate).astype(mdt), wo_ref[...],
                  preferred_element_type=jnp.float32) + bo_ref[...]
    out = _layernorm(out, g2_ref[...], be2_ref[...])
    out_ref[0] = (x + out).astype(out_ref.dtype)


def prepare_params(params, matmul_dtype=jnp.bfloat16):
    """Fuse the three input-side projections and cast MXU weights once per load."""
    w3 = jnp.stack([params["w_in"], params["w_l"], params["w_g"]],
                   axis=0).astype(matmul_dtype)            # (3, d, d)
    b3 = jnp.concatenate([params["b_in"], params["b_l"], params["b_g"]],
                         axis=0).astype(jnp.float32)       # (3, d)
    return dict(
        w3=w3, b3=b3,
        wo=params["w_o"].astype(matmul_dtype),
        bo=params["b_o"].astype(jnp.float32),
        g1=params["g1"].astype(jnp.float32), be1=params["be1"].astype(jnp.float32),
        g2=params["g2"].astype(jnp.float32), be2=params["be2"].astype(jnp.float32))


def _pick_seq_tile(n, requested):
    # Largest multiple of CHUNK that divides n and is <= requested (no more
    # silent whole-sequence tiles).
    t = max(CHUNK, min(requested, n))
    t -= t % CHUNK
    while n % t != 0:
        t -= CHUNK
    return t


def _vmem_limit_bytes(estimate):
    cap = 64 << 20                                         # v7x-safe fallback
    try:
        cap = int(pltpu.get_tpu_info().vmem_capacity_bytes)
    except Exception:
        pass
    ceiling = max(32 << 20, min(int(cap * 0.8), 100 << 20))
    return int(min(max(2 * estimate, 32 << 20), ceiling))


def hgru_real_v6(x_nbd, params, lower_bound=0.0, seq_tile=256,
                 matmul_dtype=jnp.bfloat16):
    """x_nbd: (n, b, d) as in the PyTorch module. Returns (n, b, d).

    `params` may be raw per-layer weights (see init_params) or the output of
    prepare_params (preferred: fuses/casts weights once per model load).
    """
    n, b, d = x_nbd.shape
    assert n % CHUNK == 0, "seq len must be a multiple of 8"
    assert d % 128 == 0, "embed_dim must be a multiple of 128 (lane width)"
    if "w3" not in params:
        params = prepare_params(params, matmul_dtype)
    seq_tile = _pick_seq_tile(n, seq_tile)

    x = jnp.transpose(x_nbd, (1, 0, 2))                    # (b, n, d)
    lb = jnp.asarray([lower_bound], jnp.float32)           # runtime scalar (SMEM)
    mbytes = jnp.dtype(params["w3"].dtype).itemsize
    xbytes = jnp.dtype(x.dtype).itemsize

    est = (3 * seq_tile * d * 4                            # u / lambda / gate scratch (f32)
           + 4 * d * d * mbytes                            # w3 (3 slabs) + wo, single-buffered
           + 2 * 2 * seq_tile * d * xbytes                 # x in + out blocks (double-buffered)
           + 16 * d * 4)                                   # biases / LN rows
    cparams = pltpu.CompilerParams(
        # Batch is the only megacore-parallel axis (the seq axis carries h); on
        # v7x feed >= 2 batch rows per chip so both TensorCores are occupied.
        dimension_semantics=("parallel", "arbitrary"),
        vmem_limit_bytes=_vmem_limit_bytes(est))

    def build(single_buffer_weights):
        kw = dict(pipeline_mode=pl.Buffered(1)) if single_buffer_weights else {}
        xspec = pl.BlockSpec((1, seq_tile, d), lambda bi, si, lb_r: (bi, si, 0))
        w3spec = pl.BlockSpec((3, d, d), lambda bi, si, lb_r: (0, 0, 0), **kw)
        b3spec = pl.BlockSpec((3, d), lambda bi, si, lb_r: (0, 0), **kw)
        wospec = pl.BlockSpec((d, d), lambda bi, si, lb_r: (0, 0), **kw)
        row = pl.BlockSpec((1, d), lambda bi, si, lb_r: (0, 0), **kw)
        return pl.pallas_call(
            _hgru_kernel,
            out_shape=jax.ShapeDtypeStruct((b, n, d), x.dtype),
            grid_spec=pltpu.PrefetchScalarGridSpec(
                num_scalar_prefetch=1,
                grid=(b, n // seq_tile),
                in_specs=[xspec, w3spec, b3spec, wospec, row, row, row, row, row],
                out_specs=xspec,
                scratch_shapes=[pltpu.VMEM((seq_tile, d), jnp.float32),   # u -> hiddens
                                pltpu.VMEM((seq_tile, d), jnp.float32),   # lambda
                                pltpu.VMEM((seq_tile, d), jnp.float32),   # gate pre-act
                                pltpu.VMEM((1, d), jnp.float32)]),        # carried h
            compiler_params=cparams)

    args = (lb, x, params["w3"], params["b3"], params["wo"], params["bo"],
            params["g1"], params["be1"], params["g2"], params["be2"])
    try:
        out = jax.block_until_ready(build(True)(*args))    # Buffered(1) weights
    except Exception:
        # Older JAX releases may lack pipeline_mode=pl.Buffered(1); fall back to
        # default double-buffering (identical numerics, just more VMEM).
        out = build(False)(*args)

    return jnp.transpose(out, (1, 0, 2))                   # back to (n, b, d)


def hgru_ref(x_nbd, params, lower_bound=0.0):
    """Pure-JAX reference (same math as the PyTorch forward, causal=True)."""
    x = x_nbd.astype(jnp.float32)
    gelu = lambda v: jax.nn.gelu(v, approximate=False)     # torch F.gelu default
    inp = gelu(x @ params["w_in"] + params["b_in"][0])
    gate = gelu(x @ params["w_g"] + params["b_g"][0])
    lam = jax.nn.sigmoid(x @ params["w_l"] + params["b_l"][0])
    lam = lower_bound + (1.0 - lower_bound) * lam
    inp = (1.0 - lam) * inp

    def step(h, t):
        lam_t, in_t = t
        h = lam_t * h + in_t
        return h, h

    n, b, d = x.shape
    _, hid = lax.scan(step, jnp.zeros((b, d), jnp.float32), (lam, inp))
    hid = _layernorm(hid, params["g1"][0], params["be1"][0])
    out = (hid * gate) @ params["w_o"] + params["b_o"][0]
    out = _layernorm(out, params["g2"][0], params["be2"][0])
    return x + out


def init_params(key, d):
    # nn.Linear-style init: U(-1/sqrt(d), 1/sqrt(d)); LayerNorm gamma=1, beta=0.
    ks = jax.random.split(key, 8)
    k = d ** -0.5
    u = lambda kk, shape: jax.random.uniform(kk, shape, jnp.float32, -k, k)
    return dict(
        w_in=u(ks[0], (d, d)), b_in=u(ks[1], (1, d)),
        w_l=u(ks[2], (d, d)), b_l=u(ks[3], (1, d)),
        w_g=u(ks[4], (d, d)), b_g=u(ks[5], (1, d)),
        w_o=u(ks[6], (d, d)), b_o=u(ks[7], (1, d)),
        g1=jnp.ones((1, d), jnp.float32), be1=jnp.zeros((1, d), jnp.float32),
        g2=jnp.ones((1, d), jnp.float32), be2=jnp.zeros((1, d), jnp.float32),
    )


if __name__ == "__main__":
    key = jax.random.PRNGKey(0)
    kx1, kp1, kx2, kp2 = jax.random.split(key, 4)

    # Case 1: d=128 (one lane-vreg), n=64, seq_tile=16 -> 4 seq tiles x 2 chunks
    # (exercises in-chunk scan, cross-chunk and cross-tile carries).
    # Exact f32 MXU path, 1e-3 check, two lower_bound values.
    n, b, d = 64, 2, 128
    x = jax.random.normal(kx1, (n, b, d), jnp.float32)
    raw = init_params(kp1, d)
    prepped_f32 = prepare_params(raw, matmul_dtype=jnp.float32)
    for lbv in (0.0, 0.25):
        out = jax.block_until_ready(
            hgru_real_v6(x, prepped_f32, lower_bound=lbv, seq_tile=16))
        ref = hgru_ref(x, raw, lower_bound=lbv)
        assert out.shape == (n, b, d)
        err = float(jnp.max(jnp.abs(out - ref)))
        assert err < 1e-3, f"f32 d=128 lower_bound={lbv}: max abs err {err}"

    # Case 2: d=256 (two lane-vregs), n=40 with a non-dividing requested tile
    # (divisor fallback picks seq_tile=8 -> 5 seq tiles). f32 path at 1e-3, then
    # the default bf16 MXU path (f32 accumulation) at a looser tolerance.
    n, b, d = 40, 2, 256
    x = jax.random.normal(kx2, (n, b, d), jnp.float32)
    raw = init_params(kp2, d)
    ref = hgru_ref(x, raw, lower_bound=0.1)
    out32 = jax.block_until_ready(
        hgru_real_v6(x, prepare_params(raw, jnp.float32), 0.1, seq_tile=24))
    err32 = float(jnp.max(jnp.abs(out32 - ref)))
    assert err32 < 1e-3, f"f32 d=256: max abs err {err32}"
    outbf = jax.block_until_ready(
        hgru_real_v6(x, raw, 0.1, seq_tile=24, matmul_dtype=jnp.bfloat16))
    errbf = float(jnp.max(jnp.abs(outbf - ref)))
    assert errbf < 7.5e-2, f"bf16 d=256: max abs err {errbf}"

    print("KERNEL_OK")
</pallas_src>

<mosaic_0001>
module attributes {stable_mosaic.version = 11 : i64} {
  func.func @_hgru_kernel(%arg0: i32, %arg1: i32, %arg2: memref<1xf32, #tpu.memory_space<smem>>, %arg3: memref<1x16x128xf32, #tpu.memory_space<vmem>>, %arg4: memref<3x128x128xf32, #tpu.memory_space<vmem>>, %arg5: memref<3x128xf32, #tpu.memory_space<vmem>>, %arg6: memref<128x128xf32, #tpu.memory_space<vmem>>, %arg7: memref<1x128xf32, #tpu.memory_space<vmem>>, %arg8: memref<1x128xf32, #tpu.memory_space<vmem>>, %arg9: memref<1x128xf32, #tpu.memory_space<vmem>>, %arg10: memref<1x128xf32, #tpu.memory_space<vmem>>, %arg11: memref<1x128xf32, #tpu.memory_space<vmem>>, %arg12: memref<1x16x128xf32, #tpu.memory_space<vmem>>, %arg13: memref<16x128xf32, #tpu.memory_space<vmem>>, %arg14: memref<16x128xf32, #tpu.memory_space<vmem>>, %arg15: memref<16x128xf32, #tpu.memory_space<vmem>>, %arg16: memref<1x128xf32, #tpu.memory_space<vmem>>) attributes {dimension_semantics = [#tpu.dimension_semantics<parallel>, #tpu.dimension_semantics<arbitrary>], iteration_bounds = array<i64: 2, 4>, scalar_prefetch = 1 : i64, scratch_operands = 4 : i64, tpu.core_type = #tpu.core_type<tc>, window_params = [{transform_indices = @transform_0, window_bounds = array<i64: 1, 16, 128>}, {pipeline_mode = #tpu.pipeline_mode<synchronous>, transform_indices = @transform_1, window_bounds = array<i64: 3, 128, 128>}, {pipeline_mode = #tpu.pipeline_mode<synchronous>, transform_indices = @transform_2, window_bounds = array<i64: 3, 128>}, {pipeline_mode = #tpu.pipeline_mode<synchronous>, transform_indices = @transform_3, window_bounds = array<i64: 128, 128>}, {pipeline_mode = #tpu.pipeline_mode<synchronous>, transform_indices = @transform_4, window_bounds = array<i64: 1, 128>}, {pipeline_mode = #tpu.pipeline_mode<synchronous>, transform_indices = @transform_5, window_bounds = array<i64: 1, 128>}, {pipeline_mode = #tpu.pipeline_mode<synchronous>, transform_indices = @transform_6, window_bounds = array<i64: 1, 128>}, {pipeline_mode = #tpu.pipeline_mode<synchronous>, transform_indices = @transform_7, window_bounds = array<i64: 1, 128>}, {pipeline_mode = #tpu.pipeline_mode<synchronous>, transform_indices = @transform_8, window_bounds = array<i64: 1, 128>}, {transform_indices = @transform_9, window_bounds = array<i64: 1, 16, 128>}]} {
    %c0 = arith.constant 0 : index
    %0 = memref.load %arg2[%c0] : memref<1xf32, #tpu.memory_space<smem>>
    %c0_0 = arith.constant 0 : index
    %c0_1 = arith.constant 0 : index
    %c0_2 = arith.constant 0 : index
    %1 = vector.load %arg3[%c0_0, %c0_1, %c0_2] : memref<1x16x128xf32, #tpu.memory_space<vmem>>, vector<1x16x128xf32>
    %2 = vector.shape_cast %1 : vector<1x16x128xf32> to vector<16x128xf32>
    %c2 = arith.constant 2 : index
    %c0_3 = arith.constant 0 : index
    %c0_4 = arith.constant 0 : index
    %3 = vector.load %arg4[%c2, %c0_3, %c0_4] : memref<3x128x128xf32, #tpu.memory_space<vmem>>, vector<1x128x128xf32>
    %4 = vector.shape_cast %3 : vector<1x128x128xf32> to vector<128x128xf32>
    %cst = arith.constant dense<0.000000e+00> : vector<16x128xf32>
    %5 = tpu.matmul %2, %4, %cst {dimension_numbers = #tpu.dot_dimension_numbers<[1], [0], [0], [1], [0, 0, 1, 1], [], []>} : vector<16x128xf32>, vector<128x128xf32>, vector<16x128xf32> -> vector<16x128xf32>
    %c2_5 = arith.constant 2 : index
    %c0_6 = arith.constant 0 : index
    %6 = vector.load %arg5[%c2_5, %c0_6] : memref<3x128xf32, #tpu.memory_space<vmem>>, vector<1x128xf32>
    %7 = vector.broadcast %6 : vector<1x128xf32> to vector<16x128xf32>
    %8 = arith.addf %5, %7 : vector<16x128xf32>
    %c0_7 = arith.constant 0 : index
    %c0_8 = arith.constant 0 : index
    %9 = vector.load %arg15[%c0_7, %c0_8] : memref<16x128xf32, #tpu.memory_space<vmem>>, vector<16x128xf32>
    tpu.vector_store %arg15[%c0_7, %c0_8], %8 {strides = array<i32>} : memref<16x128xf32, #tpu.memory_space<vmem>>, vector<16x128xf32>,
    %c1 = arith.constant 1 : index
    %c0_9 = arith.constant 0 : index
    %c0_10 = arith.constant 0 : index
    %10 = vector.load %arg4[%c1, %c0_9, %c0_10] : memref<3x128x128xf32, #tpu.memory_space<vmem>>, vector<1x128x128xf32>
    %11 = vector.shape_cast %10 : vector<1x128x128xf32> to vector<128x128xf32>
    %cst_11 = arith.constant dense<0.000000e+00> : vector<16x128xf32>
    %12 = tpu.matmul %2, %11, %cst_11 {dimension_numbers = #tpu.dot_dimension_numbers<[1], [0], [0], [1], [0, 0, 1, 1], [], []>} : vector<16x128xf32>, vector<128x128xf32>, vector<16x128xf32> -> vector<16x128xf32>
    %c1_12 = arith.constant 1 : index
    %c0_13 = arith.constant 0 : index
    %13 = vector.load %arg5[%c1_12, %c0_13] : memref<3x128xf32, #tpu.memory_space<vmem>>, vector<1x128xf32>
    %14 = vector.broadcast %13 : vector<1x128xf32> to vector<16x128xf32>
    %15 = arith.addf %12, %14 : vector<16x128xf32>
    %16 = arith.negf %15 : vector<16x128xf32>
    %17 = math.exp %16 : vector<16x128xf32>
    %cst_14 = arith.constant 1.000000e+00 : f32
    %18 = vector.broadcast %cst_14 : f32 to vector<16x128xf32>
    %19 = arith.addf %18, %17 : vector<16x128xf32>
    %20 = arith.divf %18, %19 : vector<16x128xf32>
    %cst_15 = arith.constant 1.000000e+00 : f32
    %21 = arith.subf %cst_15, %0 : f32
    %22 = vector.broadcast %21 : f32 to vector<16x128xf32>
    %23 = arith.mulf %22, %20 : vector<16x128xf32>
    %24 = vector.broadcast %0 : f32 to vector<16x128xf32>
    %25 = arith.addf %24, %23 : vector<16x128xf32>
    %c0_16 = arith.constant 0 : index
    %c0_17 = arith.constant 0 : index
    %26 = vector.load %arg14[%c0_16, %c0_17] : memref<16x128xf32, #tpu.memory_space<vmem>>, vector<16x128xf32>
    tpu.vector_store %arg14[%c0_16, %c0_17], %25 {strides = array<i32>} : memref<16x128xf32, #tpu.memory_space<vmem>>, vector<16x128xf32>,
    %c0_18 = arith.constant 0 : index
    %c0_19 = arith.constant 0 : index
    %c0_20 = arith.constant 0 : index
    %27 = vector.load %arg4[%c0_18, %c0_19, %c0_20] : memref<3x128x128xf32, #tpu.memory_space<vmem>>, vector<1x128x128xf32>
    %28 = vector.shape_cast %27 : vector<1x128x128xf32> to vector<128x128xf32>
    %cst_21 = arith.constant dense<0.000000e+00> : vector<16x128xf32>
    %29 = tpu.matmul %2, %28, %cst_21 {dimension_numbers = #tpu.dot_dimension_numbers<[1], [0], [0], [1], [0, 0, 1, 1], [], []>} : vector<16x128xf32>, vector<128x128xf32>, vector<16x128xf32> -> vector<16x128xf32>
    %c0_22 = arith.constant 0 : index
    %c0_23 = arith.constant 0 : index
    %30 = vector.load %arg5[%c0_22, %c0_23] : memref<3x128xf32, #tpu.memory_space<vmem>>, vector<1x128xf32>
    %31 = vector.broadcast %30 : vector<1x128xf32> to vector<16x128xf32>
    %32 = arith.addf %29, %31 : vector<16x128xf32>
    %cst_24 = arith.constant 1.000000e+00 : f32
    %33 = vector.broadcast %cst_24 : f32 to vector<16x128xf32>
    %34 = arith.subf %33, %25 : vector<16x128xf32>
    %cst_25 = arith.constant 5.000000e-01 : f32
    %35 = vector.broadcast %cst_25 : f32 to vector<16x128xf32>
    %36 = arith.mulf %35, %32 : vector<16x128xf32>
    %cst_26 = arith.constant 0.707106769 : f32
    %37 = vector.broadcast %cst_26 : f32 to vector<16x128xf32>
    %38 = arith.mulf %32, %37 : vector<16x128xf32>
    %cst_27 = arith.constant 0.000000e+00 : f32
    %39 = vector.broadcast %cst_27 : f32 to vector<16x128xf32>
    %40 = arith.cmpf oge, %38, %39 : vector<16x128xf32>
    %cst_28 = arith.constant 1.000000e+00 : f32
    %cst_29 = arith.constant -1.000000e+00 : f32
    %41 = vector.broadcast %cst_28 : f32 to vector<16x128xf32>
    %42 = vector.broadcast %cst_29 : f32 to vector<16x128xf32>
    %43 = arith.select %40, %41, %42 : vector<16x128xi1>, vector<16x128xf32>
    %44 = math.absf %38 : vector<16x128xf32>
    %cst_30 = arith.constant 0.327591091 : f32
    %45 = vector.broadcast %cst_30 : f32 to vector<16x128xf32>
    %46 = arith.mulf %45, %44 : vector<16x128xf32>
    %cst_31 = arith.constant 1.000000e+00 : f32
    %47 = vector.broadcast %cst_31 : f32 to vector<16x128xf32>
    %48 = arith.addf %47, %46 : vector<16x128xf32>
    %49 = tpu.reciprocal %48 {approx = true} : vector<16x128xf32> -> vector<16x128xf32>
    %50 = arith.mulf %48, %49 : vector<16x128xf32>
    %cst_32 = arith.constant 2.000000e+00 : f32
    %51 = vector.broadcast %cst_32 : f32 to vector<16x128xf32>
    %52 = arith.subf %51, %50 : vector<16x128xf32>
    %53 = arith.mulf %49, %52 : vector<16x128xf32>
    %cst_33 = arith.constant 1.06140542 : f32
    %54 = vector.broadcast %cst_33 : f32 to vector<16x128xf32>
    %55 = arith.mulf %54, %53 : vector<16x128xf32>
    %cst_34 = arith.constant -1.45315206 : f32
    %56 = vector.broadcast %cst_34 : f32 to vector<16x128xf32>
    %57 = arith.addf %55, %56 : vector<16x128xf32>
    %58 = arith.mulf %57, %53 : vector<16x128xf32>
    %cst_35 = arith.constant 1.42141378 : f32
    %59 = vector.broadcast %cst_35 : f32 to vector<16x128xf32>
    %60 = arith.addf %58, %59 : vector<16x128xf32>
    %61 = arith.mulf %60, %53 : vector<16x128xf32>
    %cst_36 = arith.constant -0.284496725 : f32
    %62 = vector.broadcast %cst_36 : f32 to vector<16x128xf32>
    %63 = arith.addf %61, %62 : vector<16x128xf32>
    %64 = arith.mulf %63, %53 : vector<16x128xf32>
    %cst_37 = arith.constant 0.254829586 : f32
    %65 = vector.broadcast %cst_37 : f32 to vector<16x128xf32>
    %66 = arith.addf %64, %65 : vector<16x128xf32>
    %67 = arith.mulf %66, %53 : vector<16x128xf32>
    %cst_38 = arith.constant 0.000000e+00 : f32
    %68 = vector.broadcast %cst_38 : f32 to vector<16x128xf32>
    %69 = arith.subf %68, %44 : vector<16x128xf32>
    %70 = arith.mulf %69, %44 : vector<16x128xf32>
    %71 = math.exp %70 : vector<16x128xf32>
    %72 = arith.mulf %67, %71 : vector<16x128xf32>
    %cst_39 = arith.constant 1.000000e+00 : f32
    %73 = vector.broadcast %cst_39 : f32 to vector<16x128xf32>
    %74 = arith.subf %73, %72 : vector<16x128xf32>
    %75 = arith.mulf %43, %74 : vector<16x128xf32>
    %cst_40 = arith.constant 1.000000e+00 : f32
    %76 = vector.broadcast %cst_40 : f32 to vector<16x128xf32>
    %77 = arith.addf %76, %75 : vector<16x128xf32>
    %78 = arith.mulf %36, %77 : vector<16x128xf32>
    %79 = arith.mulf %34, %78 : vector<16x128xf32>
    %c0_41 = arith.constant 0 : index
    %c0_42 = arith.constant 0 : index
    %80 = vector.load %arg13[%c0_41, %c0_42] : memref<16x128xf32, #tpu.memory_space<vmem>>, vector<16x128xf32>
    tpu.vector_store %arg13[%c0_41, %c0_42], %79 {strides = array<i32>} : memref<16x128xf32, #tpu.memory_space<vmem>>, vector<16x128xf32>,
    %c0_i32 = arith.constant 0 : i32
    %81 = arith.cmpi eq, %arg1, %c0_i32 : i32
    %82 = arith.extui %81 : i1 to i32
    %c0_i32_43 = arith.constant 0 : i32
    %83 = arith.cmpi ne, %82, %c0_i32_43 : i32
    scf.if %83 {
      %cst_131 = arith.constant 0.000000e+00 : f32
      %278 = vector.broadcast %cst_131 : f32 to vector<1x128xf32>
      %c0_132 = arith.constant 0 : index
      %c0_133 = arith.constant 0 : index
      %279 = vector.load %arg16[%c0_132, %c0_133] : memref<1x128xf32, #tpu.memory_space<vmem>>, vector<1x128xf32>
      tpu.vector_store %arg16[%c0_132, %c0_133], %278 {strides = array<i32>} : memref<1x128xf32, #tpu.memory_space<vmem>>, vector<1x128xf32>,
    } else {
    }
    %c0_44 = arith.constant 0 : index
    %c0_45 = arith.constant 0 : index
    %84 = vector.load %arg16[%c0_44, %c0_45] : memref<1x128xf32, #tpu.memory_space<vmem>>, vector<1x128xf32>
    %c0_i32_46 = arith.constant 0 : i32
    %c8_i32 = arith.constant 8 : i32
    %85 = arith.muli %c0_i32_46, %c8_i32 : i32
    %86 = tpu.assume_multiple %85, 8 : i32
    %87 = arith.index_cast %86 : i32 to index
    %c0_47 = arith.constant 0 : index
    %88 = vector.load %arg14[%87, %c0_47] : memref<16x128xf32, #tpu.memory_space<vmem>>, vector<8x128xf32>
    %89 = arith.index_cast %86 : i32 to index
    %c0_48 = arith.constant 0 : index
    %90 = vector.load %arg13[%89, %c0_48] : memref<16x128xf32, #tpu.memory_space<vmem>>, vector<8x128xf32>
    %91 = tpu.iota {dimensions = array<i32: 0>} : vector<8x128xi32>
    %c1_i32 = arith.constant 1 : i32
    %92 = vector.broadcast %c1_i32 : i32 to vector<8x128xi32>
    %93 = arith.cmpi sge, %91, %92 : vector<8x128xi32>
    %c1_i32_49 = arith.constant 1 : i32
    %94 = tpu.dynamic_rotate %88 by %c1_i32_49 dim 0 : vector<8x128xf32>, i32 -> vector<8x128xf32>
    %cst_50 = arith.constant 1.000000e+00 : f32
    %95 = vector.broadcast %cst_50 : f32 to vector<8x128xf32>
    %96 = arith.select %93, %94, %95 : vector<8x128xi1>, vector<8x128xf32>
    %c1_i32_51 = arith.constant 1 : i32
    %97 = tpu.dynamic_rotate %90 by %c1_i32_51 dim 0 : vector<8x128xf32>, i32 -> vector<8x128xf32>
    %cst_52 = arith.constant 0.000000e+00 : f32
    %98 = vector.broadcast %cst_52 : f32 to vector<8x128xf32>
    %99 = arith.select %93, %97, %98 : vector<8x128xi1>, vector<8x128xf32>
    %100 = arith.mulf %88, %99 : vector<8x128xf32>
    %101 = arith.addf %100, %90 : vector<8x128xf32>
    %102 = arith.mulf %88, %96 : vector<8x128xf32>
    %c2_i32 = arith.constant 2 : i32
    %103 = vector.broadcast %c2_i32 : i32 to vector<8x128xi32>
    %104 = arith.cmpi sge, %91, %103 : vector<8x128xi32>
    %c2_i32_53 = arith.constant 2 : i32
    %105 = tpu.dynamic_rotate %102 by %c2_i32_53 dim 0 : vector<8x128xf32>, i32 -> vector<8x128xf32>
    %cst_54 = arith.constant 1.000000e+00 : f32
    %106 = vector.broadcast %cst_54 : f32 to vector<8x128xf32>
    %107 = arith.select %104, %105, %106 : vector<8x128xi1>, vector<8x128xf32>
    %c2_i32_55 = arith.constant 2 : i32
    %108 = tpu.dynamic_rotate %101 by %c2_i32_55 dim 0 : vector<8x128xf32>, i32 -> vector<8x128xf32>
    %cst_56 = arith.constant 0.000000e+00 : f32
    %109 = vector.broadcast %cst_56 : f32 to vector<8x128xf32>
    %110 = arith.select %104, %108, %109 : vector<8x128xi1>, vector<8x128xf32>
    %111 = arith.mulf %102, %110 : vector<8x128xf32>
    %112 = arith.addf %111, %101 : vector<8x128xf32>
    %113 = arith.mulf %102, %107 : vector<8x128xf32>
    %c4_i32 = arith.constant 4 : i32
    %114 = vector.broadcast %c4_i32 : i32 to vector<8x128xi32>
    %115 = arith.cmpi sge, %91, %114 : vector<8x128xi32>
    %c4_i32_57 = arith.constant 4 : i32
    %116 = tpu.dynamic_rotate %113 by %c4_i32_57 dim 0 : vector<8x128xf32>, i32 -> vector<8x128xf32>
    %cst_58 = arith.constant 1.000000e+00 : f32
    %117 = vector.broadcast %cst_58 : f32 to vector<8x128xf32>
    %118 = arith.select %115, %116, %117 : vector<8x128xi1>, vector<8x128xf32>
    %c4_i32_59 = arith.constant 4 : i32
    %119 = tpu.dynamic_rotate %112 by %c4_i32_59 dim 0 : vector<8x128xf32>, i32 -> vector<8x128xf32>
    %cst_60 = arith.constant 0.000000e+00 : f32
    %120 = vector.broadcast %cst_60 : f32 to vector<8x128xf32>
    %121 = arith.select %115, %119, %120 : vector<8x128xi1>, vector<8x128xf32>
    %122 = arith.mulf %113, %121 : vector<8x128xf32>
    %123 = arith.addf %122, %112 : vector<8x128xf32>
    %124 = arith.mulf %113, %118 : vector<8x128xf32>
    %125 = vector.broadcast %84 : vector<1x128xf32> to vector<8x128xf32>
    %126 = arith.mulf %124, %125 : vector<8x128xf32>
    %127 = arith.addf %126, %123 : vector<8x128xf32>
    %128 = arith.index_cast %86 : i32 to index
    %c0_61 = arith.constant 0 : index
    %129 = vector.load %arg13[%128, %c0_61] : memref<16x128xf32, #tpu.memory_space<vmem>>, vector<8x128xf32>
    tpu.vector_store %arg13[%128, %c0_61], %127 {strides = array<i32>} : memref<16x128xf32, #tpu.memory_space<vmem>>, vector<8x128xf32>,
    %130 = vector.extract_strided_slice %127 {offsets = [7, 0], sizes = [1, 128], strides = [1, 1]} : vector<8x128xf32> to vector<1x128xf32>
    %c1_i32_62 = arith.constant 1 : i32
    %c8_i32_63 = arith.constant 8 : i32
    %131 = arith.muli %c1_i32_62, %c8_i32_63 : i32
    %132 = tpu.assume_multiple %131, 8 : i32
    %133 = arith.index_cast %132 : i32 to index
    %c0_64 = arith.constant 0 : index
    %134 = vector.load %arg14[%133, %c0_64] : memref<16x128xf32, #tpu.memory_space<vmem>>, vector<8x128xf32>
    %135 = arith.index_cast %132 : i32 to index
    %c0_65 = arith.constant 0 : index
    %136 = vector.load %arg13[%135, %c0_65] : memref<16x128xf32, #tpu.memory_space<vmem>>, vector<8x128xf32>
    %137 = tpu.iota {dimensions = array<i32: 0>} : vector<8x128xi32>
    %c1_i32_66 = arith.constant 1 : i32
    %138 = vector.broadcast %c1_i32_66 : i32 to vector<8x128xi32>
    %139 = arith.cmpi sge, %137, %138 : vector<8x128xi32>
    %c1_i32_67 = arith.constant 1 : i32
    %140 = tpu.dynamic_rotate %134 by %c1_i32_67 dim 0 : vector<8x128xf32>, i32 -> vector<8x128xf32>
    %cst_68 = arith.constant 1.000000e+00 : f32
    %141 = vector.broadcast %cst_68 : f32 to vector<8x128xf32>
    %142 = arith.select %139, %140, %141 : vector<8x128xi1>, vector<8x128xf32>
    %c1_i32_69 = arith.constant 1 : i32
    %143 = tpu.dynamic_rotate %136 by %c1_i32_69 dim 0 : vector<8x128xf32>, i32 -> vector<8x128xf32>
    %cst_70 = arith.constant 0.000000e+00 : f32
    %144 = vector.broadcast %cst_70 : f32 to vector<8x128xf32>
    %145 = arith.select %139, %143, %144 : vector<8x128xi1>, vector<8x128xf32>
    %146 = arith.mulf %134, %145 : vector<8x128xf32>
    %147 = arith.addf %146, %136 : vector<8x128xf32>
    %148 = arith.mulf %134, %142 : vector<8x128xf32>
    %c2_i32_71 = arith.constant 2 : i32
    %149 = vector.broadcast %c2_i32_71 : i32 to vector<8x128xi32>
    %150 = arith.cmpi sge, %137, %149 : vector<8x128xi32>
    %c2_i32_72 = arith.constant 2 : i32
    %151 = tpu.dynamic_rotate %148 by %c2_i32_72 dim 0 : vector<8x128xf32>, i32 -> vector<8x128xf32>
    %cst_73 = arith.constant 1.000000e+00 : f32
    %152 = vector.broadcast %cst_73 : f32 to vector<8x128xf32>
    %153 = arith.select %150, %151, %152 : vector<8x128xi1>, vector<8x128xf32>
    %c2_i32_74 = arith.constant 2 : i32
    %154 = tpu.dynamic_rotate %147 by %c2_i32_74 dim 0 : vector<8x128xf32>, i32 -> vector<8x128xf32>
    %cst_75 = arith.constant 0.000000e+00 : f32
    %155 = vector.broadcast %cst_75 : f32 to vector<8x128xf32>
    %156 = arith.select %150, %154, %155 : vector<8x128xi1>, vector<8x128xf32>
    %157 = arith.mulf %148, %156 : vector<8x128xf32>
    %158 = arith.addf %157, %147 : vector<8x128xf32>
    %159 = arith.mulf %148, %153 : vector<8x128xf32>
    %c4_i32_76 = arith.constant 4 : i32
    %160 = vector.broadcast %c4_i32_76 : i32 to vector<8x128xi32>
    %161 = arith.cmpi sge, %137, %160 : vector<8x128xi32>
    %c4_i32_77 = arith.constant 4 : i32
    %162 = tpu.dynamic_rotate %159 by %c4_i32_77 dim 0 : vector<8x128xf32>, i32 -> vector<8x128xf32>
    %cst_78 = arith.constant 1.000000e+00 : f32
    %163 = vector.broadcast %cst_78 : f32 to vector<8x128xf32>
    %164 = arith.select %161, %162, %163 : vector<8x128xi1>, vector<8x128xf32>
    %c4_i32_79 = arith.constant 4 : i32
    %165 = tpu.dynamic_rotate %158 by %c4_i32_79 dim 0 : vector<8x128xf32>, i32 -> vector<8x128xf32>
    %cst_80 = arith.constant 0.000000e+00 : f32
    %166 = vector.broadcast %cst_80 : f32 to vector<8x128xf32>
    %167 = arith.select %161, %165, %166 : vector<8x128xi1>, vector<8x128xf32>
    %168 = arith.mulf %159, %167 : vector<8x128xf32>
    %169 = arith.addf %168, %158 : vector<8x128xf32>
    %170 = arith.mulf %159, %164 : vector<8x128xf32>
    %171 = vector.broadcast %130 : vector<1x128xf32> to vector<8x128xf32>
    %172 = arith.mulf %170, %171 : vector<8x128xf32>
    %173 = arith.addf %172, %169 : vector<8x128xf32>
    %174 = arith.index_cast %132 : i32 to index
    %c0_81 = arith.constant 0 : index
    %175 = vector.load %arg13[%174, %c0_81] : memref<16x128xf32, #tpu.memory_space<vmem>>, vector<8x128xf32>
    tpu.vector_store %arg13[%174, %c0_81], %173 {strides = array<i32>} : memref<16x128xf32, #tpu.memory_space<vmem>>, vector<8x128xf32>,
    %176 = vector.extract_strided_slice %173 {offsets = [7, 0], sizes = [1, 128], strides = [1, 1]} : vector<8x128xf32> to vector<1x128xf32>
    %c2_i32_82 = arith.constant 2 : i32
    %c0_83 = arith.constant 0 : index
    %c0_84 = arith.constant 0 : index
    %177 = vector.load %arg16[%c0_83, %c0_84] : memref<1x128xf32, #tpu.memory_space<vmem>>, vector<1x128xf32>
    tpu.vector_store %arg16[%c0_83, %c0_84], %176 {strides = array<i32>} : memref<1x128xf32, #tpu.memory_space<vmem>>, vector<1x128xf32>,
    %c0_85 = arith.constant 0 : index
    %c0_86 = arith.constant 0 : index
    %178 = vector.load %arg13[%c0_85, %c0_86] : memref<16x128xf32, #tpu.memory_space<vmem>>, vector<16x128xf32>
    %c0_87 = arith.constant 0 : index
    %c0_88 = arith.constant 0 : index
    %179 = vector.load %arg8[%c0_87, %c0_88] : memref<1x128xf32, #tpu.memory_space<vmem>>, vector<1x128xf32>
    %c0_89 = arith.constant 0 : index
    %c0_90 = arith.constant 0 : index
    %180 = vector.load %arg9[%c0_89, %c0_90] : memref<1x128xf32, #tpu.memory_space<vmem>>, vector<1x128xf32>
    %cst_91 = arith.constant dense<0.000000e+00> : vector<16xf32>
    %181 = vector.multi_reduction <add>, %178, %cst_91 [1] : vector<16x128xf32> to vector<16xf32>
    %182 = vector.shape_cast %181 : vector<16xf32> to vector<16x1xf32>
    %cst_92 = arith.constant 1.280000e+02 : f32
    %183 = vector.broadcast %cst_92 : f32 to vector<16x1xf32>
    %184 = arith.divf %182, %183 : vector<16x1xf32>
    %185 = vector.broadcast %184 : vector<16x1xf32> to vector<16x128xf32>
    %186 = arith.subf %178, %185 : vector<16x128xf32>
    %187 = arith.mulf %186, %186 : vector<16x128xf32>
    %cst_93 = arith.constant dense<0.000000e+00> : vector<16xf32>
    %188 = vector.multi_reduction <add>, %187, %cst_93 [1] : vector<16x128xf32> to vector<16xf32>
    %189 = vector.shape_cast %188 : vector<16xf32> to vector<16x1xf32>
    %cst_94 = arith.constant 1.280000e+02 : f32
    %190 = vector.broadcast %cst_94 : f32 to vector<16x1xf32>
    %191 = arith.divf %189, %190 : vector<16x1xf32>
    %cst_95 = arith.constant 9.99999974E-6 : f32
    %192 = vector.broadcast %cst_95 : f32 to vector<16x1xf32>
    %193 = arith.addf %191, %192 : vector<16x1xf32>
    %194 = math.rsqrt %193 : vector<16x1xf32>
    %195 = vector.broadcast %194 : vector<16x1xf32> to vector<16x128xf32>
    %196 = arith.mulf %186, %195 : vector<16x128xf32>
    %197 = vector.broadcast %179 : vector<1x128xf32> to vector<16x128xf32>
    %198 = arith.mulf %196, %197 : vector<16x128xf32>
    %199 = vector.broadcast %180 : vector<1x128xf32> to vector<16x128xf32>
    %200 = arith.addf %198, %199 : vector<16x128xf32>
    %c0_96 = arith.constant 0 : index
    %c0_97 = arith.constant 0 : index
    %201 = vector.load %arg15[%c0_96, %c0_97] : memref<16x128xf32, #tpu.memory_space<vmem>>, vector<16x128xf32>
    %cst_98 = arith.constant 5.000000e-01 : f32
    %202 = vector.broadcast %cst_98 : f32 to vector<16x128xf32>
    %203 = arith.mulf %202, %201 : vector<16x128xf32>
    %cst_99 = arith.constant 0.707106769 : f32
    %204 = vector.broadcast %cst_99 : f32 to vector<16x128xf32>
    %205 = arith.mulf %201, %204 : vector<16x128xf32>
    %cst_100 = arith.constant 0.000000e+00 : f32
    %206 = vector.broadcast %cst_100 : f32 to vector<16x128xf32>
    %207 = arith.cmpf oge, %205, %206 : vector<16x128xf32>
    %cst_101 = arith.constant 1.000000e+00 : f32
    %cst_102 = arith.constant -1.000000e+00 : f32
    %208 = vector.broadcast %cst_101 : f32 to vector<16x128xf32>
    %209 = vector.broadcast %cst_102 : f32 to vector<16x128xf32>
    %210 = arith.select %207, %208, %209 : vector<16x128xi1>, vector<16x128xf32>
    %211 = math.absf %205 : vector<16x128xf32>
    %cst_103 = arith.constant 0.327591091 : f32
    %212 = vector.broadcast %cst_103 : f32 to vector<16x128xf32>
    %213 = arith.mulf %212, %211 : vector<16x128xf32>
    %cst_104 = arith.constant 1.000000e+00 : f32
    %214 = vector.broadcast %cst_104 : f32 to vector<16x128xf32>
    %215 = arith.addf %214, %213 : vector<16x128xf32>
    %216 = tpu.reciprocal %215 {approx = true} : vector<16x128xf32> -> vector<16x128xf32>
    %217 = arith.mulf %215, %216 : vector<16x128xf32>
    %cst_105 = arith.constant 2.000000e+00 : f32
    %218 = vector.broadcast %cst_105 : f32 to vector<16x128xf32>
    %219 = arith.subf %218, %217 : vector<16x128xf32>
    %220 = arith.mulf %216, %219 : vector<16x128xf32>
    %cst_106 = arith.constant 1.06140542 : f32
    %221 = vector.broadcast %cst_106 : f32 to vector<16x128xf32>
    %222 = arith.mulf %221, %220 : vector<16x128xf32>
    %cst_107 = arith.constant -1.45315206 : f32
    %223 = vector.broadcast %cst_107 : f32 to vector<16x128xf32>
    %224 = arith.addf %222, %223 : vector<16x128xf32>
    %225 = arith.mulf %224, %220 : vector<16x128xf32>
    %cst_108 = arith.constant 1.42141378 : f32
    %226 = vector.broadcast %cst_108 : f32 to vector<16x128xf32>
    %227 = arith.addf %225, %226 : vector<16x128xf32>
    %228 = arith.mulf %227, %220 : vector<16x128xf32>
    %cst_109 = arith.constant -0.284496725 : f32
    %229 = vector.broadcast %cst_109 : f32 to vector<16x128xf32>
    %230 = arith.addf %228, %229 : vector<16x128xf32>
    %231 = arith.mulf %230, %220 : vector<16x128xf32>
    %cst_110 = arith.constant 0.254829586 : f32
    %232 = vector.broadcast %cst_110 : f32 to vector<16x128xf32>
    %233 = arith.addf %231, %232 : vector<16x128xf32>
    %234 = arith.mulf %233, %220 : vector<16x128xf32>
    %cst_111 = arith.constant 0.000000e+00 : f32
    %235 = vector.broadcast %cst_111 : f32 to vector<16x128xf32>
    %236 = arith.subf %235, %211 : vector<16x128xf32>
    %237 = arith.mulf %236, %211 : vector<16x128xf32>
    %238 = math.exp %237 : vector<16x128xf32>
    %239 = arith.mulf %234, %238 : vector<16x128xf32>
    %cst_112 = arith.constant 1.000000e+00 : f32
    %240 = vector.broadcast %cst_112 : f32 to vector<16x128xf32>
    %241 = arith.subf %240, %239 : vector<16x128xf32>
    %242 = arith.mulf %210, %241 : vector<16x128xf32>
    %cst_113 = arith.constant 1.000000e+00 : f32
    %243 = vector.broadcast %cst_113 : f32 to vector<16x128xf32>
    %244 = arith.addf %243, %242 : vector<16x128xf32>
    %245 = arith.mulf %203, %244 : vector<16x128xf32>
    %246 = arith.mulf %200, %245 : vector<16x128xf32>
    %c0_114 = arith.constant 0 : index
    %c0_115 = arith.constant 0 : index
    %247 = vector.load %arg6[%c0_114, %c0_115] : memref<128x128xf32, #tpu.memory_space<vmem>>, vector<128x128xf32>
    %cst_116 = arith.constant dense<0.000000e+00> : vector<16x128xf32>
    %248 = tpu.matmul %246, %247, %cst_116 {dimension_numbers = #tpu.dot_dimension_numbers<[1], [0], [0], [1], [0, 0, 1, 1], [], []>} : vector<16x128xf32>, vector<128x128xf32>, vector<16x128xf32> -> vector<16x128xf32>
    %c0_117 = arith.constant 0 : index
    %c0_118 = arith.constant 0 : index
    %249 = vector.load %arg7[%c0_117, %c0_118] : memref<1x128xf32, #tpu.memory_space<vmem>>, vector<1x128xf32>
    %250 = vector.broadcast %249 : vector<1x128xf32> to vector<16x128xf32>
    %251 = arith.addf %248, %250 : vector<16x128xf32>
    %c0_119 = arith.constant 0 : index
    %c0_120 = arith.constant 0 : index
    %252 = vector.load %arg10[%c0_119, %c0_120] : memref<1x128xf32, #tpu.memory_space<vmem>>, vector<1x128xf32>
    %c0_121 = arith.constant 0 : index
    %c0_122 = arith.constant 0 : index
    %253 = vector.load %arg11[%c0_121, %c0_122] : memref<1x128xf32, #tpu.memory_space<vmem>>, vector<1x128xf32>
    %cst_123 = arith.constant dense<0.000000e+00> : vector<16xf32>
    %254 = vector.multi_reduction <add>, %251, %cst_123 [1] : vector<16x128xf32> to vector<16xf32>
    %255 = vector.shape_cast %254 : vector<16xf32> to vector<16x1xf32>
    %cst_124 = arith.constant 1.280000e+02 : f32
    %256 = vector.broadcast %cst_124 : f32 to vector<16x1xf32>
    %257 = arith.divf %255, %256 : vector<16x1xf32>
    %258 = vector.broadcast %257 : vector<16x1xf32> to vector<16x128xf32>
    %259 = arith.subf %251, %258 : vector<16x128xf32>
    %260 = arith.mulf %259, %259 : vector<16x128xf32>
    %cst_125 = arith.constant dense<0.000000e+00> : vector<16xf32>
    %261 = vector.multi_reduction <add>, %260, %cst_125 [1] : vector<16x128xf32> to vector<16xf32>
    %262 = vector.shape_cast %261 : vector<16xf32> to vector<16x1xf32>
    %cst_126 = arith.constant 1.280000e+02 : f32
    %263 = vector.broadcast %cst_126 : f32 to vector<16x1xf32>
    %264 = arith.divf %262, %263 : vector<16x1xf32>
    %cst_127 = arith.constant 9.99999974E-6 : f32
    %265 = vector.broadcast %cst_127 : f32 to vector<16x1xf32>
    %266 = arith.addf %264, %265 : vector<16x1xf32>
    %267 = math.rsqrt %266 : vector<16x1xf32>
    %268 = vector.broadcast %267 : vector<16x1xf32> to vector<16x128xf32>
    %269 = arith.mulf %259, %268 : vector<16x128xf32>
    %270 = vector.broadcast %252 : vector<1x128xf32> to vector<16x128xf32>
    %271 = arith.mulf %269, %270 : vector<16x128xf32>
    %272 = vector.broadcast %253 : vector<1x128xf32> to vector<16x128xf32>
    %273 = arith.addf %271, %272 : vector<16x128xf32>
    %274 = arith.addf %2, %273 : vector<16x128xf32>
    %c0_128 = arith.constant 0 : index
    %c0_129 = arith.constant 0 : index
    %c0_130 = arith.constant 0 : index
    %275 = vector.load %arg12[%c0_128, %c0_129, %c0_130] : memref<1x16x128xf32, #tpu.memory_space<vmem>>, vector<1x16x128xf32>
    %276 = vector.shape_cast %275 : vector<1x16x128xf32> to vector<16x128xf32>
    %277 = vector.shape_cast %274 : vector<16x128xf32> to vector<1x16x128xf32>
    tpu.vector_store %arg12[%c0_128, %c0_129, %c0_130], %277 {strides = array<i32>} : memref<1x16x128xf32, #tpu.memory_space<vmem>>, vector<1x16x128xf32>,
    return
  }
  func.func @transform_0(%arg0: i32, %arg1: i32, %arg2: memref<1xf32, #tpu.memory_space<smem>>) -> (i32, i32, i32) {
    %c0_i32 = arith.constant 0 : i32
    %c0_i32_0 = arith.constant 0 : i32
    return %arg0, %arg1, %c0_i32 : i32, i32, i32
  }
  func.func @transform_1(%arg0: i32, %arg1: i32, %arg2: memref<1xf32, #tpu.memory_space<smem>>) -> (i32, i32, i32) {
    %c0_i32 = arith.constant 0 : i32
    %c0_i32_0 = arith.constant 0 : i32
    %c0_i32_1 = arith.constant 0 : i32
    %c0_i32_2 = arith.constant 0 : i32
    return %c0_i32, %c0_i32_0, %c0_i32_1 : i32, i32, i32
  }
  func.func @transform_2(%arg0: i32, %arg1: i32, %arg2: memref<1xf32, #tpu.memory_space<smem>>) -> (i32, i32) {
    %c0_i32 = arith.constant 0 : i32
    %c0_i32_0 = arith.constant 0 : i32
    %c0_i32_1 = arith.constant 0 : i32
    return %c0_i32, %c0_i32_0 : i32, i32
  }
  func.func @transform_3(%arg0: i32, %arg1: i32, %arg2: memref<1xf32, #tpu.memory_space<smem>>) -> (i32, i32) {
    %c0_i32 = arith.constant 0 : i32
    %c0_i32_0 = arith.constant 0 : i32
    %c0_i32_1 = arith.constant 0 : i32
    return %c0_i32, %c0_i32_0 : i32, i32
  }
  func.func @transform_4(%arg0: i32, %arg1: i32, %arg2: memref<1xf32, #tpu.memory_space<smem>>) -> (i32, i32) {
    %c0_i32 = arith.constant 0 : i32
    %c0_i32_0 = arith.constant 0 : i32
    %c0_i32_1 = arith.constant 0 : i32
    return %c0_i32, %c0_i32_0 : i32, i32
  }
  func.func @transform_5(%arg0: i32, %arg1: i32, %arg2: memref<1xf32, #tpu.memory_space<smem>>) -> (i32, i32) {
    %c0_i32 = arith.constant 0 : i32
    %c0_i32_0 = arith.constant 0 : i32
    %c0_i32_1 = arith.constant 0 : i32
    return %c0_i32, %c0_i32_0 : i32, i32
  }
  func.func @transform_6(%arg0: i32, %arg1: i32, %arg2: memref<1xf32, #tpu.memory_space<smem>>) -> (i32, i32) {
    %c0_i32 = arith.constant 0 : i32
    %c0_i32_0 = arith.constant 0 : i32
    %c0_i32_1 = arith.constant 0 : i32
    return %c0_i32, %c0_i32_0 : i32, i32
  }
  func.func @transform_7(%arg0: i32, %arg1: i32, %arg2: memref<1xf32, #tpu.memory_space<smem>>) -> (i32, i32) {
    %c0_i32 = arith.constant 0 : i32
    %c0_i32_0 = arith.constant 0 : i32
    %c0_i32_1 = arith.constant 0 : i32
    return %c0_i32, %c0_i32_0 : i32, i32
  }
  func.func @transform_8(%arg0: i32, %arg1: i32, %arg2: memref<1xf32, #tpu.memory_space<smem>>) -> (i32, i32) {
    %c0_i32 = arith.constant 0 : i32
    %c0_i32_0 = arith.constant 0 : i32
    %c0_i32_1 = arith.constant 0 : i32
    return %c0_i32, %c0_i32_0 : i32, i32
  }
  func.func @transform_9(%arg0: i32, %arg1: i32, %arg2: memref<1xf32, #tpu.memory_space<smem>>) -> (i32, i32, i32) {
    %c0_i32 = arith.constant 0 : i32
    %c0_i32_0 = arith.constant 0 : i32
    return %arg0, %arg1, %c0_i32 : i32, i32, i32
  }
}

module attributes {stable_mosaic.version = 11 : i64} {
  func.func @_hgru_kernel(%arg0: i32, %arg1: i32, %arg2: memref<1xf32, #tpu.memory_space<smem>>, %arg3: memref<1x16x128xf32, #tpu.memory_space<vmem>>, %arg4: memref<3x128x128xf32, #tpu.memory_space<vmem>>, %arg5: memref<3x128xf32, #tpu.memory_space<vmem>>, %arg6: memref<128x128xf32, #tpu.memory_space<vmem>>, %arg7: memref<1x128xf32, #tpu.memory_space<vmem>>, %arg8: memref<1x128xf32, #tpu.memory_space<vmem>>, %arg9: memref<1x128xf32, #tpu.memory_space<vmem>>, %arg10: memref<1x128xf32, #tpu.memory_space<vmem>>, %arg11: memref<1x128xf32, #tpu.memory_space<vmem>>, %arg12: memref<1x16x128xf32, #tpu.memory_space<vmem>>, %arg13: memref<16x128xf32, #tpu.memory_space<vmem>>, %arg14: memref<16x128xf32, #tpu.memory_space<vmem>>, %arg15: memref<16x128xf32, #tpu.memory_space<vmem>>, %arg16: memref<1x128xf32, #tpu.memory_space<vmem>>) attributes {dimension_semantics = [#tpu.dimension_semantics<parallel>, #tpu.dimension_semantics<arbitrary>], iteration_bounds = array<i64: 2, 4>, scalar_prefetch = 1 : i64, scratch_operands = 4 : i64, tpu.core_type = #tpu.core_type<tc>, window_params = [{transform_indices = @transform_0, window_bounds = array<i64: 1, 16, 128>}, {pipeline_mode = #tpu.pipeline_mode<synchronous>, transform_indices = @transform_1, window_bounds = array<i64: 3, 128, 128>}, {pipeline_mode = #tpu.pipeline_mode<synchronous>, transform_indices = @transform_2, window_bounds = array<i64: 3, 128>}, {pipeline_mode = #tpu.pipeline_mode<synchronous>, transform_indices = @transform_3, window_bounds = array<i64: 128, 128>}, {pipeline_mode = #tpu.pipeline_mode<synchronous>, transform_indices = @transform_4, window_bounds = array<i64: 1, 128>}, {pipeline_mode = #tpu.pipeline_mode<synchronous>, transform_indices = @transform_5, window_bounds = array<i64: 1, 128>}, {pipeline_mode = #tpu.pipeline_mode<synchronous>, transform_indices = @transform_6, window_bounds = array<i64: 1, 128>}, {pipeline_mode = #tpu.pipeline_mode<synchronous>, transform_indices = @transform_7, window_bounds = array<i64: 1, 128>}, {pipeline_mode = #tpu.pipeline_mode<synchronous>, transform_indices = @transform_8, window_bounds = array<i64: 1, 128>}, {transform_indices = @transform_9, window_bounds = array<i64: 1, 16, 128>}]} {
    %c0 = arith.constant 0 : index
    %0 = memref.load %arg2[%c0] : memref<1xf32, #tpu.memory_space<smem>>
    %c0_0 = arith.constant 0 : index
    %c0_1 = arith.constant 0 : index
    %c0_2 = arith.constant 0 : index
    %1 = vector.load %arg3[%c0_0, %c0_1, %c0_2] : memref<1x16x128xf32, #tpu.memory_space<vmem>>, vector<1x16x128xf32>
    %2 = vector.shape_cast %1 : vector<1x16x128xf32> to vector<16x128xf32>
    %c2 = arith.constant 2 : index
    %c0_3 = arith.constant 0 : index
    %c0_4 = arith.constant 0 : index
    %3 = vector.load %arg4[%c2, %c0_3, %c0_4] : memref<3x128x128xf32, #tpu.memory_space<vmem>>, vector<1x128x128xf32>
    %4 = vector.shape_cast %3 : vector<1x128x128xf32> to vector<128x128xf32>
    %cst = arith.constant dense<0.000000e+00> : vector<16x128xf32>
    %5 = tpu.matmul %2, %4, %cst {dimension_numbers = #tpu.dot_dimension_numbers<[1], [0], [0], [1], [0, 0, 1, 1], [], []>} : vector<16x128xf32>, vector<128x128xf32>, vector<16x128xf32> -> vector<16x128xf32>
    %c2_5 = arith.constant 2 : index
    %c0_6 = arith.constant 0 : index
    %6 = vector.load %arg5[%c2_5, %c0_6] : memref<3x128xf32, #tpu.memory_space<vmem>>, vector<1x128xf32>
    %7 = vector.broadcast %6 : vector<1x128xf32> to vector<16x128xf32>
    %8 = arith.addf %5, %7 : vector<16x128xf32>
    %c0_7 = arith.constant 0 : index
    %c0_8 = arith.constant 0 : index
    %9 = vector.load %arg15[%c0_7, %c0_8] : memref<16x128xf32, #tpu.memory_space<vmem>>, vector<16x128xf32>
    tpu.vector_store %arg15[%c0_7, %c0_8], %8 {strides = array<i32>} : memref<16x128xf32, #tpu.memory_space<vmem>>, vector<16x128xf32>,
    %c1 = arith.constant 1 : index
    %c0_9 = arith.constant 0 : index
    %c0_10 = arith.constant 0 : index
    %10 = vector.load %arg4[%c1, %c0_9, %c0_10] : memref<3x128x128xf32, #tpu.memory_space<vmem>>, vector<1x128x128xf32>
    %11 = vector.shape_cast %10 : vector<1x128x128xf32> to vector<128x128xf32>
    %cst_11 = arith.constant dense<0.000000e+00> : vector<16x128xf32>
    %12 = tpu.matmul %2, %11, %cst_11 {dimension_numbers = #tpu.dot_dimension_numbers<[1], [0], [0], [1], [0, 0, 1, 1], [], []>} : vector<16x128xf32>, vector<128x128xf32>, vector<16x128xf32> -> vector<16x128xf32>
    %c1_12 = arith.constant 1 : index
    %c0_13 = arith.constant 0 : index
    %13 = vector.load %arg5[%c1_12, %c0_13] : memref<3x128xf32, #tpu.memory_space<vmem>>, vector<1x128xf32>
    %14 = vector.broadcast %13 : vector<1x128xf32> to vector<16x128xf32>
    %15 = arith.addf %12, %14 : vector<16x128xf32>
    %16 = arith.negf %15 : vector<16x128xf32>
    %17 = math.exp %16 : vector<16x128xf32>
    %cst_14 = arith.constant 1.000000e+00 : f32
    %18 = vector.broadcast %cst_14 : f32 to vector<16x128xf32>
    %19 = arith.addf %18, %17 : vector<16x128xf32>
    %20 = arith.divf %18, %19 : vector<16x128xf32>
    %cst_15 = arith.constant 1.000000e+00 : f32
    %21 = arith.subf %cst_15, %0 : f32
    %22 = vector.broadcast %21 : f32 to vector<16x128xf32>
    %23 = arith.mulf %22, %20 : vector<16x128xf32>
    %24 = vector.broadcast %0 : f32 to vector<16x128xf32>
    %25 = arith.addf %24, %23 : vector<16x128xf32>
    %c0_16 = arith.constant 0 : index
    %c0_17 = arith.constant 0 : index
    %26 = vector.load %arg14[%c0_16, %c0_17] : memref<16x128xf32, #tpu.memory_space<vmem>>, vector<16x128xf32>
    tpu.vector_store %arg14[%c0_16, %c0_17], %25 {strides = array<i32>} : memref<16x128xf32, #tpu.memory_space<vmem>>, vector<16x128xf32>,
    %c0_18 = arith.constant 0 : index
    %c0_19 = arith.constant 0 : index
    %c0_20 = arith.constant 0 : index
    %27 = vector.load %arg4[%c0_18, %c0_19, %c0_20] : memref<3x128x128xf32, #tpu.memory_space<vmem>>, vector<1x128x128xf32>
    %28 = vector.shape_cast %27 : vector<1x128x128xf32> to vector<128x128xf32>
    %cst_21 = arith.constant dense<0.000000e+00> : vector<16x128xf32>
    %29 = tpu.matmul %2, %28, %cst_21 {dimension_numbers = #tpu.dot_dimension_numbers<[1], [0], [0], [1], [0, 0, 1, 1], [], []>} : vector<16x128xf32>, vector<128x128xf32>, vector<16x128xf32> -> vector<16x128xf32>
    %c0_22 = arith.constant 0 : index
    %c0_23 = arith.constant 0 : index
    %30 = vector.load %arg5[%c0_22, %c0_23] : memref<3x128xf32, #tpu.memory_space<vmem>>, vector<1x128xf32>
    %31 = vector.broadcast %30 : vector<1x128xf32> to vector<16x128xf32>
    %32 = arith.addf %29, %31 : vector<16x128xf32>
    %cst_24 = arith.constant 1.000000e+00 : f32
    %33 = vector.broadcast %cst_24 : f32 to vector<16x128xf32>
    %34 = arith.subf %33, %25 : vector<16x128xf32>
    %cst_25 = arith.constant 5.000000e-01 : f32
    %35 = vector.broadcast %cst_25 : f32 to vector<16x128xf32>
    %36 = arith.mulf %35, %32 : vector<16x128xf32>
    %cst_26 = arith.constant 0.707106769 : f32
    %37 = vector.broadcast %cst_26 : f32 to vector<16x128xf32>
    %38 = arith.mulf %32, %37 : vector<16x128xf32>
    %cst_27 = arith.constant 0.000000e+00 : f32
    %39 = vector.broadcast %cst_27 : f32 to vector<16x128xf32>
    %40 = arith.cmpf oge, %38, %39 : vector<16x128xf32>
    %cst_28 = arith.constant 1.000000e+00 : f32
    %cst_29 = arith.constant -1.000000e+00 : f32
    %41 = vector.broadcast %cst_28 : f32 to vector<16x128xf32>
    %42 = vector.broadcast %cst_29 : f32 to vector<16x128xf32>
    %43 = arith.select %40, %41, %42 : vector<16x128xi1>, vector<16x128xf32>
    %44 = math.absf %38 : vector<16x128xf32>
    %cst_30 = arith.constant 0.327591091 : f32
    %45 = vector.broadcast %cst_30 : f32 to vector<16x128xf32>
    %46 = arith.mulf %45, %44 : vector<16x128xf32>
    %cst_31 = arith.constant 1.000000e+00 : f32
    %47 = vector.broadcast %cst_31 : f32 to vector<16x128xf32>
    %48 = arith.addf %47, %46 : vector<16x128xf32>
    %49 = tpu.reciprocal %48 {approx = true} : vector<16x128xf32> -> vector<16x128xf32>
    %50 = arith.mulf %48, %49 : vector<16x128xf32>
    %cst_32 = arith.constant 2.000000e+00 : f32
    %51 = vector.broadcast %cst_32 : f32 to vector<16x128xf32>
    %52 = arith.subf %51, %50 : vector<16x128xf32>
    %53 = arith.mulf %49, %52 : vector<16x128xf32>
    %cst_33 = arith.constant 1.06140542 : f32
    %54 = vector.broadcast %cst_33 : f32 to vector<16x128xf32>
    %55 = arith.mulf %54, %53 : vector<16x128xf32>
    %cst_34 = arith.constant -1.45315206 : f32
    %56 = vector.broadcast %cst_34 : f32 to vector<16x128xf32>
    %57 = arith.addf %55, %56 : vector<16x128xf32>
    %58 = arith.mulf %57, %53 : vector<16x128xf32>
    %cst_35 = arith.constant 1.42141378 : f32
    %59 = vector.broadcast %cst_35 : f32 to vector<16x128xf32>
    %60 = arith.addf %58, %59 : vector<16x128xf32>
    %61 = arith.mulf %60, %53 : vector<16x128xf32>
    %cst_36 = arith.constant -0.284496725 : f32
    %62 = vector.broadcast %cst_36 : f32 to vector<16x128xf32>
    %63 = arith.addf %61, %62 : vector<16x128xf32>
    %64 = arith.mulf %63, %53 : vector<16x128xf32>
    %cst_37 = arith.constant 0.254829586 : f32
    %65 = vector.broadcast %cst_37 : f32 to vector<16x128xf32>
    %66 = arith.addf %64, %65 : vector<16x128xf32>
    %67 = arith.mulf %66, %53 : vector<16x128xf32>
    %cst_38 = arith.constant 0.000000e+00 : f32
    %68 = vector.broadcast %cst_38 : f32 to vector<16x128xf32>
    %69 = arith.subf %68, %44 : vector<16x128xf32>
    %70 = arith.mulf %69, %44 : vector<16x128xf32>
    %71 = math.exp %70 : vector<16x128xf32>
    %72 = arith.mulf %67, %71 : vector<16x128xf32>
    %cst_39 = arith.constant 1.000000e+00 : f32
    %73 = vector.broadcast %cst_39 : f32 to vector<16x128xf32>
    %74 = arith.subf %73, %72 : vector<16x128xf32>
    %75 = arith.mulf %43, %74 : vector<16x128xf32>
    %cst_40 = arith.constant 1.000000e+00 : f32
    %76 = vector.broadcast %cst_40 : f32 to vector<16x128xf32>
    %77 = arith.addf %76, %75 : vector<16x128xf32>
    %78 = arith.mulf %36, %77 : vector<16x128xf32>
    %79 = arith.mulf %34, %78 : vector<16x128xf32>
    %c0_41 = arith.constant 0 : index
    %c0_42 = arith.constant 0 : index
    %80 = vector.load %arg13[%c0_41, %c0_42] : memref<16x128xf32, #tpu.memory_space<vmem>>, vector<16x128xf32>
    tpu.vector_store %arg13[%c0_41, %c0_42], %79 {strides = array<i32>} : memref<16x128xf32, #tpu.memory_space<vmem>>, vector<16x128xf32>,
    %c0_i32 = arith.constant 0 : i32
    %81 = arith.cmpi eq, %arg1, %c0_i32 : i32
    %82 = arith.extui %81 : i1 to i32
    %c0_i32_43 = arith.constant 0 : i32
    %83 = arith.cmpi ne, %82, %c0_i32_43 : i32
    scf.if %83 {
      %cst_131 = arith.constant 0.000000e+00 : f32
      %278 = vector.broadcast %cst_131 : f32 to vector<1x128xf32>
      %c0_132 = arith.constant 0 : index
      %c0_133 = arith.constant 0 : index
      %279 = vector.load %arg16[%c0_132, %c0_133] : memref<1x128xf32, #tpu.memory_space<vmem>>, vector<1x128xf32>
      tpu.vector_store %arg16[%c0_132, %c0_133], %278 {strides = array<i32>} : memref<1x128xf32, #tpu.memory_space<vmem>>, vector<1x128xf32>,
    } else {
    }
    %c0_44 = arith.constant 0 : index
    %c0_45 = arith.constant 0 : index
    %84 = vector.load %arg16[%c0_44, %c0_45] : memref<1x128xf32, #tpu.memory_space<vmem>>, vector<1x128xf32>
    %c0_i32_46 = arith.constant 0 : i32
    %c8_i32 = arith.constant 8 : i32
    %85 = arith.muli %c0_i32_46, %c8_i32 : i32
    %86 = tpu.assume_multiple %85, 8 : i32
    %87 = arith.index_cast %86 : i32 to index
    %c0_47 = arith.constant 0 : index
    %88 = vector.load %arg14[%87, %c0_47] : memref<16x128xf32, #tpu.memory_space<vmem>>, vector<8x128xf32>
    %89 = arith.index_cast %86 : i32 to index
    %c0_48 = arith.constant 0 : index
    %90 = vector.load %arg13[%89, %c0_48] : memref<16x128xf32, #tpu.memory_space<vmem>>, vector<8x128xf32>
    %91 = tpu.iota {dimensions = array<i32: 0>} : vector<8x128xi32>
    %c1_i32 = arith.constant 1 : i32
    %92 = vector.broadcast %c1_i32 : i32 to vector<8x128xi32>
    %93 = arith.cmpi sge, %91, %92 : vector<8x128xi32>
    %c1_i32_49 = arith.constant 1 : i32
    %94 = tpu.dynamic_rotate %88 by %c1_i32_49 dim 0 : vector<8x128xf32>, i32 -> vector<8x128xf32>
    %cst_50 = arith.constant 1.000000e+00 : f32
    %95 = vector.broadcast %cst_50 : f32 to vector<8x128xf32>
    %96 = arith.select %93, %94, %95 : vector<8x128xi1>, vector<8x128xf32>
    %c1_i32_51 = arith.constant 1 : i32
    %97 = tpu.dynamic_rotate %90 by %c1_i32_51 dim 0 : vector<8x128xf32>, i32 -> vector<8x128xf32>
    %cst_52 = arith.constant 0.000000e+00 : f32
    %98 = vector.broadcast %cst_52 : f32 to vector<8x128xf32>
    %99 = arith.select %93, %97, %98 : vector<8x128xi1>, vector<8x128xf32>
    %100 = arith.mulf %88, %99 : vector<8x128xf32>
    %101 = arith.addf %100, %90 : vector<8x128xf32>
    %102 = arith.mulf %88, %96 : vector<8x128xf32>
    %c2_i32 = arith.constant 2 : i32
    %103 = vector.broadcast %c2_i32 : i32 to vector<8x128xi32>
    %104 = arith.cmpi sge, %91, %103 : vector<8x128xi32>
    %c2_i32_53 = arith.constant 2 : i32
    %105 = tpu.dynamic_rotate %102 by %c2_i32_53 dim 0 : vector<8x128xf32>, i32 -> vector<8x128xf32>
    %cst_54 = arith.constant 1.000000e+00 : f32
    %106 = vector.broadcast %cst_54 : f32 to vector<8x128xf32>
    %107 = arith.select %104, %105, %106 : vector<8x128xi1>, vector<8x128xf32>
    %c2_i32_55 = arith.constant 2 : i32
    %108 = tpu.dynamic_rotate %101 by %c2_i32_55 dim 0 : vector<8x128xf32>, i32 -> vector<8x128xf32>
    %cst_56 = arith.constant 0.000000e+00 : f32
    %109 = vector.broadcast %cst_56 : f32 to vector<8x128xf32>
    %110 = arith.select %104, %108, %109 : vector<8x128xi1>, vector<8x128xf32>
    %111 = arith.mulf %102, %110 : vector<8x128xf32>
    %112 = arith.addf %111, %101 : vector<8x128xf32>
    %113 = arith.mulf %102, %107 : vector<8x128xf32>
    %c4_i32 = arith.constant 4 : i32
    %114 = vector.broadcast %c4_i32 : i32 to vector<8x128xi32>
    %115 = arith.cmpi sge, %91, %114 : vector<8x128xi32>
    %c4_i32_57 = arith.constant 4 : i32
    %116 = tpu.dynamic_rotate %113 by %c4_i32_57 dim 0 : vector<8x128xf32>, i32 -> vector<8x128xf32>
    %cst_58 = arith.constant 1.000000e+00 : f32
    %117 = vector.broadcast %cst_58 : f32 to vector<8x128xf32>
    %118 = arith.select %115, %116, %117 : vector<8x128xi1>, vector<8x128xf32>
    %c4_i32_59 = arith.constant 4 : i32
    %119 = tpu.dynamic_rotate %112 by %c4_i32_59 dim 0 : vector<8x128xf32>, i32 -> vector<8x128xf32>
    %cst_60 = arith.constant 0.000000e+00 : f32
    %120 = vector.broadcast %cst_60 : f32 to vector<8x128xf32>
    %121 = arith.select %115, %119, %120 : vector<8x128xi1>, vector<8x128xf32>
    %122 = arith.mulf %113, %121 : vector<8x128xf32>
    %123 = arith.addf %122, %112 : vector<8x128xf32>
    %124 = arith.mulf %113, %118 : vector<8x128xf32>
    %125 = vector.broadcast %84 : vector<1x128xf32> to vector<8x128xf32>
    %126 = arith.mulf %124, %125 : vector<8x128xf32>
    %127 = arith.addf %126, %123 : vector<8x128xf32>
    %128 = arith.index_cast %86 : i32 to index
    %c0_61 = arith.constant 0 : index
    %129 = vector.load %arg13[%128, %c0_61] : memref<16x128xf32, #tpu.memory_space<vmem>>, vector<8x128xf32>
    tpu.vector_store %arg13[%128, %c0_61], %127 {strides = array<i32>} : memref<16x128xf32, #tpu.memory_space<vmem>>, vector<8x128xf32>,
    %130 = vector.extract_strided_slice %127 {offsets = [7, 0], sizes = [1, 128], strides = [1, 1]} : vector<8x128xf32> to vector<1x128xf32>
    %c1_i32_62 = arith.constant 1 : i32
    %c8_i32_63 = arith.constant 8 : i32
    %131 = arith.muli %c1_i32_62, %c8_i32_63 : i32
    %132 = tpu.assume_multiple %131, 8 : i32
    %133 = arith.index_cast %132 : i32 to index
    %c0_64 = arith.constant 0 : index
    %134 = vector.load %arg14[%133, %c0_64] : memref<16x128xf32, #tpu.memory_space<vmem>>, vector<8x128xf32>
    %135 = arith.index_cast %132 : i32 to index
    %c0_65 = arith.constant 0 : index
    %136 = vector.load %arg13[%135, %c0_65] : memref<16x128xf32, #tpu.memory_space<vmem>>, vector<8x128xf32>
    %137 = tpu.iota {dimensions = array<i32: 0>} : vector<8x128xi32>
    %c1_i32_66 = arith.constant 1 : i32
    %138 = vector.broadcast %c1_i32_66 : i32 to vector<8x128xi32>
    %139 = arith.cmpi sge, %137, %138 : vector<8x128xi32>
    %c1_i32_67 = arith.constant 1 : i32
    %140 = tpu.dynamic_rotate %134 by %c1_i32_67 dim 0 : vector<8x128xf32>, i32 -> vector<8x128xf32>
    %cst_68 = arith.constant 1.000000e+00 : f32
    %141 = vector.broadcast %cst_68 : f32 to vector<8x128xf32>
    %142 = arith.select %139, %140, %141 : vector<8x128xi1>, vector<8x128xf32>
    %c1_i32_69 = arith.constant 1 : i32
    %143 = tpu.dynamic_rotate %136 by %c1_i32_69 dim 0 : vector<8x128xf32>, i32 -> vector<8x128xf32>
    %cst_70 = arith.constant 0.000000e+00 : f32
    %144 = vector.broadcast %cst_70 : f32 to vector<8x128xf32>
    %145 = arith.select %139, %143, %144 : vector<8x128xi1>, vector<8x128xf32>
    %146 = arith.mulf %134, %145 : vector<8x128xf32>
    %147 = arith.addf %146, %136 : vector<8x128xf32>
    %148 = arith.mulf %134, %142 : vector<8x128xf32>
    %c2_i32_71 = arith.constant 2 : i32
    %149 = vector.broadcast %c2_i32_71 : i32 to vector<8x128xi32>
    %150 = arith.cmpi sge, %137, %149 : vector<8x128xi32>
    %c2_i32_72 = arith.constant 2 : i32
    %151 = tpu.dynamic_rotate %148 by %c2_i32_72 dim 0 : vector<8x128xf32>, i32 -> vector<8x128xf32>
    %cst_73 = arith.constant 1.000000e+00 : f32
    %152 = vector.broadcast %cst_73 : f32 to vector<8x128xf32>
    %153 = arith.select %150, %151, %152 : vector<8x128xi1>, vector<8x128xf32>
    %c2_i32_74 = arith.constant 2 : i32
    %154 = tpu.dynamic_rotate %147 by %c2_i32_74 dim 0 : vector<8x128xf32>, i32 -> vector<8x128xf32>
    %cst_75 = arith.constant 0.000000e+00 : f32
    %155 = vector.broadcast %cst_75 : f32 to vector<8x128xf32>
    %156 = arith.select %150, %154, %155 : vector<8x128xi1>, vector<8x128xf32>
    %157 = arith.mulf %148, %156 : vector<8x128xf32>
    %158 = arith.addf %157, %147 : vector<8x128xf32>
    %159 = arith.mulf %148, %153 : vector<8x128xf32>
    %c4_i32_76 = arith.constant 4 : i32
    %160 = vector.broadcast %c4_i32_76 : i32 to vector<8x128xi32>
    %161 = arith.cmpi sge, %137, %160 : vector<8x128xi32>
    %c4_i32_77 = arith.constant 4 : i32
    %162 = tpu.dynamic_rotate %159 by %c4_i32_77 dim 0 : vector<8x128xf32>, i32 -> vector<8x128xf32>
    %cst_78 = arith.constant 1.000000e+00 : f32
    %163 = vector.broadcast %cst_78 : f32 to vector<8x128xf32>
    %164 = arith.select %161, %162, %163 : vector<8x128xi1>, vector<8x128xf32>
    %c4_i32_79 = arith.constant 4 : i32
    %165 = tpu.dynamic_rotate %158 by %c4_i32_79 dim 0 : vector<8x128xf32>, i32 -> vector<8x128xf32>
    %cst_80 = arith.constant 0.000000e+00 : f32
    %166 = vector.broadcast %cst_80 : f32 to vector<8x128xf32>
    %167 = arith.select %161, %165, %166 : vector<8x128xi1>, vector<8x128xf32>
    %168 = arith.mulf %159, %167 : vector<8x128xf32>
    %169 = arith.addf %168, %158 : vector<8x128xf32>
    %170 = arith.mulf %159, %164 : vector<8x128xf32>
    %171 = vector.broadcast %130 : vector<1x128xf32> to vector<8x128xf32>
    %172 = arith.mulf %170, %171 : vector<8x128xf32>
    %173 = arith.addf %172, %169 : vector<8x128xf32>
    %174 = arith.index_cast %132 : i32 to index
    %c0_81 = arith.constant 0 : index
    %175 = vector.load %arg13[%174, %c0_81] : memref<16x128xf32, #tpu.memory_space<vmem>>, vector<8x128xf32>
    tpu.vector_store %arg13[%174, %c0_81], %173 {strides = array<i32>} : memref<16x128xf32, #tpu.memory_space<vmem>>, vector<8x128xf32>,
    %176 = vector.extract_strided_slice %173 {offsets = [7, 0], sizes = [1, 128], strides = [1, 1]} : vector<8x128xf32> to vector<1x128xf32>
    %c2_i32_82 = arith.constant 2 : i32
    %c0_83 = arith.constant 0 : index
    %c0_84 = arith.constant 0 : index
    %177 = vector.load %arg16[%c0_83, %c0_84] : memref<1x128xf32, #tpu.memory_space<vmem>>, vector<1x128xf32>
    tpu.vector_store %arg16[%c0_83, %c0_84], %176 {strides = array<i32>} : memref<1x128xf32, #tpu.memory_space<vmem>>, vector<1x128xf32>,
    %c0_85 = arith.constant 0 : index
    %c0_86 = arith.constant 0 : index
    %178 = vector.load %arg13[%c0_85, %c0_86] : memref<16x128xf32, #tpu.memory_space<vmem>>, vector<16x128xf32>
    %c0_87 = arith.constant 0 : index
    %c0_88 = arith.constant 0 : index
    %179 = vector.load %arg8[%c0_87, %c0_88] : memref<1x128xf32, #tpu.memory_space<vmem>>, vector<1x128xf32>
    %c0_89 = arith.constant 0 : index
    %c0_90 = arith.constant 0 : index
    %180 = vector.load %arg9[%c0_89, %c0_90] : memref<1x128xf32, #tpu.memory_space<vmem>>, vector<1x128xf32>
    %cst_91 = arith.constant dense<0.000000e+00> : vector<16xf32>
    %181 = vector.multi_reduction <add>, %178, %cst_91 [1] : vector<16x128xf32> to vector<16xf32>
    %182 = vector.shape_cast %181 : vector<16xf32> to vector<16x1xf32>
    %cst_92 = arith.constant 1.280000e+02 : f32
    %183 = vector.broadcast %cst_92 : f32 to vector<16x1xf32>
    %184 = arith.divf %182, %183 : vector<16x1xf32>
    %185 = vector.broadcast %184 : vector<16x1xf32> to vector<16x128xf32>
    %186 = arith.subf %178, %185 : vector<16x128xf32>
    %187 = arith.mulf %186, %186 : vector<16x128xf32>
    %cst_93 = arith.constant dense<0.000000e+00> : vector<16xf32>
    %188 = vector.multi_reduction <add>, %187, %cst_93 [1] : vector<16x128xf32> to vector<16xf32>
    %189 = vector.shape_cast %188 : vector<16xf32> to vector<16x1xf32>
    %cst_94 = arith.constant 1.280000e+02 : f32
    %190 = vector.broadcast %cst_94 : f32 to vector<16x1xf32>
    %191 = arith.divf %189, %190 : vector<16x1xf32>
    %cst_95 = arith.constant 9.99999974E-6 : f32
    %192 = vector.broadcast %cst_95 : f32 to vector<16x1xf32>
    %193 = arith.addf %191, %192 : vector<16x1xf32>
    %194 = math.rsqrt %193 : vector<16x1xf32>
    %195 = vector.broadcast %194 : vector<16x1xf32> to vector<16x128xf32>
    %196 = arith.mulf %186, %195 : vector<16x128xf32>
    %197 = vector.broadcast %179 : vector<1x128xf32> to vector<16x128xf32>
    %198 = arith.mulf %196, %197 : vector<16x128xf32>
    %199 = vector.broadcast %180 : vector<1x128xf32> to vector<16x128xf32>
    %200 = arith.addf %198, %199 : vector<16x128xf32>
    %c0_96 = arith.constant 0 : index
    %c0_97 = arith.constant 0 : index
    %201 = vector.load %arg15[%c0_96, %c0_97] : memref<16x128xf32, #tpu.memory_space<vmem>>, vector<16x128xf32>
    %cst_98 = arith.constant 5.000000e-01 : f32
    %202 = vector.broadcast %cst_98 : f32 to vector<16x128xf32>
    %203 = arith.mulf %202, %201 : vector<16x128xf32>
    %cst_99 = arith.constant 0.707106769 : f32
    %204 = vector.broadcast %cst_99 : f32 to vector<16x128xf32>
    %205 = arith.mulf %201, %204 : vector<16x128xf32>
    %cst_100 = arith.constant 0.000000e+00 : f32
    %206 = vector.broadcast %cst_100 : f32 to vector<16x128xf32>
    %207 = arith.cmpf oge, %205, %206 : vector<16x128xf32>
    %cst_101 = arith.constant 1.000000e+00 : f32
    %cst_102 = arith.constant -1.000000e+00 : f32
    %208 = vector.broadcast %cst_101 : f32 to vector<16x128xf32>
    %209 = vector.broadcast %cst_102 : f32 to vector<16x128xf32>
    %210 = arith.select %207, %208, %209 : vector<16x128xi1>, vector<16x128xf32>
    %211 = math.absf %205 : vector<16x128xf32>
    %cst_103 = arith.constant 0.327591091 : f32
    %212 = vector.broadcast %cst_103 : f32 to vector<16x128xf32>
    %213 = arith.mulf %212, %211 : vector<16x128xf32>
    %cst_104 = arith.constant 1.000000e+00 : f32
    %214 = vector.broadcast %cst_104 : f32 to vector<16x128xf32>
    %215 = arith.addf %214, %213 : vector<16x128xf32>
    %216 = tpu.reciprocal %215 {approx = true} : vector<16x128xf32> -> vector<16x128xf32>
    %217 = arith.mulf %215, %216 : vector<16x128xf32>
    %cst_105 = arith.constant 2.000000e+00 : f32
    %218 = vector.broadcast %cst_105 : f32 to vector<16x128xf32>
    %219 = arith.subf %218, %217 : vector<16x128xf32>
    %220 = arith.mulf %216, %219 : vector<16x128xf32>
    %cst_106 = arith.constant 1.06140542 : f32
    %221 = vector.broadcast %cst_106 : f32 to vector<16x128xf32>
    %222 = arith.mulf %221, %220 : vector<16x128xf32>
    %cst_107 = arith.constant -1.45315206 : f32
    %223 = vector.broadcast %cst_107 : f32 to vector<16x128xf32>
    %224 = arith.addf %222, %223 : vector<16x128xf32>
    %225 = arith.mulf %224, %220 : vector<16x128xf32>
    %cst_108 = arith.constant 1.42141378 : f32
    %226 = vector.broadcast %cst_108 : f32 to vector<16x128xf32>
    %227 = arith.addf %225, %226 : vector<16x128xf32>
    %228 = arith.mulf %227, %220 : vector<16x128xf32>
    %cst_109 = arith.constant -0.284496725 : f32
    %229 = vector.broadcast %cst_109 : f32 to vector<16x128xf32>
    %230 = arith.addf %228, %229 : vector<16x128xf32>
    %231 = arith.mulf %230, %220 : vector<16x128xf32>
    %cst_110 = arith.constant 0.254829586 : f32
    %232 = vector.broadcast %cst_110 : f32 to vector<16x128xf32>
    %233 = arith.addf %231, %232 : vector<16x128xf32>
    %234 = arith.mulf %233, %220 : vector<16x128xf32>
    %cst_111 = arith.constant 0.000000e+00 : f32
    %235 = vector.broadcast %cst_111 : f32 to vector<16x128xf32>
    %236 = arith.subf %235, %211 : vector<16x128xf32>
    %237 = arith.mulf %236, %211 : vector<16x128xf32>
    %238 = math.exp %237 : vector<16x128xf32>
    %239 = arith.mulf %234, %238 : vector<16x128xf32>
    %cst_112 = arith.constant 1.000000e+00 : f32
    %240 = vector.broadcast %cst_112 : f32 to vector<16x128xf32>
    %241 = arith.subf %240, %239 : vector<16x128xf32>
    %242 = arith.mulf %210, %241 : vector<16x128xf32>
    %cst_113 = arith.constant 1.000000e+00 : f32
    %243 = vector.broadcast %cst_113 : f32 to vector<16x128xf32>
    %244 = arith.addf %243, %242 : vector<16x128xf32>
    %245 = arith.mulf %203, %244 : vector<16x128xf32>
    %246 = arith.mulf %200, %245 : vector<16x128xf32>
    %c0_114 = arith.constant 0 : index
    %c0_115 = arith.constant 0 : index
    %247 = vector.load %arg6[%c0_114, %c0_115] : memref<128x128xf32, #tpu.memory_space<vmem>>, vector<128x128xf32>
    %cst_116 = arith.constant dense<0.000000e+00> : vector<16x128xf32>
    %248 = tpu.matmul %246, %247, %cst_116 {dimension_numbers = #tpu.dot_dimension_numbers<[1], [0], [0], [1], [0, 0, 1, 1], [], []>} : vector<16x128xf32>, vector<128x128xf32>, vector<16x128xf32> -> vector<16x128xf32>
    %c0_117 = arith.constant 0 : index
    %c0_118 = arith.constant 0 : index
    %249 = vector.load %arg7[%c0_117, %c0_118] : memref<1x128xf32, #tpu.memory_space<vmem>>, vector<1x128xf32>
    %250 = vector.broadcast %249 : vector<1x128xf32> to vector<16x128xf32>
    %251 = arith.addf %248, %250 : vector<16x128xf32>
    %c0_119 = arith.constant 0 : index
    %c0_120 = arith.constant 0 : index
    %252 = vector.load %arg10[%c0_119, %c0_120] : memref<1x128xf32, #tpu.memory_space<vmem>>, vector<1x128xf32>
    %c0_121 = arith.constant 0 : index
    %c0_122 = arith.constant 0 : index
    %253 = vector.load %arg11[%c0_121, %c0_122] : memref<1x128xf32, #tpu.memory_space<vmem>>, vector<1x128xf32>
    %cst_123 = arith.constant dense<0.000000e+00> : vector<16xf32>
    %254 = vector.multi_reduction <add>, %251, %cst_123 [1] : vector<16x128xf32> to vector<16xf32>
    %255 = vector.shape_cast %254 : vector<16xf32> to vector<16x1xf32>
    %cst_124 = arith.constant 1.280000e+02 : f32
    %256 = vector.broadcast %cst_124 : f32 to vector<16x1xf32>
    %257 = arith.divf %255, %256 : vector<16x1xf32>
    %258 = vector.broadcast %257 : vector<16x1xf32> to vector<16x128xf32>
    %259 = arith.subf %251, %258 : vector<16x128xf32>
    %260 = arith.mulf %259, %259 : vector<16x128xf32>
    %cst_125 = arith.constant dense<0.000000e+00> : vector<16xf32>
    %261 = vector.multi_reduction <add>, %260, %cst_125 [1] : vector<16x128xf32> to vector<16xf32>
    %262 = vector.shape_cast %261 : vector<16xf32> to vector<16x1xf32>
    %cst_126 = arith.constant 1.280000e+02 : f32
    %263 = vector.broadcast %cst_126 : f32 to vector<16x1xf32>
    %264 = arith.divf %262, %263 : vector<16x1xf32>
    %cst_127 = arith.constant 9.99999974E-6 : f32
    %265 = vector.broadcast %cst_127 : f32 to vector<16x1xf32>
    %266 = arith.addf %264, %265 : vector<16x1xf32>
    %267 = math.rsqrt %266 : vector<16x1xf32>
    %268 = vector.broadcast %267 : vector<16x1xf32> to vector<16x128xf32>
    %269 = arith.mulf %259, %268 : vector<16x128xf32>
    %270 = vector.broadcast %252 : vector<1x128xf32> to vector<16x128xf32>
    %271 = arith.mulf %269, %270 : vector<16x128xf32>
    %272 = vector.broadcast %253 : vector<1x128xf32> to vector<16x128xf32>
    %273 = arith.addf %271, %272 : vector<16x128xf32>
    %274 = arith.addf %2, %273 : vector<16x128xf32>
    %c0_128 = arith.constant 0 : index
    %c0_129 = arith.constant 0 : index
    %c0_130 = arith.constant 0 : index
    %275 = vector.load %arg12[%c0_128, %c0_129, %c0_130] : memref<1x16x128xf32, #tpu.memory_space<vmem>>, vector<1x16x128xf32>
    %276 = vector.shape_cast %275 : vector<1x16x128xf32> to vector<16x128xf32>
    %277 = vector.shape_cast %274 : vector<16x128xf32> to vector<1x16x128xf32>
    tpu.vector_store %arg12[%c0_128, %c0_129, %c0_130], %277 {strides = array<i32>} : memref<1x16x128xf32, #tpu.memory_space<vmem>>, vector<1x16x128xf32>,
    return
  }
  func.func @transform_0(%arg0: i32, %arg1: i32, %arg2: memref<1xf32, #tpu.memory_space<smem>>) -> (i32, i32, i32) {
    %c0_i32 = arith.constant 0 : i32
    %c0_i32_0 = arith.constant 0 : i32
    return %arg0, %arg1, %c0_i32 : i32, i32, i32
  }
  func.func @transform_1(%arg0: i32, %arg1: i32, %arg2: memref<1xf32, #tpu.memory_space<smem>>) -> (i32, i32, i32) {
    %c0_i32 = arith.constant 0 : i32
    %c0_i32_0 = arith.constant 0 : i32
    %c0_i32_1 = arith.constant 0 : i32
    %c0_i32_2 = arith.constant 0 : i32
    return %c0_i32, %c0_i32_0, %c0_i32_1 : i32, i32, i32
  }
  func.func @transform_2(%arg0: i32, %arg1: i32, %arg2: memref<1xf32, #tpu.memory_space<smem>>) -> (i32, i32) {
    %c0_i32 = arith.constant 0 : i32
    %c0_i32_0 = arith.constant 0 : i32
    %c0_i32_1 = arith.constant 0 : i32
    return %c0_i32, %c0_i32_0 : i32, i32
  }
  func.func @transform_3(%arg0: i32, %arg1: i32, %arg2: memref<1xf32, #tpu.memory_space<smem>>) -> (i32, i32) {
    %c0_i32 = arith.constant 0 : i32
    %c0_i32_0 = arith.constant 0 : i32
    %c0_i32_1 = arith.constant 0 : i32
    return %c0_i32, %c0_i32_0 : i32, i32
  }
  func.func @transform_4(%arg0: i32, %arg1: i32, %arg2: memref<1xf32, #tpu.memory_space<smem>>) -> (i32, i32) {
    %c0_i32 = arith.constant 0 : i32
    %c0_i32_0 = arith.constant 0 : i32
    %c0_i32_1 = arith.constant 0 : i32
    return %c0_i32, %c0_i32_0 : i32, i32
  }
  func.func @transform_5(%arg0: i32, %arg1: i32, %arg2: memref<1xf32, #tpu.memory_space<smem>>) -> (i32, i32) {
    %c0_i32 = arith.constant 0 : i32
    %c0_i32_0 = arith.constant 0 : i32
    %c0_i32_1 = arith.constant 0 : i32
    return %c0_i32, %c0_i32_0 : i32, i32
  }
  func.func @transform_6(%arg0: i32, %arg1: i32, %arg2: memref<1xf32, #tpu.memory_space<smem>>) -> (i32, i32) {
    %c0_i32 = arith.constant 0 : i32
    %c0_i32_0 = arith.constant 0 : i32
    %c0_i32_1 = arith.constant 0 : i32
    return %c0_i32, %c0_i32_0 : i32, i32
  }
  func.func @transform_7(%arg0: i32, %arg1: i32, %arg2: memref<1xf32, #tpu.memory_space<smem>>) -> (i32, i32) {
    %c0_i32 = arith.constant 0 : i32
    %c0_i32_0 = arith.constant 0 : i32
    %c0_i32_1 = arith.constant 0 : i32
    return %c0_i32, %c0_i32_0 : i32, i32
  }
  func.func @transform_8(%arg0: i32, %arg1: i32, %arg2: memref<1xf32, #tpu.memory_space<smem>>) -> (i32, i32) {
    %c0_i32 = arith.constant 0 : i32
    %c0_i32_0 = arith.constant 0 : i32
    %c0_i32_1 = arith.constant 0 : i32
    return %c0_i32, %c0_i32_0 : i32, i32
  }
  func.func @transform_9(%arg0: i32, %arg1: i32, %arg2: memref<1xf32, #tpu.memory_space<smem>>) -> (i32, i32, i32) {
    %c0_i32 = arith.constant 0 : i32
    %c0_i32_0 = arith.constant 0 : i32
    return %arg0, %arg1, %c0_i32 : i32, i32, i32
  }
}

</mosaic_0001>

<bundles_post_ra>
// kernel: tpu_custom_call.1
= control target key start
LH: loop header
LB: loop body
LE: loop exit
PB: predicated region body
PF: predicated region fallthrough
CT: control target
= control target key end

     0   :  { %s2383_s0 = inlined_call_operand.<no memory space> [shape: f32[1], index: 0, kind: input, shape index: {}]   ;;  %s2384_s1 = inlined_call_operand.hbm [shape: f32[2,64,128], index: 1, kind: input, shape index: {}]   ;;  %s2385_s2 = inlined_call_operand.hbm [shape: f32[3,128,128], index: 2, kind: input, shape index: {}]   ;;  %s2386_s3 = inlined_call_operand.vmem [shape: f32[3,128], index: 3, kind: input, shape index: {}]   ;;  %s2387_s4 = inlined_call_operand.hbm [shape: f32[128,128], index: 4, kind: input, shape index: {}]   ;;  %s2388_s5 = inlined_call_operand.vmem [shape: f32[1,128], index: 5, kind: input, shape index: {}]   ;;  %s2389_s6 = inlined_call_operand.vmem [shape: f32[1,128], index: 6, kind: input, shape index: {}]   ;;  %s2390_s7 = inlined_call_operand.vmem [shape: f32[1,128], index: 7, kind: input, shape index: {}]   ;;  %s2391_s8 = inlined_call_operand.vmem [shape: f32[1,128], index: 8, kind: input, shape index: {}]   ;;  %s2392_s9 = inlined_call_operand.vmem [shape: f32[1,128], index: 9, kind: input, shape index: {}]   ;;  %s2393_s10 = inlined_call_operand.hbm [shape: f32[2,64,128], index: 10, kind: output, shape index: {}]  }
   0x1   :  { %2406 = sst [smem:[#allocation23_spill]] %s2385_s2 }
   0x2   :  { %2407 = sst [smem:[#allocation24_spill]] %s2387_s4 }
   0x3   :  { %2408 = sst [smem:[#allocation25_spill]] %s2388_s5 }
   0x4   :  { %2409 = sst [smem:[#allocation26_spill]] %s2391_s8 }
   0x5   :  { %2410 = sst [smem:[#allocation27_spill]] %s2392_s9 }
   0x6   :  { %2411 = sst [smem:[#allocation28_spill]] %s2393_s10 }
   0x7   :  { %15 = sst [smem:[#allocation7]] %s2383_s0 }
   0x8   :  { %16 = vsyncpa [#allocation9], 0 }
   0x9   :  { %18 = vsyncpa [#allocation9 + $0x1], 0 }
   0xa   :  { %19 = vsyncpa [#allocation12], 0 }
   0xb   :  { %20 = vsyncpa [#allocation10], 0 }
   0xc   :  { %22 = vsyncpa [#allocation10 + $0x1], 0  ;;  %s1998_s15 = smov 0   ;;  %s2000_s16 = smov 0  }
   0xd   :  { %s2002_s17 = smov 0   ;;  %s2004_s18 = smov 0  }
   0xe   :  { %s2006_s19 = smov 0   ;;  %s2008_s20 = smov 0  }
   0xf   :  { %s2010_s21 = smov 0   ;;  %s2012_s0 = smov 0  }
  0x10 LB: > { %2412 = sst [smem:[#allocation18_spill]] %s1900_s15  ;;  %s1230_s22 = sadd.s32 4294967295, %s1928_s0   ;;  %s1928_s0 = sphi %s2012_s0, %s28_s0   ;;  %s1924_s21 = sphi %s2010_s21, %s2450_s21   ;;  %s1920_s20 = sphi %s2008_s20, %s2449_s20   ;;  %s1916_s19 = sphi %s2006_s19, %s2448_s19   ;;  %s1912_s18 = sphi %s2004_s18, %s2447_s18   ;;  %s1908_s17 = sphi %s2002_s17, %s2446_s17   ;;  %s1904_s16 = sphi %s2000_s16, %s2445_s16   ;;  %s1900_s15 = sphi %s1998_s15, %s2444_s15  }
  0x11   : > { %2413 = sst [smem:[#allocation19_spill]] %s1916_s19  ;;  %s1231_s23 = sadd.s32 4294967294, %s1928_s0  }
  0x12   : > { %p62_p0 = scmp.ne.s32.totalorder %s1904_s16, %s1900_s15  ;;  %p2042_p1 = scmp.eq.s32.totalorder %s1230_s22, 0 }
  0x13   : > { %p2046_p2 = scmp.eq.s32.totalorder %s1230_s22, 7  ;;  %p262_p3 = scmp.eq.s32.totalorder %s1231_s23, 7 }
  0x14   : > { %s2414_s24 = scalar_select %p2042_p1, 1, 0 }
  0x15   : > { %s2415_s25 = scalar_select %p2046_p2, 1, 0 }
  0x16   : > { %p2052_p4 = por %p2042_p1, %p62_p0  ;;  %p1232_p5 = scmp.ge.s32.totalorder %s1928_s0, 1 }
  0x17   : > { %p2057_p6 = por %p262_p3, %p62_p0  ;;  %p269_p7 = scmp.lt.s32.totalorder %s1928_s0, 9 }
  0x18   : > { %s2416_s26 = scalar_select %p2052_p4, 1, 0 }
  0x19   : > { %s2417_s27 = scalar_select %p2057_p6, 1, 0 }
  0x1a   : > { %p2062_p8 = pnand %p1232_p5, %p269_p7  ;;  %s1930_s29 = smov [#allocation11]  }
  0x1b   : > { %2418 = sst [smem:[#allocation20_spill]] %s2417_s27  ;;  %s281_s30 = sshll.u32 %s1930_s29, 4  ;;  %s282_s30 = int_to_ptr.vmem [resolvable:$true] %s281_s30 }
  0x1c   : > { %s2419_s28 = scalar_select %p2062_p8, 1, 0 }
  0x1d   : > { %p1615_p9 = pneg %p2062_p8  ;;  %s1931_s12 = smov [#allocation13]  }
  0x1e   : > { %s297_s13 = sshll.u32 %s1931_s12, 4  ;;  %s2421_s2 = sld [smem:[#allocation23_spill]]  ;;  %s2074_s13 = int_to_ptr.vmem [resolvable:$true] %s297_s13 }
  0x1f   : > { %p2070_p10 = pnand %p1615_p9, %p2042_p1 }
  0x21   : > { %p1742_p12 = pneg %p2070_p10 }
  0x24   : > { %s1740_s23 = scalar_lea.hbm %s2421_s2, 6144 }
  0x25   : > { %p1741_p11 = scmp.ne.s32.totalorder %s2421_s2, %s1740_s23  ;;  %p1747_p3 = scmp.lt.u32.totalorder %s1740_s23, %s2421_s2 }
  0x27   : > { %p1743_p13 = pnand %p1742_p12, %p1741_p11 }
  0x29   : > { %p1744_p0 = pneg %p1743_p13 }
  0x2b   : > { %p1749_p5 = pnand %p1747_p3, %p1744_p0 }
  0x2d   : > { %1752 = shalt.err (!%p1749_p5)
}
  0x2e   : > { %s1753_s12 = scalar_lea.vmem %s282_s30, 6144  ;;  %p1761_p1 = scmp.lt.s32.totalorder %s282_s30, %s282_s30 }
  0x2f   : > { %p1754_p7 = scmp.ne.s32.totalorder %s282_s30, %s1753_s12  ;;  %p1762_p4 = scmp.lt.s32.totalorder %s1753_s12, %s1753_s12 }
  0x31   : > { %p1756_p9 = pnand %p1754_p7, %p1742_p12  ;;  %p1763_p8 = por %p1762_p4, %p1761_p1 }
  0x33   : > { %p1757_p6 = pneg %p1756_p9 }
  0x35   : > { %p1764_p2 = pnand %p1763_p8, %p1757_p6 }
  0x37   : > { %1767 = shalt.err (!%p1764_p2)
}
  0x38   : > { %s2401_s27 = smov 128   ;;  %s2402_s14 = smov 8  }
  0x39   : > { %1618 = dma.hbm_to_vmem [thread:$0]  (!%p2070_p10), %s2421_s2, 6144, %s282_s30, [#allocation12], %s2401_s27, %s2401_s27, %s2402_s14  }
  0x3a   : > { %s2422_s4 = sld [smem:[#allocation24_spill]] }
  0x40   : > { %s1768_s29 = scalar_lea.hbm %s2422_s4, 2048 }
  0x41   : > { %p1769_p1 = scmp.ne.s32.totalorder %s2422_s4, %s1768_s29  ;;  %p1775_p6 = scmp.lt.u32.totalorder %s1768_s29, %s2422_s4 }
  0x43   : > { %p1771_p2 = pnand %p1769_p1, %p1742_p12 }
  0x45   : > { %p1772_p4 = pneg %p1771_p2 }
  0x47   : > { %p1777_p8 = pnand %p1775_p6, %p1772_p4 }
  0x49   : > { %1780 = shalt.err (!%p1777_p8)
}
  0x4a   : > { %s1781_s30 = scalar_lea.vmem %s2074_s13, 2048  ;;  %p1789_p3 = scmp.lt.s32.totalorder %s2074_s13, %s2074_s13 }
  0x4b   : > { %p1782_p11 = scmp.ne.s32.totalorder %s2074_s13, %s1781_s30  ;;  %p1790_p5 = scmp.lt.s32.totalorder %s1781_s30, %s1781_s30 }
  0x4d   : > { %p1784_p13 = pnand %p1782_p11, %p1742_p12  ;;  %p1791_p7 = por %p1790_p5, %p1789_p3 }
  0x4f   : > { %p1785_p0 = pneg %p1784_p13 }
  0x51   : > { %p1792_p9 = pnand %p1791_p7, %p1785_p0 }
  0x53   : > { %1795 = shalt.err (!%p1792_p9)
}
  0x54   : > { %1621 = dma.hbm_to_vmem [thread:$0]  (!%p2070_p10), %s2422_s4, 2048, %s2074_s13, [#allocation12], %s2401_s27, %s2401_s27, %s2402_s14  }
  0x55   : > { %s37_s19 = sadd.s32 1, %s1920_s20  ;;  %s40_s11 = sadd.s32 1, %s1924_s21 }
  0x56   : > { %p38_p12 = scmp.ge.s32.totalorder %s37_s19, 4  ;;  %s49_s10 = sadd.s32 1, %s1908_s17 }
  0x57   : > { %p56_p1 = scmp.ne.s32.totalorder %s1908_s17, %s1904_s16  ;;  %p57_p2 = scmp.eq.s32.totalorder %s1928_s0, 0 }
  0x58   : > { %s2452_s19 = smov (%p38_p12, %s37_s19), 0  ;;  %s2454_s11 = smov (!%p38_p12, %s40_s11), %s1924_s21 }
  0x59   : > { %2423 = sst [smem:[#allocation21_spill]] %s2452_s19  ;;  %s45_s15 = ssub.s32 %s1920_s20, %s2452_s19 }
  0x5a   : > { %p2140_p4 = por %p57_p2, %p56_p1  ;;  %p42_p10 = scmp.ge.s32.totalorder %s2454_s11, 2 }
  0x5b   : > { %p2425_p6 = scmp.ne.s32.totalorder %s2415_s25, 0  ;;  %p1632_p11 = scmp.lt.s32.totalorder %s1928_s0, 8 }
  0x5c   : > { %s326_s23 = sand.u32 1, %s1908_s17   ;;  %s2456_s11 = smov (%p42_p10, %s2454_s11), 0 }
  0x5d   : > { %p2146_p8 = por %p2425_p6, %p56_p1  ;;  %s1236_s29 = sshll.u32 %s326_s23, 4 }
  0x5e   : > { %s44_s12 = ssub.s32 %s1924_s21, %s2456_s11  ;;  %s1237_s8 = sshll.u32 %s1920_s20, 1 }
  0x5f   : > { %s2426_s13 = scalar_select %p2146_p8, 1, 0 }
  0x60   : > { %s46_s30 = sor.u32 %s45_s15, %s44_s12  ;;  %s1238_s9 = sshll.u32 %s1924_s21, 3 }
  0x61   : > { %2427 = sst [smem:[#allocation22_spill]] %s2426_s13  ;;  %p47_p13 = scmp.eq.s32.totalorder %s46_s30, 0 }
  0x62   : > { %s336_s27 = sadd.s32 %s1238_s9, %s1237_s8  ;;  %s330_s14 = scalar_lea.vmem [#allocation8], %s1236_s29 }
  0x63   : > { %s339_s25 = sshll.u32 %s330_s14, 4  ;;  %s1239_s4 = sshll.u32 %s336_s27, 7  ;;  %s2161_s25 = int_to_ptr.vmem [resolvable:$true] %s339_s25 }
  0x64   : > { %s2159_s2 = scalar_select %p47_p13, %s1908_s17, %s49_s10  }
  0x65   : > { %s2166_s5 = scalar_lea.hbm %s2384_s1, %s1239_s4  ;;  %p2172_p0 = pnand %p1632_p11, %p2140_p4 }
  0x66   : > { %s2176_s27 = scalar_lea.sflag [#allocation9], %s326_s23  ;;  %s1796_s14 = scalar_lea.hbm %s2166_s5, 256 }
  0x67   : > { %p1797_p3 = scmp.ne.s32.totalorder %s2166_s5, %s1796_s14  ;;  %p1798_p5 = pneg %p2172_p0 }
  0x68   : > { %s1801_s10 = scalar_lea.hbm %s2384_s1, 2048  ;;  %p1802_p12 = scmp.lt.u32.totalorder %s2166_s5, %s2384_s1 }
  0x69   : > { %p1799_p7 = pnand %p1798_p5, %p1797_p3  ;;  %p1803_p1 = scmp.lt.u32.totalorder %s1801_s10, %s1796_s14 }
  0x6a   : > { %p1805_p4 = scmp.lt.u32.totalorder %s1796_s14, %s2166_s5 }
  0x6b   : > { %p1800_p9 = pneg %p1799_p7  ;;  %p1804_p2 = por %p1803_p1, %p1802_p12 }
  0x6d   : > { %p1806_p10 = por %p1805_p4, %p1804_p2 }
  0x6f   : > { %p1807_p6 = pnand %p1806_p10, %p1800_p9 }
  0x71   : > { %1810 = shalt.err (!%p1807_p6)
}
  0x72   : > { %s1811_s23 = scalar_lea.vmem %s2161_s25, 256  ;;  %s1934_s29 = smov [#allocation8]  }
  0x73   : > { %p1812_p11 = scmp.ne.s32.totalorder %s2161_s25, %s1811_s23  ;;  %s1816_s12 = sshll.u32 %s1934_s29, 4  ;;  %s1817_s12 = int_to_ptr.vmem [resolvable:$false] %s1816_s12 }
  0x74   : > { %s1818_s30 = scalar_lea.vmem %s1817_s12, 512  ;;  %p1819_p7 = scmp.lt.s32.totalorder %s2161_s25, %s1817_s12 }
  0x75   : > { %p1814_p13 = pnand %p1812_p11, %p1798_p5  ;;  %p1820_p12 = scmp.lt.s32.totalorder %s1818_s30, %s1811_s23 }
  0x77   : > { %p1815_p3 = pneg %p1814_p13  ;;  %p1821_p1 = por %p1820_p12, %p1819_p7 }
  0x79   : > { %p1822_p2 = pnand %p1821_p1, %p1815_p3 }
  0x7b   : > { %1825 = shalt.err (!%p1822_p2)
}
  0x7c   : > { %s2429_s8 = smov 8   ;;  %s2430_s9 = smov 128  }
  0x7d   : > { %1625 = dma.hbm_to_vmem [thread:$0]  (!%p2172_p0), %s2166_s5, 256, %s2161_s25, %s2176_s27, %s2430_s9, %s2430_s9, %s2429_s8  }
  0x7e   : > { %p2431_p5 = scmp.ne.s32.totalorder %s2419_s28, 0 }
  0x7f   : > { %s2210_s14 = sand.u32 (!%p2431_p5), 1, %s1904_s16   ;;  %p2432_p9 = scmp.ne.s32.totalorder (!%p2431_p5), %s2416_s26, 0 }
  0x80   : > { %351 = sbr.rel (%p2431_p5) target bundleno = 1369 (0x559), region = 56  ;;  %s1241_s4 = sshll.u32 (!%p2431_p5), %s2210_s14, 4 }
  0x81   : > { %s354_s19 = scalar_lea.sflag (!%p2431_p5), [#allocation9], %s2210_s14  ;;  %s2216_s15 = scalar_lea.vmem (!%p2431_p5), [#allocation8], %s1241_s4 }
  0x87   : > { %1887 = dma.done.wait (%p2432_p9), %s354_s19, 256  }
  0x88   : > { %1889 = vsyncadd (%p2432_p9), %s354_s19, 4294967040  ;;  %p2433_p0 = scmp.ne.s32.totalorder %s2414_s24, 0 }
  0x8a   : > { %1891 = dma.done.wait (%p2433_p0), [#allocation12], 8192  }
  0x8b   : > { %1893 = vsyncadd (%p2433_p0), [#allocation12], 4294959104  ;;  %v406_v0 = vld [vmem:[#allocation11 + $0x100] sm:$0xff]  ;;  %v407_v1 = vld [vmem:[#allocation11 + $0x108] sm:$0xff]  ;;  %s402_s25 = sld [smem:[#allocation7]]  ;;  %s2275_s13 = scalar_lea.vmem [#allocation14], %s1241_s4 }
  0x8c   : > { %v408_v2 = vld [vmem:[#allocation11 + $0x110] sm:$0xff]  ;;  %v1475_v3 = vpack.c.bf16 %v407_v1, %v406_v0  ;;  %v409_v4 = vld [vmem:[#allocation11 + $0x118] sm:$0xff]  ;;  %v410_v6 = vld [vmem:[#allocation11 + $0x120] sm:$0xff]  ;;  %p1250_p4 = scmp.ne.s32.totalorder %s1912_s18, 0 }
  0x8d   : > { %v1479_v5 = vpack.c.bf16 %v409_v4, %v408_v2  ;;  %v411_v7 = vld [vmem:[#allocation11 + $0x128] sm:$0xff]  ;;  %v2227_v9 = vld [vmem:[%s2216_s15] sm:$0xff]  ;;  %v413_v11 = vld [vmem:[#allocation11 + $0x138] sm:$0xff] }
  0x8e   : > { %1476 = vmatprep.subr.bf16.mxu0 %v1475_v3  ;;  %v1483_v8 = vpack.c.bf16 %v411_v7, %v410_v6  ;;  %v412_v10 = vld [vmem:[#allocation11 + $0x130] sm:$0xff]  ;;  %1367 = vmatprep.mubr.f32.mxu0 %v2227_v9  ;;  %v505_v13 = vld [vmem:[#allocation11 + $0x80] sm:$0xff]  ;;  %v506_v14 = vld [vmem:[#allocation11 + $0x88] sm:$0xff] }
  0x8f   : > { %1478 = vmatpush3.bf16.msra.mxu0 %v1475_v3  ;;  %1402 = vmatprep.mubr.f32.mxu1 %v2227_v9  ;;  %v1487_v12 = vpack.c.bf16 %v413_v11, %v412_v10  ;;  %v414_v15 = vld [vmem:[#allocation11 + $0x140] sm:$0xff]  ;;  %v415_v16 = vld [vmem:[#allocation11 + $0x148] sm:$0xff]  ;;  %v1507_v17 = vpack.c.bf16 %v506_v14, %v505_v13  ;;  %v507_v18 = vld [vmem:[#allocation11 + $0x90] sm:$0xff] }
  0x90   : > { %1480 = vmatprep.subr.bf16.mxu0 %v1479_v5  ;;  %v508_v19 = vld [vmem:[#allocation11 + $0x98] sm:$0xff]  ;;  %v509_v21 = vld [vmem:[#allocation11 + $0xa0] sm:$0xff]  ;;  %v510_v22 = vld [vmem:[#allocation11 + $0xa8] sm:$0xff]  ;;  %v1491_v23 = vpack.c.bf16 %v415_v16, %v414_v15 }
  0x91   : > { %1508 = vmatprep.subr.bf16.mxu1 %v1507_v17  ;;  %v1511_v20 = vpack.c.bf16 %v508_v19, %v507_v18  ;;  %v416_v24 = vld [vmem:[#allocation11 + $0x150] sm:$0xff]  ;;  %v417_v25 = vld [vmem:[#allocation11 + $0x158] sm:$0xff]  ;;  %v1515_v26 = vpack.c.bf16 %v510_v22, %v509_v21  ;;  %v418_v30 = vld [vmem:[#allocation11 + $0x160] sm:$0xff]  ;;  %s613_s22 = ssub.f32 1.0, %s402_s25 }
  0x92   : > { %1510 = vmatpush3.bf16.msra.mxu1 %v1507_v17  ;;  %v511_v27 = vld [vmem:[#allocation11 + $0xb0] sm:$0xff]  ;;  %v512_v28 = vld [vmem:[#allocation11 + $0xb8] sm:$0xff]  ;;  %v1495_v29 = vpack.c.bf16 %v417_v25, %v416_v24  ;;  %v419_v31 = vld [vmem:[#allocation11 + $0x168] sm:$0xff] }
  0x93   : > { %1482 = vmatpush3.bf16.msra.mxu0 %v1479_v5  ;;  %1512 = vmatprep.subr.bf16.mxu1 %v1511_v20  ;;  %v1519_v32 = vpack.c.bf16 %v512_v28, %v511_v27  ;;  %v513_v33 = vld [vmem:[#allocation11 + $0xc0] sm:$0xff]  ;;  %v514_v34 = vld [vmem:[#allocation11 + $0xc8] sm:$0xff]  ;;  %v1499_v35 = vpack.c.bf16 %v419_v31, %v418_v30  ;;  %v420_v36 = vld [vmem:[#allocation11 + $0x170] sm:$0xff] }
  0x94   : > { %1484 = vmatprep.subr.bf16.mxu0 %v1483_v8  ;;  %v421_v37 = vld [vmem:[#allocation11 + $0x178] sm:$0xff]  ;;  %v1523_v38 = vpack.c.bf16 %v514_v34, %v513_v33  ;;  %v515_v39 = vld [vmem:[#allocation11 + $0xd0] sm:$0xff]  ;;  %v622_v42 = vld [vmem:[#allocation11] sm:$0xff]  ;;  %v614_v33 = vstv %s613_s22 }
  0x95   : > { %v516_v40 = vld [vmem:[#allocation11 + $0xd8] sm:$0xff]  ;;  %v1503_v41 = vpack.c.bf16 %v421_v37, %v420_v36  ;;  %v623_v43 = vld [vmem:[#allocation11 + $0x8] sm:$0xff]  ;;  %v517_v45 = vld [vmem:[#allocation11 + $0xe0] sm:$0xff]  ;;  %v617_v37 = vstv %s402_s25 }
  0x96   : > { %1514 = vmatpush3.bf16.msra.mxu1 %v1511_v20  ;;  %v1527_v44 = vpack.c.bf16 %v516_v40, %v515_v39  ;;  %v518_v46 = vld [vmem:[#allocation11 + $0xe8] sm:$0xff]  ;;  %v1539_v47 = vpack.c.bf16 %v623_v43, %v622_v42  ;;  %v624_v48 = vld [vmem:[#allocation11 + $0x10] sm:$0xff]  ;;  %v625_v49 = vld [vmem:[#allocation11 + $0x18] sm:$0xff] }
  0x97   : > { %1486 = vmatpush3.bf16.msra.mxu0 %v1483_v8  ;;  %1516 = vmatprep.subr.bf16.mxu1 %v1515_v26  ;;  %v1531_v50 = vpack.c.bf16 %v518_v46, %v517_v45  ;;  %v519_v51 = vld [vmem:[#allocation11 + $0xf0] sm:$0xff]  ;;  %v520_v52 = vld [vmem:[#allocation11 + $0xf8] sm:$0xff]  ;;  %v1543_v54 = vpack.c.bf16 %v625_v49, %v624_v48  ;;  %v626_v55 = vld [vmem:[#allocation11 + $0x20] sm:$0xff] }
  0x98   : > { %1488 = vmatprep.subr.bf16.mxu0 %v1487_v12  ;;  %v2232_v53 = vld [vmem:[%s2216_s15 + $0x8] sm:$0xff]  ;;  %v1535_v57 = vpack.c.bf16 %v520_v52, %v519_v51  ;;  %v628_v59 = vld [vmem:[#allocation11 + $0x30] sm:$0xff]  ;;  %v630_v62 = vld [vmem:[#allocation11 + $0x40] sm:$0xff] }
  0x99   : > { %v627_v56 = vld [vmem:[#allocation11 + $0x28] sm:$0xff]  ;;  %v629_v60 = vld [vmem:[#allocation11 + $0x38] sm:$0xff]  ;;  %v632_v1 = vld [vmem:[#allocation11 + $0x50] sm:$0xff] }
  0x9a   : > { %1518 = vmatpush3.bf16.msra.mxu1 %v1515_v26  ;;  %v1547_v58 = vpack.c.bf16 %v627_v56, %v626_v55  ;;  %v1551_v61 = vpack.c.bf16 %v629_v60, %v628_v59  ;;  %v631_v63 = vld [vmem:[#allocation11 + $0x48] sm:$0xff]  ;;  %v633_v2 = vld [vmem:[#allocation11 + $0x58] sm:$0xff]  ;;  %v634_v4 = vld [vmem:[#allocation11 + $0x60] sm:$0xff] }
  0x9b   : > { %1490 = vmatpush3.bf16.msra.mxu0 %v1487_v12  ;;  %1520 = vmatprep.subr.bf16.mxu1 %v1519_v32  ;;  %v1555_v0 = vpack.c.bf16 %v631_v63, %v630_v62  ;;  %v1559_v3 = vpack.c.bf16 %v633_v2, %v632_v1  ;;  %v635_v5 = vld [vmem:[#allocation11 + $0x68] sm:$0xff]  ;;  %v636_v7 = vld [vmem:[#allocation11 + $0x70] sm:$0xff]  ;;  %v637_v8 = vld [vmem:[#allocation11 + $0x78] sm:$0xff] }
  0x9c   : > { %1492 = vmatprep.subr.bf16.mxu0 %v1491_v23  ;;  %v1563_v6 = vpack.c.bf16 %v635_v5, %v634_v4  ;;  %v1567_v10 = vpack.c.bf16 %v637_v8, %v636_v7  ;;  %v1245_v11 = vld [vmem:[%s2386_s3 + $0x2] ss:$0 sm:$0xff]  ;;  %v1246_v16 = vld [vmem:[%s2386_s3 + $0x1] ss:$0 sm:$0xff]  ;;  %v1249_v27 = vld [vmem:[%s2386_s3] ss:$0 sm:$0xff] }
  0x9e   : > { %1522 = vmatpush3.bf16.msra.mxu1 %v1519_v32 }
  0x9f   : > { %1494 = vmatpush3.bf16.msra.mxu0 %v1491_v23  ;;  %1524 = vmatprep.subr.bf16.mxu1 %v1523_v38 }
  0xa0   : > { %1496 = vmatprep.subr.bf16.mxu0 %v1495_v29 }
  0xa2   : > { %1526 = vmatpush3.bf16.msra.mxu1 %v1523_v38 }
  0xa3   : > { %1498 = vmatpush3.bf16.msra.mxu0 %v1495_v29  ;;  %1528 = vmatprep.subr.bf16.mxu1 %v1527_v44 }
  0xa4   : > { %1500 = vmatprep.subr.bf16.mxu0 %v1499_v35 }
  0xa6   : > { %1530 = vmatpush3.bf16.msra.mxu1 %v1527_v44 }
  0xa7   : > { %1502 = vmatpush3.bf16.msra.mxu0 %v1499_v35  ;;  %1532 = vmatprep.subr.bf16.mxu1 %v1531_v50 }
  0xa8   : > { %1504 = vmatprep.subr.bf16.mxu0 %v1503_v41 }
  0xaa   : > { %1534 = vmatpush3.bf16.msra.mxu1 %v1531_v50 }
  0xab   : > { %1506 = vmatpush3.bf16.msra.mxu0 %v1503_v41  ;;  %1536 = vmatprep.subr.bf16.mxu1 %v1535_v57 }
  0xac   : > { %1540 = vmatprep.subr.bf16.mxu0 %v1539_v47 }
  0xae   : > { %1368 = vmatmul.mubr.f32.vlgmr.msra.gmra.mrb[0].mxu0 %v2232_v53  ;;  %1538 = vmatpush3.bf16.msra.mxu1 %v1535_v57 }
  0xaf   : > { %1542 = vmatpush3.bf16.msra.mxu0 %v1539_v47  ;;  %1437 = vmatprep.mubr.f32.mxu0 %v2227_v9 }
  0xb0   : > { %1544 = vmatprep.subr.bf16.mxu0 %v1543_v54 }
  0xb1   : > { %1403 = vmatmul.mubr.f32.vlgmr.msra.gmra.mrb[0].mxu1 %v2232_v53 }
  0xb3   : > { %1546 = vmatpush3.bf16.msra.mxu0 %v1543_v54 }
  0xb4   : > { %1548 = vmatprep.subr.bf16.mxu0 %v1547_v58 }
  0xb7   : > { %1550 = vmatpush3.bf16.msra.mxu0 %v1547_v58 }
  0xb8   : > { %1552 = vmatprep.subr.bf16.mxu0 %v1551_v61 }
  0xbb   : > { %1554 = vmatpush3.bf16.msra.mxu0 %v1551_v61 }
  0xbc   : > { %1556 = vmatprep.subr.bf16.mxu0 %v1555_v0 }
  0xbf   : > { %1558 = vmatpush3.bf16.msra.mxu0 %v1555_v0 }
  0xc0   : > { %1560 = vmatprep.subr.bf16.mxu0 %v1559_v3 }
  0xc3   : > { %1562 = vmatpush3.bf16.msra.mxu0 %v1559_v3 }
  0xc4   : > { %1564 = vmatprep.subr.bf16.mxu0 %v1563_v6 }
  0xc7   : > { %1566 = vmatpush3.bf16.msra.mxu0 %v1563_v6 }
  0xc8   : > { %1568 = vmatprep.subr.bf16.mxu0 %v1567_v10 }
  0xcb   : > { %1570 = vmatpush3.bf16.msra.mxu0 %v1567_v10 }
  0xce   : > { %1438 = vmatmul.mubr.f32.vlgmr.msra.gmra.mrb[2].mxu0 %v2232_v53 }
 0x181   : > { %v1369_v12 = vpop.f32.mrb[0].mxu0 }
 0x182   : > { %v499_v13 = vadd.f32 %v1369_v12, %v1245_v11  ;;  %v493_v14 = vpop.f32.mrb[1].mxu0 }
 0x183   : > { %v494_v15 = vadd.f32 %v1245_v11, %v493_v14 }
 0x184   : > { %503 = vst [vmem:[#allocation4 + $0x8] sm:$0xff] %v499_v13  ;;  %v1404_v17 = vpop.f32.mrb[0].mxu1 }
 0x185   : > { %502 = vst [vmem:[#allocation4] sm:$0xff] %v494_v15  ;;  %v598_v18 = vadd.f32 %v1404_v17, %v1246_v16  ;;  %v592_v19 = vpop.f32.mrb[1].mxu1 }
 0x186   : > { %v593_v20 = vadd.f32 %v1246_v16, %v592_v19 }
 0x187   : > { %v1248_v21 = vmul.f32 -1.442695, %v598_v18 }
 0x188   : > { %v1247_v22 = vmul.f32 -1.442695, %v593_v20 }
 0x189   : > { %1708 = vpow2.f32 %v1248_v21 }
 0x18a   : > { %1710 = vpow2.f32 %v1247_v22 }
 0x193   : > { %v1709_v23 = vpop.eup %1708 }
 0x194   : > { %v1711_v24 = vpop.eup %1710  ;;  %v608_v25 = vadd.f32 1.0, %v1709_v23  ;;  %v1935_v23 = vmov -1.0  }
 0x195   : > { %v607_v26 = vadd.f32 1.0, %v1711_v24 }
 0x196   : > { %1712 = vrcp.f32 %v608_v25 }
 0x197   : > { %1714 = vrcp.f32 %v607_v26 }
 0x1a0   : > { %v1713_v35 = vpop.eup %1712 }
 0x1a1   : > { %v1439_v28 = vpop.f32.mrb[2].mxu0  ;;  %v1715_v38 = vpop.eup %1714  ;;  %v616_v40 = vmul.f32 %v1713_v35, %v614_v33 }
 0x1a2   : > { %v2247_v29 = vadd.f32 %v1439_v28, %v1249_v27  ;;  %v709_v30 = vpop.f32.mrb[3].mxu0  ;;  %v615_v42 = vmul.f32 %v1715_v38, %v614_v33 }
 0x1a3   : > { %v2249_v31 = vadd.f32 %v1249_v27, %v709_v30  ;;  %v2259_v44 = vadd.f32 %v617_v37, %v616_v40 }
 0x1a4   : > { %v2252_v32 = vmul.f32 0.70710677, %v2247_v29  ;;  %v2261_v46 = vadd.f32 %v617_v37, %v615_v42  ;;  %v721_v30 = vmul.f32 0.5, %v2247_v29  ;;  %v1936_v29 = vmov (!%p1250_p4), 0.0  }
 0x1a5   : > { %v2255_v34 = vmul.f32 0.70710677, %v2249_v31  ;;  %621 = vst [vmem:[#allocation3 + $0x8] sm:$0xff] %v2259_v44  ;;  %v719_v35 = vsub.f32 1.0, %v2259_v44  ;;  %786 = vst [vmem:[#allocation5] sm:$0x1] (!%p1250_p4), %v1936_v29 }
 0x1a6   : > { %v729_v36 = vand.u32 2147483647, %v2252_v32  ;;  %620 = vst [vmem:[#allocation3] sm:$0xff] %v2261_v46  ;;  %vm725_vm0 = vcmp.ge.f32.partialorder %v2252_v32, 0.0  ;;  %v720_v32 = vmul.f32 0.5, %v2249_v31 }
 0x1a7   : > { %v728_v39 = vand.u32 2147483647, %v2255_v34  ;;  %vm724_vm1 = vcmp.ge.f32.partialorder %v2255_v34, 0.0  ;;  %v727_v24 = vsel %vm725_vm0, 1.0, %v1935_v23  ;;  %v718_v34 = vsub.f32 1.0, %v2261_v46 }
 0x1a8   : > { %v731_v41 = vmul.f32 0.3275911, %v729_v36  ;;  %v761_v51 = vsub.f32 0.0, %v729_v36  ;;  %v726_v27 = vsel %vm724_vm1, 1.0, %v1935_v23 }
 0x1a9   : > { %v730_v43 = vmul.f32 0.3275911, %v728_v39  ;;  %v760_v55 = vsub.f32 0.0, %v728_v39 }
 0x1aa   : > { %v733_v45 = vadd.f32 1.0, %v731_v41  ;;  %v763_v58 = vmul.f32 %v761_v51, %v729_v36 }
 0x1ab   : > { %v732_v47 = vadd.f32 1.0, %v730_v43  ;;  %v762_v61 = vmul.f32 %v760_v55, %v728_v39 }
 0x1ac   : > { %1716 = vrcp.f32 %v733_v45  ;;  %v766_v0 = vmul.f32 1.442695, %v763_v58 }
 0x1ad   : > { %1718 = vrcp.f32 %v732_v47  ;;  %v764_v3 = vmul.f32 1.442695, %v762_v61 }
 0x1ae   : > { %1720 = vpow2.f32 %v766_v0 }
 0x1af   : > { %1722 = vpow2.f32 %v764_v3 }
 0x1b6   : > { %v1717_v48 = vpop.eup %1716 }
 0x1b7   : > { %v1719_v49 = vpop.eup %1718  ;;  %v737_v50 = vmul.f32 %v1717_v48, %v733_v45 }
 0x1b8   : > { %v736_v52 = vmul.f32 %v1719_v49, %v732_v47  ;;  %v1721_v17 = vpop.eup %1720 }
 0x1b9   : > { %v739_v54 = vsub.f32 2.0, %v737_v50  ;;  %v1723_v19 = vpop.eup %1722 }
 0x1ba   : > { %v738_v56 = vsub.f32 2.0, %v736_v52 }
 0x1bb   : > { %v741_v57 = vmul.f32 %v1717_v48, %v739_v54 }
 0x1bc   : > { %v740_v59 = vmul.f32 %v1719_v49, %v738_v56 }
 0x1bd   : > { %v743_v60 = vmul.f32 1.0614054, %v741_v57 }
 0x1be   : > { %v742_v62 = vmul.f32 1.0614054, %v740_v59 }
 0x1bf   : > { %v745_v63 = vadd.f32 -1.4531521, %v743_v60 }
 0x1c0   : > { %v744_v1 = vadd.f32 -1.4531521, %v742_v62 }
 0x1c1   : > { %v747_v2 = vmul.f32 %v745_v63, %v741_v57 }
 0x1c2   : > { %v746_v4 = vmul.f32 %v744_v1, %v740_v59 }
 0x1c3   : > { %v749_v5 = vadd.f32 1.4214138, %v747_v2 }
 0x1c4   : > { %v748_v6 = vadd.f32 1.4214138, %v746_v4 }
 0x1c5   : > { %v751_v7 = vmul.f32 %v749_v5, %v741_v57 }
 0x1c6   : > { %v750_v8 = vmul.f32 %v748_v6, %v740_v59 }
 0x1c7   : > { %v753_v10 = vadd.f32 -0.28449672, %v751_v7 }
 0x1c8   : > { %v752_v11 = vadd.f32 -0.28449672, %v750_v8 }
 0x1c9   : > { %v755_v12 = vmul.f32 %v753_v10, %v741_v57 }
 0x1ca   : > { %v754_v13 = vmul.f32 %v752_v11, %v740_v59 }
 0x1cb   : > { %v757_v14 = vadd.f32 0.2548296, %v755_v12 }
 0x1cc   : > { %v756_v15 = vadd.f32 0.2548296, %v754_v13 }
 0x1cd   : > { %v759_v16 = vmul.f32 %v757_v14, %v741_v57 }
 0x1ce   : > { %v758_v18 = vmul.f32 %v756_v15, %v740_v59 }
 0x1cf   : > { %v769_v20 = vmul.f32 %v1721_v17, %v759_v16 }
 0x1d0   : > { %v768_v21 = vmul.f32 %v1723_v19, %v758_v18 }
 0x1d1   : > { %v771_v22 = vsub.f32 1.0, %v769_v20 }
 0x1d2   : > { %v770_v25 = vsub.f32 1.0, %v768_v21 }
 0x1d3   : > { %v773_v26 = vmul.f32 %v771_v22, %v727_v24 }
 0x1d4   : > { %v772_v28 = vmul.f32 %v770_v25, %v726_v27 }
 0x1d5   : > { %v775_v33 = vadd.f32 1.0, %v773_v26 }
 0x1d6   : > { %v774_v36 = vadd.f32 1.0, %v772_v28  ;;  %785 = sbr.rel (%p1250_p4) target bundleno = 477 (0x1dd), region = 72 }
 0x1d7   : > { %v777_v37 = vmul.f32 %v775_v33, %v721_v30 }
 0x1d8   : > { %v776_v38 = vmul.f32 %v774_v36, %v720_v32 }
 0x1d9   : > { %v779_v39 = vmul.f32 %v777_v37, %v719_v35 }
 0x1da   : > { %v778_v40 = vmul.f32 %v776_v38, %v718_v34 }
 0x1db   : > { %781 = vst [vmem:[#allocation2 + $0x8] sm:$0xff] %v779_v39 }
 0x1dc   : > { %780 = vst [vmem:[#allocation2] sm:$0xff] %v778_v40 }
 0x1dd PF: > { %v788_v41 = vld [vmem:[#allocation3] sm:$0xff]  ;;  %v790_v42 = vlaneseq  ;;  %v826_v45 = vld [vmem:[#allocation3 + $0x8] sm:$0xff]  ;;  %s2434_s4 = sld [smem:[#allocation25_spill]]  ;;  %s2435_s19 = sld [smem:[#allocation19_spill]] }
 0x1de   : > { %v793_v43 = vrot.slane %v788_v41, 7  ;;  %v829_v48 = vrot.slane %v826_v45, 7  ;;  %v1251_v15 = vld [vmem:[#allocation5] ss:$0 sm:$0xff]  ;;  %v963_v34 = vld [vmem:[#allocation13] sm:$0xff]  ;;  %v964_v37 = vld [vmem:[#allocation13 + $0x8] sm:$0xff] }
 0x1df   : > { %v791_v47 = vshrl.u32 %v790_v42, 7  ;;  %v1571_v38 = vpack.c.bf16 %v964_v37, %v963_v34  ;;  %s1258_s15 = sshll.u32 %s1912_s18, 1  ;;  %s2436_s28 = sld [smem:[#allocation26_spill]] }
 0x1e0   : > { %s2437_s22 = sld [smem:[#allocation27_spill]]  ;;  %s1121_s29 = sshll.u32 %s2275_s13, 4  ;;  %s2326_s29 = int_to_ptr.vmem [resolvable:$true] %s1121_s29 }
 0x1e1   : > { %vm792_vm2 = vcmp.ge.s32.totalorder %v791_v47, 1  ;;  %vm800_vm3 = vcmp.ge.s32.totalorder %v791_v47, 2  ;;  %vm808_vm4 = vcmp.ge.s32.totalorder %v791_v47, 4  ;;  %v852_v26 = vsub.s32 7, %v791_v47  ;;  %1572 = vmatprep.subr.bf16.mxu1 %v1571_v38  ;;  %s2439_s8 = sld [smem:[#allocation28_spill]] }
 0x1e2   : > { %v828_v46 = vld [vmem:[#allocation2 + $0x8] sm:$0xff]  ;;  %v794_v50 = vsel %vm792_vm2, %v793_v43, 1.0  ;;  %v830_v52 = vsel %vm792_vm2, %v829_v48, 1.0  ;;  %1574 = vmatpush3.bf16.msra.mxu1 %v1571_v38  ;;  %v967_v48 = vld [vmem:[#allocation13 + $0x20] sm:$0xff] }
 0x1e3   : > { %v789_v31 = vld [vmem:[#allocation2] sm:$0xff]  ;;  %v831_v49 = vrot.slane %v828_v46, 7  ;;  %v799_v56 = vmul.f32 %v794_v50, %v788_v41  ;;  %v835_v58 = vmul.f32 %v830_v52, %v826_v45  ;;  %v970_v52 = vld [vmem:[#allocation13 + $0x38] sm:$0xff]  ;;  %s1259_s5 = sshll.u32 %s2435_s19, 3  ;;  %s1826_s19 = scalar_lea.vmem %s2326_s29, 256 }
 0x1e4   : > { %v795_v44 = vrot.slane %v789_v31, 7  ;;  %s1118_s25 = sadd.s32 %s1259_s5, %s1258_s15  ;;  %p1827_p10 = scmp.ne.s32.totalorder %s2326_s29, %s1826_s19 }
 0x1e5   : > { %v832_v54 = vsel %vm792_vm2, %v831_v49, 0.0  ;;  %v801_v60 = vrot.slane %v799_v56, 6  ;;  %v836_v62 = vrot.slane %v835_v58, 6  ;;  %v968_v49 = vld [vmem:[#allocation13 + $0x28] sm:$0xff]  ;;  %s1260_s18 = sshll.u32 %s1118_s25, 7  ;;  %s1937_s15 = smov [#allocation14]  }
 0x1e6   : > { %v796_v51 = vsel %vm792_vm2, %v795_v44, 0.0  ;;  %v833_v57 = vmul.f32 %v832_v54, %v826_v45  ;;  %v965_v45 = vld [vmem:[#allocation13 + $0x10] sm:$0xff]  ;;  %v1579_v50 = vpack.c.bf16 %v968_v49, %v967_v48  ;;  %p1828_p6 = pnand %p1827_p10, %p2146_p8  ;;  %s1830_s5 = sshll.u32 %s1937_s15, 4  ;;  %s1831_s5 = int_to_ptr.vmem [resolvable:$false] %s1830_s5 }
 0x1e7   : > { %v797_v55 = vmul.f32 %v796_v51, %v788_v41  ;;  %v802_v63 = vsel %vm800_vm3, %v801_v60, 1.0  ;;  %v837_v1 = vsel %vm800_vm3, %v836_v62, 1.0  ;;  %v969_v51 = vld [vmem:[#allocation13 + $0x30] sm:$0xff]  ;;  %v976_v62 = vld [vmem:[#allocation13 + $0x68] sm:$0xff]  ;;  %s2324_s9 = scalar_lea.hbm %s2439_s8, %s1260_s18  ;;  %s1832_s24 = scalar_lea.vmem %s1831_s5, 512 }
 0x1e8   : > { %v834_v61 = vadd.f32 %v833_v57, %v828_v46  ;;  %v807_v3 = vmul.f32 %v802_v63, %v799_v56  ;;  %v842_v10 = vmul.f32 %v837_v1, %v835_v58  ;;  %v966_v46 = vld [vmem:[#allocation13 + $0x18] sm:$0xff]  ;;  %v1583_v54 = vpack.c.bf16 %v970_v52, %v969_v51  ;;  %v973_v57 = vld [vmem:[#allocation13 + $0x50] sm:$0xff]  ;;  %p1829_p11 = pneg %p1828_p6  ;;  %p1833_p13 = scmp.lt.s32.totalorder %s2326_s29, %s1831_s5 }
 0x1e9   : > { %v798_v59 = vadd.f32 %v797_v55, %v789_v31  ;;  %v1575_v47 = vpack.c.bf16 %v966_v46, %v965_v45  ;;  %v971_v55 = vld [vmem:[#allocation13 + $0x40] sm:$0xff]  ;;  %v978_v1 = vld [vmem:[#allocation13 + $0x78] sm:$0xff]  ;;  %p1834_p3 = scmp.lt.s32.totalorder %s1832_s24, %s1826_s19 }
 0x1ea   : > { %v838_v2 = vrot.slane %v834_v61, 6  ;;  %v809_v7 = vrot.slane %v807_v3, 4  ;;  %v843_v17 = vrot.slane %v842_v10, 4 }
 0x1eb   : > { %v803_v0 = vrot.slane %v798_v59, 6  ;;  %1576 = vmatprep.subr.bf16.mxu1 %v1575_v47  ;;  %p1835_p7 = por %p1834_p3, %p1833_p13 }
 0x1ec   : > { %v839_v5 = vsel %vm800_vm3, %v838_v2, 0.0  ;;  %v810_v12 = vsel %vm808_vm4, %v809_v7, 1.0  ;;  %v844_v24 = vsel %vm808_vm4, %v843_v17, 1.0  ;;  %1578 = vmatpush3.bf16.msra.mxu1 %v1575_v47 }
 0x1ed   : > { %v804_v4 = vsel %vm800_vm3, %v803_v0, 0.0  ;;  %v840_v8 = vmul.f32 %v839_v5, %v835_v58  ;;  %v815_v14 = vmul.f32 %v810_v12, %v807_v3  ;;  %v849_v30 = vmul.f32 %v844_v24, %v842_v10  ;;  %1580 = vmatprep.subr.bf16.mxu1 %v1579_v50  ;;  %v977_v0 = vld [vmem:[#allocation13 + $0x70] sm:$0xff]  ;;  %p1836_p12 = pnand %p1835_p7, %p1829_p11 }
 0x1ee   : > { %v805_v6 = vmul.f32 %v804_v4, %v799_v56  ;;  %v972_v56 = vld [vmem:[#allocation13 + $0x48] sm:$0xff]  ;;  %v1599_v2 = vpack.c.bf16 %v978_v1, %v977_v0  ;;  %v2293_v5 = vld [vmem:[#allocation4 + $0x8] sm:$0xff] }
 0x1ef   : > { %v841_v13 = vadd.f32 %v840_v8, %v834_v61  ;;  %v822_v22 = vmul.f32 %v1251_v15, %v815_v14  ;;  %v1587_v58 = vpack.c.bf16 %v972_v56, %v971_v55  ;;  %v975_v61 = vld [vmem:[#allocation13 + $0x60] sm:$0xff]  ;;  %v906_v7 = vmul.f32 0.70710677, %v2293_v5 }
 0x1f0   : > { %v806_v11 = vadd.f32 %v805_v6, %v798_v59  ;;  %1582 = vmatpush3.bf16.msra.mxu1 %v1579_v50  ;;  %v974_v59 = vld [vmem:[#allocation13 + $0x58] sm:$0xff]  ;;  %v1595_v63 = vpack.c.bf16 %v976_v62, %v975_v61 }
 0x1f1   : > { %v845_v18 = vrot.slane %v841_v13, 4  ;;  %1584 = vmatprep.subr.bf16.mxu1 %v1583_v54  ;;  %v1591_v60 = vpack.c.bf16 %v974_v59, %v973_v57  ;;  %vm908_vm6 = vcmp.ge.f32.partialorder %v906_v7, 0.0 }
 0x1f2   : > { %v811_v16 = vrot.slane %v806_v11, 4  ;;  %v910_v0 = vsel %vm908_vm6, 1.0, %v1935_v23 }
 0x1f3   : > { %v846_v20 = vsel %vm808_vm4, %v845_v18, 0.0 }
 0x1f4   : > { %v812_v19 = vsel %vm808_vm4, %v811_v16, 0.0  ;;  %v847_v27 = vmul.f32 %v846_v20, %v842_v10  ;;  %1586 = vmatpush3.bf16.msra.mxu1 %v1583_v54  ;;  %v912_v10 = vand.u32 2147483647, %v906_v7 }
 0x1f5   : > { %v813_v21 = vmul.f32 %v812_v19, %v807_v3  ;;  %1588 = vmatprep.subr.bf16.mxu1 %v1587_v58  ;;  %v2290_v3 = vld [vmem:[#allocation4] sm:$0xff] }
 0x1f6   : > { %v848_v35 = vadd.f32 %v847_v27, %v841_v13  ;;  %v905_v4 = vmul.f32 0.70710677, %v2290_v3  ;;  %v914_v12 = vmul.f32 0.3275911, %v912_v10  ;;  %v903_v1 = vmul.f32 0.5, %v2290_v3 }
 0x1f7   : > { %v814_v25 = vadd.f32 %v813_v21, %v806_v11 }
 0x1f8   : > { %1590 = vmatpush3.bf16.msra.mxu1 %v1587_v58  ;;  %v911_v6 = vand.u32 2147483647, %v905_v4  ;;  %v916_v13 = vadd.f32 1.0, %v914_v12  ;;  %vm907_vm5 = vcmp.ge.f32.partialorder %v905_v4, 0.0 }
 0x1f9   : > { %v823_v28 = vadd.f32 %v822_v22, %v814_v25  ;;  %1592 = vmatprep.subr.bf16.mxu1 %v1591_v60  ;;  %v909_v59 = vsel %vm907_vm5, 1.0, %v1935_v23  ;;  %v904_v23 = vmul.f32 0.5, %v2293_v5 }
 0x1fa   : > { %v913_v8 = vmul.f32 0.3275911, %v911_v6 }
 0x1fb   : > { %824 = vst [vmem:[#allocation2] sm:$0xff] %v823_v28  ;;  %v853_v33 = vrot.slane %v823_v28, %v852_v26  ;;  %862 = vadd.xlane.f32.xlu0 %v823_v28 }
 0x1fc   : > { %1594 = vmatpush3.bf16.msra.mxu1 %v1591_v60  ;;  %v915_v11 = vadd.f32 1.0, %v913_v8 }
 0x1fd   : > { %v854_v32 = vmul.f32 %v853_v33, %v849_v30  ;;  %1596 = vmatprep.subr.bf16.mxu1 %v1595_v63 }
 0x1fe   : > { %1724 = vrcp.f32 %v915_v11 }
 0x1ff   : > { %v855_v36 = vadd.f32 %v854_v32, %v848_v35  ;;  %1726 = vrcp.f32 %v916_v13 }
 0x200   : > { %1598 = vmatpush3.bf16.msra.mxu1 %v1595_v63 }
 0x201   : > { %856 = vst [vmem:[#allocation2 + $0x8] sm:$0xff] %v855_v36  ;;  %857 = vst [vmem:[#allocation5 - $0x7] sm:$0x80] %v855_v36  ;;  %864 = vadd.xlane.f32.xlu0 %v855_v36  ;;  %1600 = vmatprep.subr.bf16.mxu1 %v1599_v2 }
 0x204   : > { %1602 = vmatpush3.bf16.msra.mxu1 %v1599_v2 }
 0x208   : > { %v1725_v14 = vpop.eup %1724 }
 0x209   : > { %v919_v15 = vmul.f32 %v1725_v14, %v915_v11  ;;  %v1727_v16 = vpop.eup %1726  ;;  %v1253_v11 = vld [vmem:[%s2390_s7] ss:$0 sm:$0xff] }
 0x20a   : > { %v920_v18 = vmul.f32 %v1727_v16, %v916_v13 }
 0x20b   : > { %v921_v17 = vsub.f32 2.0, %v919_v15 }
 0x20c   : > { %v922_v20 = vsub.f32 2.0, %v920_v18 }
 0x20d   : > { %v923_v19 = vmul.f32 %v1725_v14, %v921_v17 }
 0x20e   : > { %v924_v22 = vmul.f32 %v1727_v16, %v922_v20  ;;  %v1254_v20 = vld [vmem:[%s2434_s4] ss:$0 sm:$0xff]  ;;  %s1106_s4 = scalar_lea.sflag [#allocation10], %s2210_s14 }
 0x20f   : > { %v925_v21 = vmul.f32 1.0614054, %v923_v19 }
 0x210   : > { %v926_v25 = vmul.f32 1.0614054, %v924_v22 }
 0x211   : > { %v927_v24 = vadd.f32 -1.4531521, %v925_v21 }
 0x212   : > { %v928_v27 = vadd.f32 -1.4531521, %v926_v25 }
 0x213   : > { %v929_v26 = vmul.f32 %v927_v24, %v923_v19 }
 0x214   : > { %v930_v33 = vmul.f32 %v928_v27, %v924_v22 }
 0x215   : > { %v931_v30 = vadd.f32 1.4214138, %v929_v26 }
 0x216   : > { %v932_v34 = vadd.f32 1.4214138, %v930_v33 }
 0x217   : > { %v933_v32 = vmul.f32 %v931_v30, %v923_v19 }
 0x219   : > { %v935_v38 = vadd.f32 -0.28449672, %v933_v32 }
 0x288   : > { %v863_v39 = vpop.xlane.xlu0 %862 }
 0x289   : > { %v867_v40 = vmul.f32 0.0078125, %v863_v39 }
 0x28b   : > { %v2282_v29 = vsub.f32 %v823_v28, %v867_v40  ;;  %v943_v28 = vsub.f32 0.0, %v911_v6  ;;  %v934_v40 = vmul.f32 %v932_v34, %v924_v22 }
 0x28d   : > { %v871_v41 = vmul.f32 %v2282_v29, %v2282_v29  ;;  %v945_v35 = vmul.f32 %v943_v28, %v911_v6  ;;  %v1252_v6 = vld [vmem:[%s2389_s6] ss:$0 sm:$0xff] }
 0x28e   : > { %v865_v31 = vpop.xlane.xlu0 %864 }
 0x28f   : > { %v868_v42 = vmul.f32 0.0078125, %v865_v31  ;;  %873 = vadd.xlane.f32.xlu1 %v871_v41  ;;  %v947_v37 = vmul.f32 1.442695, %v945_v35  ;;  %v937_v41 = vmul.f32 %v935_v38, %v923_v19 }
 0x291   : > { %v2286_v43 = vsub.f32 %v855_v36, %v868_v42  ;;  %v944_v36 = vsub.f32 0.0, %v912_v10  ;;  %1728 = vpow2.f32 %v947_v37  ;;  %v936_v42 = vadd.f32 -0.28449672, %v934_v40 }
 0x293   : > { %v872_v44 = vmul.f32 %v2286_v43, %v2286_v43  ;;  %v946_v39 = vmul.f32 %v944_v36, %v912_v10  ;;  %v938_v45 = vmul.f32 %v936_v42, %v924_v22 }
 0x295   : > { %875 = vadd.xlane.f32.xlu1 %v872_v44  ;;  %v949_v31 = vmul.f32 1.442695, %v946_v39  ;;  %v939_v44 = vadd.f32 0.2548296, %v937_v41  ;;  %v940_v49 = vadd.f32 0.2548296, %v938_v45 }
 0x296   : > { %v1255_v41 = vld [vmem:[%s2436_s28] ss:$0 sm:$0xff] }
 0x297   : > { %1730 = vpow2.f32 %v949_v31  ;;  %v941_v46 = vmul.f32 %v939_v44, %v923_v19  ;;  %v942_v54 = vmul.f32 %v940_v49, %v924_v22  ;;  %v1256_v45 = vld [vmem:[%s2437_s22] ss:$0 sm:$0xff] }
 0x29b   : > { %v1729_v47 = vpop.eup %1728 }
 0x29c   : > { %v951_v51 = vmul.f32 %v1729_v47, %v941_v46 }
 0x29e   : > { %v953_v57 = vsub.f32 1.0, %v951_v51 }
 0x2a0   : > { %v955_v62 = vmul.f32 %v953_v57, %v909_v59 }
 0x2a1   : > { %v1731_v55 = vpop.eup %1730 }
 0x2a2   : > { %v952_v60 = vmul.f32 %v1731_v55, %v942_v54  ;;  %v957_v2 = vadd.f32 1.0, %v955_v62 }
 0x2a4   : > { %v954_v63 = vsub.f32 1.0, %v952_v60  ;;  %v959_v12 = vmul.f32 %v957_v2, %v903_v1 }
 0x2a6   : > { %v956_v10 = vmul.f32 %v954_v63, %v910_v0 }
 0x2a8   : > { %v958_v14 = vadd.f32 1.0, %v956_v10 }
 0x2aa   : > { %v960_v18 = vmul.f32 %v958_v14, %v904_v23 }
 0x31c   : > { %v874_v48 = vpop.xlane.xlu1 %873 }
 0x31d   : > { %v877_v50 = vmul.f32 0.0078125, %v874_v48 }
 0x31f   : > { %v879_v52 = vadd.f32 1e-05, %v877_v50 }
 0x321   : > { %1732 = vrsqrt.f32 %v879_v52 }
 0x322   : > { %v876_v56 = vpop.xlane.xlu1 %875 }
 0x323   : > { %v878_v58 = vmul.f32 0.0078125, %v876_v56 }
 0x325   : > { %v880_v61 = vadd.f32 1e-05, %v878_v58 }
 0x327   : > { %1734 = vrsqrt.f32 %v880_v61 }
 0x32b   : > { %v1733_v4 = vpop.eup %1732 }
 0x32c   : > { %v883_v8 = vmul.f32 %v1733_v4, %v2282_v29 }
 0x32e   : > { %v891_v7 = vmul.f32 %v1252_v6, %v883_v8 }
 0x330   : > { %v899_v13 = vadd.f32 %v1253_v11, %v891_v7 }
 0x331   : > { %v1735_v3 = vpop.eup %1734 }
 0x332   : > { %v884_v15 = vmul.f32 %v1735_v3, %v2286_v43  ;;  %v961_v16 = vmul.f32 %v959_v12, %v899_v13 }
 0x334   : > { %v892_v17 = vmul.f32 %v1252_v6, %v884_v15  ;;  %1472 = vmatprep.mubr.f32.mxu1 %v961_v16 }
 0x336   : > { %v900_v19 = vadd.f32 %v1253_v11, %v892_v17 }
 0x338   : > { %v962_v29 = vmul.f32 %v960_v18, %v900_v19 }
 0x33a   : > { %1473 = vmatmul.mubr.f32.vlgmr.msra.gmra.mrb[2].mxu1 %v962_v29 }
 0x40d   : > { %v1474_v21 = vpop.f32.mrb[2].mxu1 }
 0x40e   : > { %v1058_v22 = vadd.f32 %v1474_v21, %v1254_v20  ;;  %v1052_v24 = vpop.f32.mrb[3].mxu1 }
 0x40f   : > { %v1053_v25 = vadd.f32 %v1254_v20, %v1052_v24 }
 0x410   : > { %1065 = vadd.xlane.f32.xlu1 %v1058_v22 }
 0x411   : > { %1063 = vadd.xlane.f32.xlu0 %v1053_v25 }
 0x49d   : > { %v1066_v5 = vpop.xlane.xlu1 %1065 }
 0x49e   : > { %v1068_v26 = vmul.f32 0.0078125, %v1066_v5  ;;  %v1064_v43 = vpop.xlane.xlu0 %1063 }
 0x49f   : > { %v1067_v27 = vmul.f32 0.0078125, %v1064_v43 }
 0x4a0   : > { %v1070_v28 = vsub.f32 %v1058_v22, %v1068_v26 }
 0x4a1   : > { %v1069_v30 = vsub.f32 %v1053_v25, %v1067_v27 }
 0x4a2   : > { %v1072_v33 = vmul.f32 %v1070_v28, %v1070_v28 }
 0x4a3   : > { %v1071_v35 = vmul.f32 %v1069_v30, %v1069_v30 }
 0x4a4   : > { %1075 = vadd.xlane.f32.xlu1 %v1072_v33 }
 0x4a5   : > { %1073 = vadd.xlane.f32.xlu0 %v1071_v35 }
 0x531   : > { %v1076_v32 = vpop.xlane.xlu1 %1075 }
 0x532   : > { %v1078_v36 = vmul.f32 0.0078125, %v1076_v32  ;;  %v1074_v34 = vpop.xlane.xlu0 %1073 }
 0x533   : > { %v1077_v37 = vmul.f32 0.0078125, %v1074_v34 }
 0x534   : > { %v1080_v38 = vadd.f32 1e-05, %v1078_v36 }
 0x535   : > { %v1079_v39 = vadd.f32 1e-05, %v1077_v37 }
 0x536   : > { %1736 = vrsqrt.f32 %v1080_v38 }
 0x537   : > { %1738 = vrsqrt.f32 %v1079_v39 }
 0x540   : > { %v1737_v40 = vpop.eup %1736 }
 0x541   : > { %v1739_v31 = vpop.eup %1738  ;;  %v1084_v42 = vmul.f32 %v1737_v40, %v1070_v28 }
 0x542   : > { %v1083_v44 = vmul.f32 %v1739_v31, %v1069_v30 }
 0x543   : > { %v1092_v46 = vmul.f32 %v1255_v41, %v1084_v42 }
 0x544   : > { %v1091_v47 = vmul.f32 %v1255_v41, %v1083_v44 }
 0x545   : > { %v1100_v48 = vadd.f32 %v1256_v45, %v1092_v46 }
 0x546   : > { %v1099_v49 = vadd.f32 %v1256_v45, %v1091_v47 }
 0x547   : > { %v1102_v50 = vadd.f32 %v1100_v48, %v2232_v53 }
 0x548   : > { %v1101_v51 = vadd.f32 %v1099_v49, %v2227_v9 }
 0x549   : > { %1104 = vst [vmem:[%s2275_s13 + $0x8] sm:$0xff] %v1102_v50 }
 0x54a   : > { %1103 = vst [vmem:[%s2275_s13] sm:$0xff] %v1101_v51 }
 0x54b   : > { %1839 = shalt.err (!%p1836_p12)
}
 0x54c   : > { %s1840_s13 = scalar_lea.hbm %s2324_s9, 256  ;;  %s1844_s25 = scalar_lea.hbm %s2439_s8, 2048 }
 0x54d   : > { %p1841_p1 = scmp.ne.s32.totalorder %s2324_s9, %s1840_s13  ;;  %p1845_p9 = scmp.lt.u32.totalorder %s2324_s9, %s2439_s8 }
 0x54e   : > { %p1846_p0 = scmp.lt.u32.totalorder %s1844_s25, %s1840_s13  ;;  %p1848_p10 = scmp.lt.u32.totalorder %s1840_s13, %s2324_s9 }
 0x54f   : > { %p1842_p2 = pnand %p1841_p1, %p2146_p8 }
 0x550   : > { %p1847_p4 = por %p1846_p0, %p1845_p9 }
 0x551   : > { %p1843_p5 = pneg %p1842_p2 }
 0x552   : > { %p1849_p6 = por %p1848_p10, %p1847_p4 }
 0x554   : > { %p1850_p11 = pnand %p1849_p6, %p1843_p5 }
 0x556   : > { %1853 = shalt.err (!%p1850_p11)
}
 0x557   : > { %s1938_s22 = smov 128   ;;  %s1939_s18 = smov 8  }
 0x558   : > { %1613 = dma.vmem_to_hbm [thread:$0]  (%p2146_p8), %s2326_s29, 256, %s2324_s9, %s1106_s4, %s1938_s22, %s1938_s22, %s1939_s18  }
 0x559 PF: > { %s2440_s12 = sld [smem:[#allocation18_spill]]  ;;  %s2441_s30 = sld [smem:[#allocation20_spill]] }
 0x55a   : > { %p1635_p13 = scmp.ge.s32.totalorder %s1928_s0, 2 }
 0x55f   : > { %s1136_s19 = sand.u32 1, %s2440_s12   ;;  %p2442_p3 = scmp.ne.s32.totalorder %s2441_s30, 0 }
 0x560   : > { %s1137_s15 = scalar_lea.sflag [#allocation10], %s1136_s19 }
 0x561   : > { %p1627_p7 = pnand %p1635_p13, %p2442_p3 }
 0x563   : > { %1895 = dma.done.wait (!%p1627_p7), %s1137_s15, 256  }
 0x564   : > { %1897 = vsyncadd (!%p1627_p7), %s1137_s15, 4294967040  ;;  %s28_s0 = sadd.s32 1, %s1928_s0   ;;  %s2443_s14 = sld [smem:[#allocation21_spill]] }
 0x565   : > { %p25_p12 = scmp.ge.s32.totalorder %s28_s0, 10   ;;  %s2444_s15 = smov %s1904_s16 }
 0x566   : > { %s2445_s16 = smov %s1908_s17  ;;  %s2446_s17 = smov %s2159_s2 }
 0x567   : > { %s2447_s18 = smov %s1920_s20  ;;  %s2448_s19 = smov %s1924_s21 }
 0x568   : > { %s2450_s21 = smov %s2456_s11  ;;  %27 = sbr.rel (!%p25_p12) target bundleno = 16 (0x10), region = 117 }
 0x56a   : > { %s2449_s20 = smov %s2443_s14 }
 0x56f   :  { %1142 = vsyncpa [#allocation9], 1 }
 0x570   :  { %1144 = vsyncpa [#allocation9 + $0x1], 1 }
 0x571   :  { %1145 = vsyncpa [#allocation12], 1 }
 0x572   :  { %1146 = vsyncpa [#allocation10], 1 }
 0x573   :  { %1148 = vsyncpa [#allocation10 + $0x1], 1 }

// kernel: tpu_custom_call.1
= control target key start
LH: loop header
LB: loop body
LE: loop exit
PB: predicated region body
PF: predicated region fallthrough
CT: control target
= control target key end

     0   :  { %s2383_s0 = inlined_call_operand.<no memory space> [shape: f32[1], index: 0, kind: input, shape index: {}]   ;;  %s2384_s1 = inlined_call_operand.hbm [shape: f32[2,64,128], index: 1, kind: input, shape index: {}]   ;;  %s2385_s2 = inlined_call_operand.hbm [shape: f32[3,128,128], index: 2, kind: input, shape index: {}]   ;;  %s2386_s3 = inlined_call_operand.vmem [shape: f32[3,128], index: 3, kind: input, shape index: {}]   ;;  %s2387_s4 = inlined_call_operand.hbm [shape: f32[128,128], index: 4, kind: input, shape index: {}]   ;;  %s2388_s5 = inlined_call_operand.vmem [shape: f32[1,128], index: 5, kind: input, shape index: {}]   ;;  %s2389_s6 = inlined_call_operand.vmem [shape: f32[1,128], index: 6, kind: input, shape index: {}]   ;;  %s2390_s7 = inlined_call_operand.vmem [shape: f32[1,128], index: 7, kind: input, shape index: {}]   ;;  %s2391_s8 = inlined_call_operand.vmem [shape: f32[1,128], index: 8, kind: input, shape index: {}]   ;;  %s2392_s9 = inlined_call_operand.vmem [shape: f32[1,128], index: 9, kind: input, shape index: {}]   ;;  %s2393_s10 = inlined_call_operand.hbm [shape: f32[2,64,128], index: 10, kind: output, shape index: {}]  }
   0x1   :  { %2406 = sst [smem:[#allocation23_spill]] %s2385_s2 }
   0x2   :  { %2407 = sst [smem:[#allocation24_spill]] %s2387_s4 }
   0x3   :  { %2408 = sst [smem:[#allocation25_spill]] %s2388_s5 }
   0x4   :  { %2409 = sst [smem:[#allocation26_spill]] %s2391_s8 }
   0x5   :  { %2410 = sst [smem:[#allocation27_spill]] %s2392_s9 }
   0x6   :  { %2411 = sst [smem:[#allocation28_spill]] %s2393_s10 }
   0x7   :  { %15 = sst [smem:[#allocation7]] %s2383_s0 }
   0x8   :  { %16 = vsyncpa [#allocation9], 0 }
   0x9   :  { %18 = vsyncpa [#allocation9 + $0x1], 0 }
   0xa   :  { %19 = vsyncpa [#allocation12], 0 }
   0xb   :  { %20 = vsyncpa [#allocation10], 0 }
   0xc   :  { %22 = vsyncpa [#allocation10 + $0x1], 0  ;;  %s1998_s15 = smov 0   ;;  %s2000_s16 = smov 0  }
   0xd   :  { %s2002_s17 = smov 0   ;;  %s2004_s18 = smov 0  }
   0xe   :  { %s2006_s19 = smov 0   ;;  %s2008_s20 = smov 0  }
   0xf   :  { %s2010_s21 = smov 0   ;;  %s2012_s0 = smov 0  }
  0x10 LB: > { %2412 = sst [smem:[#allocation18_spill]] %s1900_s15  ;;  %s1230_s22 = sadd.s32 4294967295, %s1928_s0   ;;  %s1928_s0 = sphi %s2012_s0, %s28_s0   ;;  %s1924_s21 = sphi %s2010_s21, %s2450_s21   ;;  %s1920_s20 = sphi %s2008_s20, %s2449_s20   ;;  %s1916_s19 = sphi %s2006_s19, %s2448_s19   ;;  %s1912_s18 = sphi %s2004_s18, %s2447_s18   ;;  %s1908_s17 = sphi %s2002_s17, %s2446_s17   ;;  %s1904_s16 = sphi %s2000_s16, %s2445_s16   ;;  %s1900_s15 = sphi %s1998_s15, %s2444_s15  }
  0x11   : > { %2413 = sst [smem:[#allocation19_spill]] %s1916_s19  ;;  %s1231_s23 = sadd.s32 4294967294, %s1928_s0  }
  0x12   : > { %p62_p0 = scmp.ne.s32.totalorder %s1904_s16, %s1900_s15  ;;  %p2042_p1 = scmp.eq.s32.totalorder %s1230_s22, 0 }
  0x13   : > { %p2046_p2 = scmp.eq.s32.totalorder %s1230_s22, 7  ;;  %p262_p3 = scmp.eq.s32.totalorder %s1231_s23, 7 }
  0x14   : > { %s2414_s24 = scalar_select %p2042_p1, 1, 0 }
  0x15   : > { %s2415_s25 = scalar_select %p2046_p2, 1, 0 }
  0x16   : > { %p2052_p4 = por %p2042_p1, %p62_p0  ;;  %p1232_p5 = scmp.ge.s32.totalorder %s1928_s0, 1 }
  0x17   : > { %p2057_p6 = por %p262_p3, %p62_p0  ;;  %p269_p7 = scmp.lt.s32.totalorder %s1928_s0, 9 }
  0x18   : > { %s2416_s26 = scalar_select %p2052_p4, 1, 0 }
  0x19   : > { %s2417_s27 = scalar_select %p2057_p6, 1, 0 }
  0x1a   : > { %p2062_p8 = pnand %p1232_p5, %p269_p7  ;;  %s1930_s29 = smov [#allocation11]  }
  0x1b   : > { %2418 = sst [smem:[#allocation20_spill]] %s2417_s27  ;;  %s281_s30 = sshll.u32 %s1930_s29, 4  ;;  %s282_s30 = int_to_ptr.vmem [resolvable:$true] %s281_s30 }
  0x1c   : > { %s2419_s28 = scalar_select %p2062_p8, 1, 0 }
  0x1d   : > { %p1615_p9 = pneg %p2062_p8  ;;  %s1931_s12 = smov [#allocation13]  }
  0x1e   : > { %s297_s13 = sshll.u32 %s1931_s12, 4  ;;  %s2421_s2 = sld [smem:[#allocation23_spill]]  ;;  %s2074_s13 = int_to_ptr.vmem [resolvable:$true] %s297_s13 }
  0x1f   : > { %p2070_p10 = pnand %p1615_p9, %p2042_p1 }
  0x21   : > { %p1742_p12 = pneg %p2070_p10 }
  0x24   : > { %s1740_s23 = scalar_lea.hbm %s2421_s2, 6144 }
  0x25   : > { %p1741_p11 = scmp.ne.s32.totalorder %s2421_s2, %s1740_s23  ;;  %p1747_p3 = scmp.lt.u32.totalorder %s1740_s23, %s2421_s2 }
  0x27   : > { %p1743_p13 = pnand %p1742_p12, %p1741_p11 }
  0x29   : > { %p1744_p0 = pneg %p1743_p13 }
  0x2b   : > { %p1749_p5 = pnand %p1747_p3, %p1744_p0 }
  0x2d   : > { %1752 = shalt.err (!%p1749_p5)
}
  0x2e   : > { %s1753_s12 = scalar_lea.vmem %s282_s30, 6144  ;;  %p1761_p1 = scmp.lt.s32.totalorder %s282_s30, %s282_s30 }
  0x2f   : > { %p1754_p7 = scmp.ne.s32.totalorder %s282_s30, %s1753_s12  ;;  %p1762_p4 = scmp.lt.s32.totalorder %s1753_s12, %s1753_s12 }
  0x31   : > { %p1756_p9 = pnand %p1754_p7, %p1742_p12  ;;  %p1763_p8 = por %p1762_p4, %p1761_p1 }
  0x33   : > { %p1757_p6 = pneg %p1756_p9 }
  0x35   : > { %p1764_p2 = pnand %p1763_p8, %p1757_p6 }
  0x37   : > { %1767 = shalt.err (!%p1764_p2)
}
  0x38   : > { %s2401_s27 = smov 128   ;;  %s2402_s14 = smov 8  }
  0x39   : > { %1618 = dma.hbm_to_vmem [thread:$0]  (!%p2070_p10), %s2421_s2, 6144, %s282_s30, [#allocation12], %s2401_s27, %s2401_s27, %s2402_s14  }
  0x3a   : > { %s2422_s4 = sld [smem:[#allocation24_spill]] }
  0x40   : > { %s1768_s29 = scalar_lea.hbm %s2422_s4, 2048 }
  0x41   : > { %p1769_p1 = scmp.ne.s32.totalorder %s2422_s4, %s1768_s29  ;;  %p1775_p6 = scmp.lt.u32.totalorder %s1768_s29, %s2422_s4 }
  0x43   : > { %p1771_p2 = pnand %p1769_p1, %p1742_p12 }
  0x45   : > { %p1772_p4 = pneg %p1771_p2 }
  0x47   : > { %p1777_p8 = pnand %p1775_p6, %p1772_p4 }
  0x49   : > { %1780 = shalt.err (!%p1777_p8)
}
  0x4a   : > { %s1781_s30 = scalar_lea.vmem %s2074_s13, 2048  ;;  %p1789_p3 = scmp.lt.s32.totalorder %s2074_s13, %s2074_s13 }
  0x4b   : > { %p1782_p11 = scmp.ne.s32.totalorder %s2074_s13, %s1781_s30  ;;  %p1790_p5 = scmp.lt.s32.totalorder %s1781_s30, %s1781_s30 }
  0x4d   : > { %p1784_p13 = pnand %p1782_p11, %p1742_p12  ;;  %p1791_p7 = por %p1790_p5, %p1789_p3 }
  0x4f   : > { %p1785_p0 = pneg %p1784_p13 }
  0x51   : > { %p1792_p9 = pnand %p1791_p7, %p1785_p0 }
  0x53   : > { %1795 = shalt.err (!%p1792_p9)
}
  0x54   : > { %1621 = dma.hbm_to_vmem [thread:$0]  (!%p2070_p10), %s2422_s4, 2048, %s2074_s13, [#allocation12], %s2401_s27, %s2401_s27, %s2402_s14  }
  0x55   : > { %s37_s19 = sadd.s32 1, %s1920_s20  ;;  %s40_s11 = sadd.s32 1, %s1924_s21 }
  0x56   : > { %p38_p12 = scmp.ge.s32.totalorder %s37_s19, 4  ;;  %s49_s10 = sadd.s32 1, %s1908_s17 }
  0x57   : > { %p56_p1 = scmp.ne.s32.totalorder %s1908_s17, %s1904_s16  ;;  %p57_p2 = scmp.eq.s32.totalorder %s1928_s0, 0 }
  0x58   : > { %s2452_s19 = smov (%p38_p12, %s37_s19), 0  ;;  %s2454_s11 = smov (!%p38_p12, %s40_s11), %s1924_s21 }
  0x59   : > { %2423 = sst [smem:[#allocation21_spill]] %s2452_s19  ;;  %s45_s15 = ssub.s32 %s1920_s20, %s2452_s19 }
  0x5a   : > { %p2140_p4 = por %p57_p2, %p56_p1  ;;  %p42_p10 = scmp.ge.s32.totalorder %s2454_s11, 2 }
  0x5b   : > { %p2425_p6 = scmp.ne.s32.totalorder %s2415_s25, 0  ;;  %p1632_p11 = scmp.lt.s32.totalorder %s1928_s0, 8 }
  0x5c   : > { %s326_s23 = sand.u32 1, %s1908_s17   ;;  %s2456_s11 = smov (%p42_p10, %s2454_s11), 0 }
  0x5d   : > { %p2146_p8 = por %p2425_p6, %p56_p1  ;;  %s1236_s29 = sshll.u32 %s326_s23, 4 }
  0x5e   : > { %s44_s12 = ssub.s32 %s1924_s21, %s2456_s11  ;;  %s1237_s8 = sshll.u32 %s1920_s20, 1 }
  0x5f   : > { %s2426_s13 = scalar_select %p2146_p8, 1, 0 }
  0x60   : > { %s46_s30 = sor.u32 %s45_s15, %s44_s12  ;;  %s1238_s9 = sshll.u32 %s1924_s21, 3 }
  0x61   : > { %2427 = sst [smem:[#allocation22_spill]] %s2426_s13  ;;  %p47_p13 = scmp.eq.s32.totalorder %s46_s30, 0 }
  0x62   : > { %s336_s27 = sadd.s32 %s1238_s9, %s1237_s8  ;;  %s330_s14 = scalar_lea.vmem [#allocation8], %s1236_s29 }
  0x63   : > { %s339_s25 = sshll.u32 %s330_s14, 4  ;;  %s1239_s4 = sshll.u32 %s336_s27, 7  ;;  %s2161_s25 = int_to_ptr.vmem [resolvable:$true] %s339_s25 }
  0x64   : > { %s2159_s2 = scalar_select %p47_p13, %s1908_s17, %s49_s10  }
  0x65   : > { %s2166_s5 = scalar_lea.hbm %s2384_s1, %s1239_s4  ;;  %p2172_p0 = pnand %p1632_p11, %p2140_p4 }
  0x66   : > { %s2176_s27 = scalar_lea.sflag [#allocation9], %s326_s23  ;;  %s1796_s14 = scalar_lea.hbm %s2166_s5, 256 }
  0x67   : > { %p1797_p3 = scmp.ne.s32.totalorder %s2166_s5, %s1796_s14  ;;  %p1798_p5 = pneg %p2172_p0 }
  0x68   : > { %s1801_s10 = scalar_lea.hbm %s2384_s1, 2048  ;;  %p1802_p12 = scmp.lt.u32.totalorder %s2166_s5, %s2384_s1 }
  0x69   : > { %p1799_p7 = pnand %p1798_p5, %p1797_p3  ;;  %p1803_p1 = scmp.lt.u32.totalorder %s1801_s10, %s1796_s14 }
  0x6a   : > { %p1805_p4 = scmp.lt.u32.totalorder %s1796_s14, %s2166_s5 }
  0x6b   : > { %p1800_p9 = pneg %p1799_p7  ;;  %p1804_p2 = por %p1803_p1, %p1802_p12 }
  0x6d   : > { %p1806_p10 = por %p1805_p4, %p1804_p2 }
  0x6f   : > { %p1807_p6 = pnand %p1806_p10, %p1800_p9 }
  0x71   : > { %1810 = shalt.err (!%p1807_p6)
}
  0x72   : > { %s1811_s23 = scalar_lea.vmem %s2161_s25, 256  ;;  %s1934_s29 = smov [#allocation8]  }
  0x73   : > { %p1812_p11 = scmp.ne.s32.totalorder %s2161_s25, %s1811_s23  ;;  %s1816_s12 = sshll.u32 %s1934_s29, 4  ;;  %s1817_s12 = int_to_ptr.vmem [resolvable:$false] %s1816_s12 }
  0x74   : > { %s1818_s30 = scalar_lea.vmem %s1817_s12, 512  ;;  %p1819_p7 = scmp.lt.s32.totalorder %s2161_s25, %s1817_s12 }
  0x75   : > { %p1814_p13 = pnand %p1812_p11, %p1798_p5  ;;  %p1820_p12 = scmp.lt.s32.totalorder %s1818_s30, %s1811_s23 }
  0x77   : > { %p1815_p3 = pneg %p1814_p13  ;;  %p1821_p1 = por %p1820_p12, %p1819_p7 }
  0x79   : > { %p1822_p2 = pnand %p1821_p1, %p1815_p3 }
  0x7b   : > { %1825 = shalt.err (!%p1822_p2)
}
  0x7c   : > { %s2429_s8 = smov 8   ;;  %s2430_s9 = smov 128  }
  0x7d   : > { %1625 = dma.hbm_to_vmem [thread:$0]  (!%p2172_p0), %s2166_s5, 256, %s2161_s25, %s2176_s27, %s2430_s9, %s2430_s9, %s2429_s8  }
  0x7e   : > { %p2431_p5 = scmp.ne.s32.totalorder %s2419_s28, 0 }
  0x7f   : > { %s2210_s14 = sand.u32 (!%p2431_p5), 1, %s1904_s16   ;;  %p2432_p9 = scmp.ne.s32.totalorder (!%p2431_p5), %s2416_s26, 0 }
  0x80   : > { %351 = sbr.rel (%p2431_p5) target bundleno = 1369 (0x559), region = 56  ;;  %s1241_s4 = sshll.u32 (!%p2431_p5), %s2210_s14, 4 }
  0x81   : > { %s354_s19 = scalar_lea.sflag (!%p2431_p5), [#allocation9], %s2210_s14  ;;  %s2216_s15 = scalar_lea.vmem (!%p2431_p5), [#allocation8], %s1241_s4 }
  0x87   : > { %1887 = dma.done.wait (%p2432_p9), %s354_s19, 256  }
  0x88   : > { %1889 = vsyncadd (%p2432_p9), %s354_s19, 4294967040  ;;  %p2433_p0 = scmp.ne.s32.totalorder %s2414_s24, 0 }
  0x8a   : > { %1891 = dma.done.wait (%p2433_p0), [#allocation12], 8192  }
  0x8b   : > { %1893 = vsyncadd (%p2433_p0), [#allocation12], 4294959104  ;;  %v406_v0 = vld [vmem:[#allocation11 + $0x100] sm:$0xff]  ;;  %v407_v1 = vld [vmem:[#allocation11 + $0x108] sm:$0xff]  ;;  %s402_s25 = sld [smem:[#allocation7]]  ;;  %s2275_s13 = scalar_lea.vmem [#allocation14], %s1241_s4 }
  0x8c   : > { %v408_v2 = vld [vmem:[#allocation11 + $0x110] sm:$0xff]  ;;  %v1475_v3 = vpack.c.bf16 %v407_v1, %v406_v0  ;;  %v409_v4 = vld [vmem:[#allocation11 + $0x118] sm:$0xff]  ;;  %v410_v6 = vld [vmem:[#allocation11 + $0x120] sm:$0xff]  ;;  %p1250_p4 = scmp.ne.s32.totalorder %s1912_s18, 0 }
  0x8d   : > { %v1479_v5 = vpack.c.bf16 %v409_v4, %v408_v2  ;;  %v411_v7 = vld [vmem:[#allocation11 + $0x128] sm:$0xff]  ;;  %v2227_v9 = vld [vmem:[%s2216_s15] sm:$0xff]  ;;  %v413_v11 = vld [vmem:[#allocation11 + $0x138] sm:$0xff] }
  0x8e   : > { %1476 = vmatprep.subr.bf16.mxu0 %v1475_v3  ;;  %v1483_v8 = vpack.c.bf16 %v411_v7, %v410_v6  ;;  %v412_v10 = vld [vmem:[#allocation11 + $0x130] sm:$0xff]  ;;  %1367 = vmatprep.mubr.f32.mxu0 %v2227_v9  ;;  %v505_v13 = vld [vmem:[#allocation11 + $0x80] sm:$0xff]  ;;  %v506_v14 = vld [vmem:[#allocation11 + $0x88] sm:$0xff] }
  0x8f   : > { %1478 = vmatpush3.bf16.msra.mxu0 %v1475_v3  ;;  %1402 = vmatprep.mubr.f32.mxu1 %v2227_v9  ;;  %v1487_v12 = vpack.c.bf16 %v413_v11, %v412_v10  ;;  %v414_v15 = vld [vmem:[#allocation11 + $0x140] sm:$0xff]  ;;  %v415_v16 = vld [vmem:[#allocation11 + $0x148] sm:$0xff]  ;;  %v1507_v17 = vpack.c.bf16 %v506_v14, %v505_v13  ;;  %v507_v18 = vld [vmem:[#allocation11 + $0x90] sm:$0xff] }
  0x90   : > { %1480 = vmatprep.subr.bf16.mxu0 %v1479_v5  ;;  %v508_v19 = vld [vmem:[#allocation11 + $0x98] sm:$0xff]  ;;  %v509_v21 = vld [vmem:[#allocation11 + $0xa0] sm:$0xff]  ;;  %v510_v22 = vld [vmem:[#allocation11 + $0xa8] sm:$0xff]  ;;  %v1491_v23 = vpack.c.bf16 %v415_v16, %v414_v15 }
  0x91   : > { %1508 = vmatprep.subr.bf16.mxu1 %v1507_v17  ;;  %v1511_v20 = vpack.c.bf16 %v508_v19, %v507_v18  ;;  %v416_v24 = vld [vmem:[#allocation11 + $0x150] sm:$0xff]  ;;  %v417_v25 = vld [vmem:[#allocation11 + $0x158] sm:$0xff]  ;;  %v1515_v26 = vpack.c.bf16 %v510_v22, %v509_v21  ;;  %v418_v30 = vld [vmem:[#allocation11 + $0x160] sm:$0xff]  ;;  %s613_s22 = ssub.f32 1.0, %s402_s25 }
  0x92   : > { %1510 = vmatpush3.bf16.msra.mxu1 %v1507_v17  ;;  %v511_v27 = vld [vmem:[#allocation11 + $0xb0] sm:$0xff]  ;;  %v512_v28 = vld [vmem:[#allocation11 + $0xb8] sm:$0xff]  ;;  %v1495_v29 = vpack.c.bf16 %v417_v25, %v416_v24  ;;  %v419_v31 = vld [vmem:[#allocation11 + $0x168] sm:$0xff] }
  0x93   : > { %1482 = vmatpush3.bf16.msra.mxu0 %v1479_v5  ;;  %1512 = vmatprep.subr.bf16.mxu1 %v1511_v20  ;;  %v1519_v32 = vpack.c.bf16 %v512_v28, %v511_v27  ;;  %v513_v33 = vld [vmem:[#allocation11 + $0xc0] sm:$0xff]  ;;  %v514_v34 = vld [vmem:[#allocation11 + $0xc8] sm:$0xff]  ;;  %v1499_v35 = vpack.c.bf16 %v419_v31, %v418_v30  ;;  %v420_v36 = vld [vmem:[#allocation11 + $0x170] sm:$0xff] }
  0x94   : > { %1484 = vmatprep.subr.bf16.mxu0 %v1483_v8  ;;  %v421_v37 = vld [vmem:[#allocation11 + $0x178] sm:$0xff]  ;;  %v1523_v38 = vpack.c.bf16 %v514_v34, %v513_v33  ;;  %v515_v39 = vld [vmem:[#allocation11 + $0xd0] sm:$0xff]  ;;  %v622_v42 = vld [vmem:[#allocation11] sm:$0xff]  ;;  %v614_v33 = vstv %s613_s22 }
  0x95   : > { %v516_v40 = vld [vmem:[#allocation11 + $0xd8] sm:$0xff]  ;;  %v1503_v41 = vpack.c.bf16 %v421_v37, %v420_v36  ;;  %v623_v43 = vld [vmem:[#allocation11 + $0x8] sm:$0xff]  ;;  %v517_v45 = vld [vmem:[#allocation11 + $0xe0] sm:$0xff]  ;;  %v617_v37 = vstv %s402_s25 }
  0x96   : > { %1514 = vmatpush3.bf16.msra.mxu1 %v1511_v20  ;;  %v1527_v44 = vpack.c.bf16 %v516_v40, %v515_v39  ;;  %v518_v46 = vld [vmem:[#allocation11 + $0xe8] sm:$0xff]  ;;  %v1539_v47 = vpack.c.bf16 %v623_v43, %v622_v42  ;;  %v624_v48 = vld [vmem:[#allocation11 + $0x10] sm:$0xff]  ;;  %v625_v49 = vld [vmem:[#allocation11 + $0x18] sm:$0xff] }
  0x97   : > { %1486 = vmatpush3.bf16.msra.mxu0 %v1483_v8  ;;  %1516 = vmatprep.subr.bf16.mxu1 %v1515_v26  ;;  %v1531_v50 = vpack.c.bf16 %v518_v46, %v517_v45  ;;  %v519_v51 = vld [vmem:[#allocation11 + $0xf0] sm:$0xff]  ;;  %v520_v52 = vld [vmem:[#allocation11 + $0xf8] sm:$0xff]  ;;  %v1543_v54 = vpack.c.bf16 %v625_v49, %v624_v48  ;;  %v626_v55 = vld [vmem:[#allocation11 + $0x20] sm:$0xff] }
  0x98   : > { %1488 = vmatprep.subr.bf16.mxu0 %v1487_v12  ;;  %v2232_v53 = vld [vmem:[%s2216_s15 + $0x8] sm:$0xff]  ;;  %v1535_v57 = vpack.c.bf16 %v520_v52, %v519_v51  ;;  %v628_v59 = vld [vmem:[#allocation11 + $0x30] sm:$0xff]  ;;  %v630_v62 = vld [vmem:[#allocation11 + $0x40] sm:$0xff] }
  0x99   : > { %v627_v56 = vld [vmem:[#allocation11 + $0x28] sm:$0xff]  ;;  %v629_v60 = vld [vmem:[#allocation11 + $0x38] sm:$0xff]  ;;  %v632_v1 = vld [vmem:[#allocation11 + $0x50] sm:$0xff] }
  0x9a   : > { %1518 = vmatpush3.bf16.msra.mxu1 %v1515_v26  ;;  %v1547_v58 = vpack.c.bf16 %v627_v56, %v626_v55  ;;  %v1551_v61 = vpack.c.bf16 %v629_v60, %v628_v59  ;;  %v631_v63 = vld [vmem:[#allocation11 + $0x48] sm:$0xff]  ;;  %v633_v2 = vld [vmem:[#allocation11 + $0x58] sm:$0xff]  ;;  %v634_v4 = vld [vmem:[#allocation11 + $0x60] sm:$0xff] }
  0x9b   : > { %1490 = vmatpush3.bf16.msra.mxu0 %v1487_v12  ;;  %1520 = vmatprep.subr.bf16.mxu1 %v1519_v32  ;;  %v1555_v0 = vpack.c.bf16 %v631_v63, %v630_v62  ;;  %v1559_v3 = vpack.c.bf16 %v633_v2, %v632_v1  ;;  %v635_v5 = vld [vmem:[#allocation11 + $0x68] sm:$0xff]  ;;  %v636_v7 = vld [vmem:[#allocation11 + $0x70] sm:$0xff]  ;;  %v637_v8 = vld [vmem:[#allocation11 + $0x78] sm:$0xff] }
  0x9c   : > { %1492 = vmatprep.subr.bf16.mxu0 %v1491_v23  ;;  %v1563_v6 = vpack.c.bf16 %v635_v5, %v634_v4  ;;  %v1567_v10 = vpack.c.bf16 %v637_v8, %v636_v7  ;;  %v1245_v11 = vld [vmem:[%s2386_s3 + $0x2] ss:$0 sm:$0xff]  ;;  %v1246_v16 = vld [vmem:[%s2386_s3 + $0x1] ss:$0 sm:$0xff]  ;;  %v1249_v27 = vld [vmem:[%s2386_s3] ss:$0 sm:$0xff] }
  0x9e   : > { %1522 = vmatpush3.bf16.msra.mxu1 %v1519_v32 }
  0x9f   : > { %1494 = vmatpush3.bf16.msra.mxu0 %v1491_v23  ;;  %1524 = vmatprep.subr.bf16.mxu1 %v1523_v38 }
  0xa0   : > { %1496 = vmatprep.subr.bf16.mxu0 %v1495_v29 }
  0xa2   : > { %1526 = vmatpush3.bf16.msra.mxu1 %v1523_v38 }
  0xa3   : > { %1498 = vmatpush3.bf16.msra.mxu0 %v1495_v29  ;;  %1528 = vmatprep.subr.bf16.mxu1 %v1527_v44 }
  0xa4   : > { %1500 = vmatprep.subr.bf16.mxu0 %v1499_v35 }
  0xa6   : > { %1530 = vmatpush3.bf16.msra.mxu1 %v1527_v44 }
  0xa7   : > { %1502 = vmatpush3.bf16.msra.mxu0 %v1499_v35  ;;  %1532 = vmatprep.subr.bf16.mxu1 %v1531_v50 }
  0xa8   : > { %1504 = vmatprep.subr.bf16.mxu0 %v1503_v41 }
  0xaa   : > { %1534 = vmatpush3.bf16.msra.mxu1 %v1531_v50 }
  0xab   : > { %1506 = vmatpush3.bf16.msra.mxu0 %v1503_v41  ;;  %1536 = vmatprep.subr.bf16.mxu1 %v1535_v57 }
  0xac   : > { %1540 = vmatprep.subr.bf16.mxu0 %v1539_v47 }
  0xae   : > { %1368 = vmatmul.mubr.f32.vlgmr.msra.gmra.mrb[0].mxu0 %v2232_v53  ;;  %1538 = vmatpush3.bf16.msra.mxu1 %v1535_v57 }
  0xaf   : > { %1542 = vmatpush3.bf16.msra.mxu0 %v1539_v47  ;;  %1437 = vmatprep.mubr.f32.mxu0 %v2227_v9 }
  0xb0   : > { %1544 = vmatprep.subr.bf16.mxu0 %v1543_v54 }
  0xb1   : > { %1403 = vmatmul.mubr.f32.vlgmr.msra.gmra.mrb[0].mxu1 %v2232_v53 }
  0xb3   : > { %1546 = vmatpush3.bf16.msra.mxu0 %v1543_v54 }
  0xb4   : > { %1548 = vmatprep.subr.bf16.mxu0 %v1547_v58 }
  0xb7   : > { %1550 = vmatpush3.bf16.msra.mxu0 %v1547_v58 }
  0xb8   : > { %1552 = vmatprep.subr.bf16.mxu0 %v1551_v61 }
  0xbb   : > { %1554 = vmatpush3.bf16.msra.mxu0 %v1551_v61 }
  0xbc   : > { %1556 = vmatprep.subr.bf16.mxu0 %v1555_v0 }
  0xbf   : > { %1558 = vmatpush3.bf16.msra.mxu0 %v1555_v0 }
  0xc0   : > { %1560 = vmatprep.subr.bf16.mxu0 %v1559_v3 }
  0xc3   : > { %1562 = vmatpush3.bf16.msra.mxu0 %v1559_v3 }
  0xc4   : > { %1564 = vmatprep.subr.bf16.mxu0 %v1563_v6 }
  0xc7   : > { %1566 = vmatpush3.bf16.msra.mxu0 %v1563_v6 }
  0xc8   : > { %1568 = vmatprep.subr.bf16.mxu0 %v1567_v10 }
  0xcb   : > { %1570 = vmatpush3.bf16.msra.mxu0 %v1567_v10 }
  0xce   : > { %1438 = vmatmul.mubr.f32.vlgmr.msra.gmra.mrb[2].mxu0 %v2232_v53 }
 0x181   : > { %v1369_v12 = vpop.f32.mrb[0].mxu0 }
 0x182   : > { %v499_v13 = vadd.f32 %v1369_v12, %v1245_v11  ;;  %v493_v14 = vpop.f32.mrb[1].mxu0 }
 0x183   : > { %v494_v15 = vadd.f32 %v1245_v11, %v493_v14 }
 0x184   : > { %503 = vst [vmem:[#allocation4 + $0x8] sm:$0xff] %v499_v13  ;;  %v1404_v17 = vpop.f32.mrb[0].mxu1 }
 0x185   : > { %502 = vst [vmem:[#allocation4] sm:$0xff] %v494_v15  ;;  %v598_v18 = vadd.f32 %v1404_v17, %v1246_v16  ;;  %v592_v19 = vpop.f32.mrb[1].mxu1 }
 0x186   : > { %v593_v20 = vadd.f32 %v1246_v16, %v592_v19 }
 0x187   : > { %v1248_v21 = vmul.f32 -1.442695, %v598_v18 }
 0x188   : > { %v1247_v22 = vmul.f32 -1.442695, %v593_v20 }
 0x189   : > { %1708 = vpow2.f32 %v1248_v21 }
 0x18a   : > { %1710 = vpow2.f32 %v1247_v22 }
 0x193   : > { %v1709_v23 = vpop.eup %1708 }
 0x194   : > { %v1711_v24 = vpop.eup %1710  ;;  %v608_v25 = vadd.f32 1.0, %v1709_v23  ;;  %v1935_v23 = vmov -1.0  }
 0x195   : > { %v607_v26 = vadd.f32 1.0, %v1711_v24 }
 0x196   : > { %1712 = vrcp.f32 %v608_v25 }
 0x197   : > { %1714 = vrcp.f32 %v607_v26 }
 0x1a0   : > { %v1713_v35 = vpop.eup %1712 }
 0x1a1   : > { %v1439_v28 = vpop.f32.mrb[2].mxu0  ;;  %v1715_v38 = vpop.eup %1714  ;;  %v616_v40 = vmul.f32 %v1713_v35, %v614_v33 }
 0x1a2   : > { %v2247_v29 = vadd.f32 %v1439_v28, %v1249_v27  ;;  %v709_v30 = vpop.f32.mrb[3].mxu0  ;;  %v615_v42 = vmul.f32 %v1715_v38, %v614_v33 }
 0x1a3   : > { %v2249_v31 = vadd.f32 %v1249_v27, %v709_v30  ;;  %v2259_v44 = vadd.f32 %v617_v37, %v616_v40 }
 0x1a4   : > { %v2252_v32 = vmul.f32 0.70710677, %v2247_v29  ;;  %v2261_v46 = vadd.f32 %v617_v37, %v615_v42  ;;  %v721_v30 = vmul.f32 0.5, %v2247_v29  ;;  %v1936_v29 = vmov (!%p1250_p4), 0.0  }
 0x1a5   : > { %v2255_v34 = vmul.f32 0.70710677, %v2249_v31  ;;  %621 = vst [vmem:[#allocation3 + $0x8] sm:$0xff] %v2259_v44  ;;  %v719_v35 = vsub.f32 1.0, %v2259_v44  ;;  %786 = vst [vmem:[#allocation5] sm:$0x1] (!%p1250_p4), %v1936_v29 }
 0x1a6   : > { %v729_v36 = vand.u32 2147483647, %v2252_v32  ;;  %620 = vst [vmem:[#allocation3] sm:$0xff] %v2261_v46  ;;  %vm725_vm0 = vcmp.ge.f32.partialorder %v2252_v32, 0.0  ;;  %v720_v32 = vmul.f32 0.5, %v2249_v31 }
 0x1a7   : > { %v728_v39 = vand.u32 2147483647, %v2255_v34  ;;  %vm724_vm1 = vcmp.ge.f32.partialorder %v2255_v34, 0.0  ;;  %v727_v24 = vsel %vm725_vm0, 1.0, %v1935_v23  ;;  %v718_v34 = vsub.f32 1.0, %v2261_v46 }
 0x1a8   : > { %v731_v41 = vmul.f32 0.3275911, %v729_v36  ;;  %v761_v51 = vsub.f32 0.0, %v729_v36  ;;  %v726_v27 = vsel %vm724_vm1, 1.0, %v1935_v23 }
 0x1a9   : > { %v730_v43 = vmul.f32 0.3275911, %v728_v39  ;;  %v760_v55 = vsub.f32 0.0, %v728_v39 }
 0x1aa   : > { %v733_v45 = vadd.f32 1.0, %v731_v41  ;;  %v763_v58 = vmul.f32 %v761_v51, %v729_v36 }
 0x1ab   : > { %v732_v47 = vadd.f32 1.0, %v730_v43  ;;  %v762_v61 = vmul.f32 %v760_v55, %v728_v39 }
 0x1ac   : > { %1716 = vrcp.f32 %v733_v45  ;;  %v766_v0 = vmul.f32 1.442695, %v763_v58 }
 0x1ad   : > { %1718 = vrcp.f32 %v732_v47  ;;  %v764_v3 = vmul.f32 1.442695, %v762_v61 }
 0x1ae   : > { %1720 = vpow2.f32 %v766_v0 }
 0x1af   : > { %1722 = vpow2.f32 %v764_v3 }
 0x1b6   : > { %v1717_v48 = vpop.eup %1716 }
 0x1b7   : > { %v1719_v49 = vpop.eup %1718  ;;  %v737_v50 = vmul.f32 %v1717_v48, %v733_v45 }
 0x1b8   : > { %v736_v52 = vmul.f32 %v1719_v49, %v732_v47  ;;  %v1721_v17 = vpop.eup %1720 }
 0x1b9   : > { %v739_v54 = vsub.f32 2.0, %v737_v50  ;;  %v1723_v19 = vpop.eup %1722 }
 0x1ba   : > { %v738_v56 = vsub.f32 2.0, %v736_v52 }
 0x1bb   : > { %v741_v57 = vmul.f32 %v1717_v48, %v739_v54 }
 0x1bc   : > { %v740_v59 = vmul.f32 %v1719_v49, %v738_v56 }
 0x1bd   : > { %v743_v60 = vmul.f32 1.0614054, %v741_v57 }
 0x1be   : > { %v742_v62 = vmul.f32 1.0614054, %v740_v59 }
 0x1bf   : > { %v745_v63 = vadd.f32 -1.4531521, %v743_v60 }
 0x1c0   : > { %v744_v1 = vadd.f32 -1.4531521, %v742_v62 }
 0x1c1   : > { %v747_v2 = vmul.f32 %v745_v63, %v741_v57 }
 0x1c2   : > { %v746_v4 = vmul.f32 %v744_v1, %v740_v59 }
 0x1c3   : > { %v749_v5 = vadd.f32 1.4214138, %v747_v2 }
 0x1c4   : > { %v748_v6 = vadd.f32 1.4214138, %v746_v4 }
 0x1c5   : > { %v751_v7 = vmul.f32 %v749_v5, %v741_v57 }
 0x1c6   : > { %v750_v8 = vmul.f32 %v748_v6, %v740_v59 }
 0x1c7   : > { %v753_v10 = vadd.f32 -0.28449672, %v751_v7 }
 0x1c8   : > { %v752_v11 = vadd.f32 -0.28449672, %v750_v8 }
 0x1c9   : > { %v755_v12 = vmul.f32 %v753_v10, %v741_v57 }
 0x1ca   : > { %v754_v13 = vmul.f32 %v752_v11, %v740_v59 }
 0x1cb   : > { %v757_v14 = vadd.f32 0.2548296, %v755_v12 }
 0x1cc   : > { %v756_v15 = vadd.f32 0.2548296, %v754_v13 }
 0x1cd   : > { %v759_v16 = vmul.f32 %v757_v14, %v741_v57 }
 0x1ce   : > { %v758_v18 = vmul.f32 %v756_v15, %v740_v59 }
 0x1cf   : > { %v769_v20 = vmul.f32 %v1721_v17, %v759_v16 }
 0x1d0   : > { %v768_v21 = vmul.f32 %v1723_v19, %v758_v18 }
 0x1d1   : > { %v771_v22 = vsub.f32 1.0, %v769_v20 }
 0x1d2   : > { %v770_v25 = vsub.f32 1.0, %v768_v21 }
 0x1d3   : > { %v773_v26 = vmul.f32 %v771_v22, %v727_v24 }
 0x1d4   : > { %v772_v28 = vmul.f32 %v770_v25, %v726_v27 }
 0x1d5   : > { %v775_v33 = vadd.f32 1.0, %v773_v26 }
 0x1d6   : > { %v774_v36 = vadd.f32 1.0, %v772_v28  ;;  %785 = sbr.rel (%p1250_p4) target bundleno = 477 (0x1dd), region = 72 }
 0x1d7   : > { %v777_v37 = vmul.f32 %v775_v33, %v721_v30 }
 0x1d8   : > { %v776_v38 = vmul.f32 %v774_v36, %v720_v32 }
 0x1d9   : > { %v779_v39 = vmul.f32 %v777_v37, %v719_v35 }
 0x1da   : > { %v778_v40 = vmul.f32 %v776_v38, %v718_v34 }
 0x1db   : > { %781 = vst [vmem:[#allocation2 + $0x8] sm:$0xff] %v779_v39 }
 0x1dc   : > { %780 = vst [vmem:[#allocation2] sm:$0xff] %v778_v40 }
 0x1dd PF: > { %v788_v41 = vld [vmem:[#allocation3] sm:$0xff]  ;;  %v790_v42 = vlaneseq  ;;  %v826_v45 = vld [vmem:[#allocation3 + $0x8] sm:$0xff]  ;;  %s2434_s4 = sld [smem:[#allocation25_spill]]  ;;  %s2435_s19 = sld [smem:[#allocation19_spill]] }
 0x1de   : > { %v793_v43 = vrot.slane %v788_v41, 7  ;;  %v829_v48 = vrot.slane %v826_v45, 7  ;;  %v1251_v15 = vld [vmem:[#allocation5] ss:$0 sm:$0xff]  ;;  %v963_v34 = vld [vmem:[#allocation13] sm:$0xff]  ;;  %v964_v37 = vld [vmem:[#allocation13 + $0x8] sm:$0xff] }
 0x1df   : > { %v791_v47 = vshrl.u32 %v790_v42, 7  ;;  %v1571_v38 = vpack.c.bf16 %v964_v37, %v963_v34  ;;  %s1258_s15 = sshll.u32 %s1912_s18, 1  ;;  %s2436_s28 = sld [smem:[#allocation26_spill]] }
 0x1e0   : > { %s2437_s22 = sld [smem:[#allocation27_spill]]  ;;  %s1121_s29 = sshll.u32 %s2275_s13, 4  ;;  %s2326_s29 = int_to_ptr.vmem [resolvable:$true] %s1121_s29 }
 0x1e1   : > { %vm792_vm2 = vcmp.ge.s32.totalorder %v791_v47, 1  ;;  %vm800_vm3 = vcmp.ge.s32.totalorder %v791_v47, 2  ;;  %vm808_vm4 = vcmp.ge.s32.totalorder %v791_v47, 4  ;;  %v852_v26 = vsub.s32 7, %v791_v47  ;;  %1572 = vmatprep.subr.bf16.mxu1 %v1571_v38  ;;  %s2439_s8 = sld [smem:[#allocation28_spill]] }
 0x1e2   : > { %v828_v46 = vld [vmem:[#allocation2 + $0x8] sm:$0xff]  ;;  %v794_v50 = vsel %vm792_vm2, %v793_v43, 1.0  ;;  %v830_v52 = vsel %vm792_vm2, %v829_v48, 1.0  ;;  %1574 = vmatpush3.bf16.msra.mxu1 %v1571_v38  ;;  %v967_v48 = vld [vmem:[#allocation13 + $0x20] sm:$0xff] }
 0x1e3   : > { %v789_v31 = vld [vmem:[#allocation2] sm:$0xff]  ;;  %v831_v49 = vrot.slane %v828_v46, 7  ;;  %v799_v56 = vmul.f32 %v794_v50, %v788_v41  ;;  %v835_v58 = vmul.f32 %v830_v52, %v826_v45  ;;  %v970_v52 = vld [vmem:[#allocation13 + $0x38] sm:$0xff]  ;;  %s1259_s5 = sshll.u32 %s2435_s19, 3  ;;  %s1826_s19 = scalar_lea.vmem %s2326_s29, 256 }
 0x1e4   : > { %v795_v44 = vrot.slane %v789_v31, 7  ;;  %s1118_s25 = sadd.s32 %s1259_s5, %s1258_s15  ;;  %p1827_p10 = scmp.ne.s32.totalorder %s2326_s29, %s1826_s19 }
 0x1e5   : > { %v832_v54 = vsel %vm792_vm2, %v831_v49, 0.0  ;;  %v801_v60 = vrot.slane %v799_v56, 6  ;;  %v836_v62 = vrot.slane %v835_v58, 6  ;;  %v968_v49 = vld [vmem:[#allocation13 + $0x28] sm:$0xff]  ;;  %s1260_s18 = sshll.u32 %s1118_s25, 7  ;;  %s1937_s15 = smov [#allocation14]  }
 0x1e6   : > { %v796_v51 = vsel %vm792_vm2, %v795_v44, 0.0  ;;  %v833_v57 = vmul.f32 %v832_v54, %v826_v45  ;;  %v965_v45 = vld [vmem:[#allocation13 + $0x10] sm:$0xff]  ;;  %v1579_v50 = vpack.c.bf16 %v968_v49, %v967_v48  ;;  %p1828_p6 = pnand %p1827_p10, %p2146_p8  ;;  %s1830_s5 = sshll.u32 %s1937_s15, 4  ;;  %s1831_s5 = int_to_ptr.vmem [resolvable:$false] %s1830_s5 }
 0x1e7   : > { %v797_v55 = vmul.f32 %v796_v51, %v788_v41  ;;  %v802_v63 = vsel %vm800_vm3, %v801_v60, 1.0  ;;  %v837_v1 = vsel %vm800_vm3, %v836_v62, 1.0  ;;  %v969_v51 = vld [vmem:[#allocation13 + $0x30] sm:$0xff]  ;;  %v976_v62 = vld [vmem:[#allocation13 + $0x68] sm:$0xff]  ;;  %s2324_s9 = scalar_lea.hbm %s2439_s8, %s1260_s18  ;;  %s1832_s24 = scalar_lea.vmem %s1831_s5, 512 }
 0x1e8   : > { %v834_v61 = vadd.f32 %v833_v57, %v828_v46  ;;  %v807_v3 = vmul.f32 %v802_v63, %v799_v56  ;;  %v842_v10 = vmul.f32 %v837_v1, %v835_v58  ;;  %v966_v46 = vld [vmem:[#allocation13 + $0x18] sm:$0xff]  ;;  %v1583_v54 = vpack.c.bf16 %v970_v52, %v969_v51  ;;  %v973_v57 = vld [vmem:[#allocation13 + $0x50] sm:$0xff]  ;;  %p1829_p11 = pneg %p1828_p6  ;;  %p1833_p13 = scmp.lt.s32.totalorder %s2326_s29, %s1831_s5 }
 0x1e9   : > { %v798_v59 = vadd.f32 %v797_v55, %v789_v31  ;;  %v1575_v47 = vpack.c.bf16 %v966_v46, %v965_v45  ;;  %v971_v55 = vld [vmem:[#allocation13 + $0x40] sm:$0xff]  ;;  %v978_v1 = vld [vmem:[#allocation13 + $0x78] sm:$0xff]  ;;  %p1834_p3 = scmp.lt.s32.totalorder %s1832_s24, %s1826_s19 }
 0x1ea   : > { %v838_v2 = vrot.slane %v834_v61, 6  ;;  %v809_v7 = vrot.slane %v807_v3, 4  ;;  %v843_v17 = vrot.slane %v842_v10, 4 }
 0x1eb   : > { %v803_v0 = vrot.slane %v798_v59, 6  ;;  %1576 = vmatprep.subr.bf16.mxu1 %v1575_v47  ;;  %p1835_p7 = por %p1834_p3, %p1833_p13 }
 0x1ec   : > { %v839_v5 = vsel %vm800_vm3, %v838_v2, 0.0  ;;  %v810_v12 = vsel %vm808_vm4, %v809_v7, 1.0  ;;  %v844_v24 = vsel %vm808_vm4, %v843_v17, 1.0  ;;  %1578 = vmatpush3.bf16.msra.mxu1 %v1575_v47 }
 0x1ed   : > { %v804_v4 = vsel %vm800_vm3, %v803_v0, 0.0  ;;  %v840_v8 = vmul.f32 %v839_v5, %v835_v58  ;;  %v815_v14 = vmul.f32 %v810_v12, %v807_v3  ;;  %v849_v30 = vmul.f32 %v844_v24, %v842_v10  ;;  %1580 = vmatprep.subr.bf16.mxu1 %v1579_v50  ;;  %v977_v0 = vld [vmem:[#allocation13 + $0x70] sm:$0xff]  ;;  %p1836_p12 = pnand %p1835_p7, %p1829_p11 }
 0x1ee   : > { %v805_v6 = vmul.f32 %v804_v4, %v799_v56  ;;  %v972_v56 = vld [vmem:[#allocation13 + $0x48] sm:$0xff]  ;;  %v1599_v2 = vpack.c.bf16 %v978_v1, %v977_v0  ;;  %v2293_v5 = vld [vmem:[#allocation4 + $0x8] sm:$0xff] }
 0x1ef   : > { %v841_v13 = vadd.f32 %v840_v8, %v834_v61  ;;  %v822_v22 = vmul.f32 %v1251_v15, %v815_v14  ;;  %v1587_v58 = vpack.c.bf16 %v972_v56, %v971_v55  ;;  %v975_v61 = vld [vmem:[#allocation13 + $0x60] sm:$0xff]  ;;  %v906_v7 = vmul.f32 0.70710677, %v2293_v5 }
 0x1f0   : > { %v806_v11 = vadd.f32 %v805_v6, %v798_v59  ;;  %1582 = vmatpush3.bf16.msra.mxu1 %v1579_v50  ;;  %v974_v59 = vld [vmem:[#allocation13 + $0x58] sm:$0xff]  ;;  %v1595_v63 = vpack.c.bf16 %v976_v62, %v975_v61 }
 0x1f1   : > { %v845_v18 = vrot.slane %v841_v13, 4  ;;  %1584 = vmatprep.subr.bf16.mxu1 %v1583_v54  ;;  %v1591_v60 = vpack.c.bf16 %v974_v59, %v973_v57  ;;  %vm908_vm6 = vcmp.ge.f32.partialorder %v906_v7, 0.0 }
 0x1f2   : > { %v811_v16 = vrot.slane %v806_v11, 4  ;;  %v910_v0 = vsel %vm908_vm6, 1.0, %v1935_v23 }
 0x1f3   : > { %v846_v20 = vsel %vm808_vm4, %v845_v18, 0.0 }
 0x1f4   : > { %v812_v19 = vsel %vm808_vm4, %v811_v16, 0.0  ;;  %v847_v27 = vmul.f32 %v846_v20, %v842_v10  ;;  %1586 = vmatpush3.bf16.msra.mxu1 %v1583_v54  ;;  %v912_v10 = vand.u32 2147483647, %v906_v7 }
 0x1f5   : > { %v813_v21 = vmul.f32 %v812_v19, %v807_v3  ;;  %1588 = vmatprep.subr.bf16.mxu1 %v1587_v58  ;;  %v2290_v3 = vld [vmem:[#allocation4] sm:$0xff] }
 0x1f6   : > { %v848_v35 = vadd.f32 %v847_v27, %v841_v13  ;;  %v905_v4 = vmul.f32 0.70710677, %v2290_v3  ;;  %v914_v12 = vmul.f32 0.3275911, %v912_v10  ;;  %v903_v1 = vmul.f32 0.5, %v2290_v3 }
 0x1f7   : > { %v814_v25 = vadd.f32 %v813_v21, %v806_v11 }
 0x1f8   : > { %1590 = vmatpush3.bf16.msra.mxu1 %v1587_v58  ;;  %v911_v6 = vand.u32 2147483647, %v905_v4  ;;  %v916_v13 = vadd.f32 1.0, %v914_v12  ;;  %vm907_vm5 = vcmp.ge.f32.partialorder %v905_v4, 0.0 }
 0x1f9   : > { %v823_v28 = vadd.f32 %v822_v22, %v814_v25  ;;  %1592 = vmatprep.subr.bf16.mxu1 %v1591_v60  ;;  %v909_v59 = vsel %vm907_vm5, 1.0, %v1935_v23  ;;  %v904_v23 = vmul.f32 0.5, %v2293_v5 }
 0x1fa   : > { %v913_v8 = vmul.f32 0.3275911, %v911_v6 }
 0x1fb   : > { %824 = vst [vmem:[#allocation2] sm:$0xff] %v823_v28  ;;  %v853_v33 = vrot.slane %v823_v28, %v852_v26  ;;  %862 = vadd.xlane.f32.xlu0 %v823_v28 }
 0x1fc   : > { %1594 = vmatpush3.bf16.msra.mxu1 %v1591_v60  ;;  %v915_v11 = vadd.f32 1.0, %v913_v8 }
 0x1fd   : > { %v854_v32 = vmul.f32 %v853_v33, %v849_v30  ;;  %1596 = vmatprep.subr.bf16.mxu1 %v1595_v63 }
 0x1fe   : > { %1724 = vrcp.f32 %v915_v11 }
 0x1ff   : > { %v855_v36 = vadd.f32 %v854_v32, %v848_v35  ;;  %1726 = vrcp.f32 %v916_v13 }
 0x200   : > { %1598 = vmatpush3.bf16.msra.mxu1 %v1595_v63 }
 0x201   : > { %856 = vst [vmem:[#allocation2 + $0x8] sm:$0xff] %v855_v36  ;;  %857 = vst [vmem:[#allocation5 - $0x7] sm:$0x80] %v855_v36  ;;  %864 = vadd.xlane.f32.xlu0 %v855_v36  ;;  %1600 = vmatprep.subr.bf16.mxu1 %v1599_v2 }
 0x204   : > { %1602 = vmatpush3.bf16.msra.mxu1 %v1599_v2 }
 0x208   : > { %v1725_v14 = vpop.eup %1724 }
 0x209   : > { %v919_v15 = vmul.f32 %v1725_v14, %v915_v11  ;;  %v1727_v16 = vpop.eup %1726  ;;  %v1253_v11 = vld [vmem:[%s2390_s7] ss:$0 sm:$0xff] }
 0x20a   : > { %v920_v18 = vmul.f32 %v1727_v16, %v916_v13 }
 0x20b   : > { %v921_v17 = vsub.f32 2.0, %v919_v15 }
 0x20c   : > { %v922_v20 = vsub.f32 2.0, %v920_v18 }
 0x20d   : > { %v923_v19 = vmul.f32 %v1725_v14, %v921_v17 }
 0x20e   : > { %v924_v22 = vmul.f32 %v1727_v16, %v922_v20  ;;  %v1254_v20 = vld [vmem:[%s2434_s4] ss:$0 sm:$0xff]  ;;  %s1106_s4 = scalar_lea.sflag [#allocation10], %s2210_s14 }
 0x20f   : > { %v925_v21 = vmul.f32 1.0614054, %v923_v19 }
 0x210   : > { %v926_v25 = vmul.f32 1.0614054, %v924_v22 }
 0x211   : > { %v927_v24 = vadd.f32 -1.4531521, %v925_v21 }
 0x212   : > { %v928_v27 = vadd.f32 -1.4531521, %v926_v25 }
 0x213   : > { %v929_v26 = vmul.f32 %v927_v24, %v923_v19 }
 0x214   : > { %v930_v33 = vmul.f32 %v928_v27, %v924_v22 }
 0x215   : > { %v931_v30 = vadd.f32 1.4214138, %v929_v26 }
 0x216   : > { %v932_v34 = vadd.f32 1.4214138, %v930_v33 }
 0x217   : > { %v933_v32 = vmul.f32 %v931_v30, %v923_v19 }
 0x219   : > { %v935_v38 = vadd.f32 -0.28449672, %v933_v32 }
 0x288   : > { %v863_v39 = vpop.xlane.xlu0 %862 }
 0x289   : > { %v867_v40 = vmul.f32 0.0078125, %v863_v39 }
 0x28b   : > { %v2282_v29 = vsub.f32 %v823_v28, %v867_v40  ;;  %v943_v28 = vsub.f32 0.0, %v911_v6  ;;  %v934_v40 = vmul.f32 %v932_v34, %v924_v22 }
 0x28d   : > { %v871_v41 = vmul.f32 %v2282_v29, %v2282_v29  ;;  %v945_v35 = vmul.f32 %v943_v28, %v911_v6  ;;  %v1252_v6 = vld [vmem:[%s2389_s6] ss:$0 sm:$0xff] }
 0x28e   : > { %v865_v31 = vpop.xlane.xlu0 %864 }
 0x28f   : > { %v868_v42 = vmul.f32 0.0078125, %v865_v31  ;;  %873 = vadd.xlane.f32.xlu1 %v871_v41  ;;  %v947_v37 = vmul.f32 1.442695, %v945_v35  ;;  %v937_v41 = vmul.f32 %v935_v38, %v923_v19 }
 0x291   : > { %v2286_v43 = vsub.f32 %v855_v36, %v868_v42  ;;  %v944_v36 = vsub.f32 0.0, %v912_v10  ;;  %1728 = vpow2.f32 %v947_v37  ;;  %v936_v42 = vadd.f32 -0.28449672, %v934_v40 }
 0x293   : > { %v872_v44 = vmul.f32 %v2286_v43, %v2286_v43  ;;  %v946_v39 = vmul.f32 %v944_v36, %v912_v10  ;;  %v938_v45 = vmul.f32 %v936_v42, %v924_v22 }
 0x295   : > { %875 = vadd.xlane.f32.xlu1 %v872_v44  ;;  %v949_v31 = vmul.f32 1.442695, %v946_v39  ;;  %v939_v44 = vadd.f32 0.2548296, %v937_v41  ;;  %v940_v49 = vadd.f32 0.2548296, %v938_v45 }
 0x296   : > { %v1255_v41 = vld [vmem:[%s2436_s28] ss:$0 sm:$0xff] }
 0x297   : > { %1730 = vpow2.f32 %v949_v31  ;;  %v941_v46 = vmul.f32 %v939_v44, %v923_v19  ;;  %v942_v54 = vmul.f32 %v940_v49, %v924_v22  ;;  %v1256_v45 = vld [vmem:[%s2437_s22] ss:$0 sm:$0xff] }
 0x29b   : > { %v1729_v47 = vpop.eup %1728 }
 0x29c   : > { %v951_v51 = vmul.f32 %v1729_v47, %v941_v46 }
 0x29e   : > { %v953_v57 = vsub.f32 1.0, %v951_v51 }
 0x2a0   : > { %v955_v62 = vmul.f32 %v953_v57, %v909_v59 }
 0x2a1   : > { %v1731_v55 = vpop.eup %1730 }
 0x2a2   : > { %v952_v60 = vmul.f32 %v1731_v55, %v942_v54  ;;  %v957_v2 = vadd.f32 1.0, %v955_v62 }
 0x2a4   : > { %v954_v63 = vsub.f32 1.0, %v952_v60  ;;  %v959_v12 = vmul.f32 %v957_v2, %v903_v1 }
 0x2a6   : > { %v956_v10 = vmul.f32 %v954_v63, %v910_v0 }
 0x2a8   : > { %v958_v14 = vadd.f32 1.0, %v956_v10 }
 0x2aa   : > { %v960_v18 = vmul.f32 %v958_v14, %v904_v23 }
 0x31c   : > { %v874_v48 = vpop.xlane.xlu1 %873 }
 0x31d   : > { %v877_v50 = vmul.f32 0.0078125, %v874_v48 }
 0x31f   : > { %v879_v52 = vadd.f32 1e-05, %v877_v50 }
 0x321   : > { %1732 = vrsqrt.f32 %v879_v52 }
 0x322   : > { %v876_v56 = vpop.xlane.xlu1 %875 }
 0x323   : > { %v878_v58 = vmul.f32 0.0078125, %v876_v56 }
 0x325   : > { %v880_v61 = vadd.f32 1e-05, %v878_v58 }
 0x327   : > { %1734 = vrsqrt.f32 %v880_v61 }
 0x32b   : > { %v1733_v4 = vpop.eup %1732 }
 0x32c   : > { %v883_v8 = vmul.f32 %v1733_v4, %v2282_v29 }
 0x32e   : > { %v891_v7 = vmul.f32 %v1252_v6, %v883_v8 }
 0x330   : > { %v899_v13 = vadd.f32 %v1253_v11, %v891_v7 }
 0x331   : > { %v1735_v3 = vpop.eup %1734 }
 0x332   : > { %v884_v15 = vmul.f32 %v1735_v3, %v2286_v43  ;;  %v961_v16 = vmul.f32 %v959_v12, %v899_v13 }
 0x334   : > { %v892_v17 = vmul.f32 %v1252_v6, %v884_v15  ;;  %1472 = vmatprep.mubr.f32.mxu1 %v961_v16 }
 0x336   : > { %v900_v19 = vadd.f32 %v1253_v11, %v892_v17 }
 0x338   : > { %v962_v29 = vmul.f32 %v960_v18, %v900_v19 }
 0x33a   : > { %1473 = vmatmul.mubr.f32.vlgmr.msra.gmra.mrb[2].mxu1 %v962_v29 }
 0x40d   : > { %v1474_v21 = vpop.f32.mrb[2].mxu1 }
 0x40e   : > { %v1058_v22 = vadd.f32 %v1474_v21, %v1254_v20  ;;  %v1052_v24 = vpop.f32.mrb[3].mxu1 }
 0x40f   : > { %v1053_v25 = vadd.f32 %v1254_v20, %v1052_v24 }
 0x410   : > { %1065 = vadd.xlane.f32.xlu1 %v1058_v22 }
 0x411   : > { %1063 = vadd.xlane.f32.xlu0 %v1053_v25 }
 0x49d   : > { %v1066_v5 = vpop.xlane.xlu1 %1065 }
 0x49e   : > { %v1068_v26 = vmul.f32 0.0078125, %v1066_v5  ;;  %v1064_v43 = vpop.xlane.xlu0 %1063 }
 0x49f   : > { %v1067_v27 = vmul.f32 0.0078125, %v1064_v43 }
 0x4a0   : > { %v1070_v28 = vsub.f32 %v1058_v22, %v1068_v26 }
 0x4a1   : > { %v1069_v30 = vsub.f32 %v1053_v25, %v1067_v27 }
 0x4a2   : > { %v1072_v33 = vmul.f32 %v1070_v28, %v1070_v28 }
 0x4a3   : > { %v1071_v35 = vmul.f32 %v1069_v30, %v1069_v30 }
 0x4a4   : > { %1075 = vadd.xlane.f32.xlu1 %v1072_v33 }
 0x4a5   : > { %1073 = vadd.xlane.f32.xlu0 %v1071_v35 }
 0x531   : > { %v1076_v32 = vpop.xlane.xlu1 %1075 }
 0x532   : > { %v1078_v36 = vmul.f32 0.0078125, %v1076_v32  ;;  %v1074_v34 = vpop.xlane.xlu0 %1073 }
 0x533   : > { %v1077_v37 = vmul.f32 0.0078125, %v1074_v34 }
 0x534   : > { %v1080_v38 = vadd.f32 1e-05, %v1078_v36 }
 0x535   : > { %v1079_v39 = vadd.f32 1e-05, %v1077_v37 }
 0x536   : > { %1736 = vrsqrt.f32 %v1080_v38 }
 0x537   : > { %1738 = vrsqrt.f32 %v1079_v39 }
 0x540   : > { %v1737_v40 = vpop.eup %1736 }
 0x541   : > { %v1739_v31 = vpop.eup %1738  ;;  %v1084_v42 = vmul.f32 %v1737_v40, %v1070_v28 }
 0x542   : > { %v1083_v44 = vmul.f32 %v1739_v31, %v1069_v30 }
 0x543   : > { %v1092_v46 = vmul.f32 %v1255_v41, %v1084_v42 }
 0x544   : > { %v1091_v47 = vmul.f32 %v1255_v41, %v1083_v44 }
 0x545   : > { %v1100_v48 = vadd.f32 %v1256_v45, %v1092_v46 }
 0x546   : > { %v1099_v49 = vadd.f32 %v1256_v45, %v1091_v47 }
 0x547   : > { %v1102_v50 = vadd.f32 %v1100_v48, %v2232_v53 }
 0x548   : > { %v1101_v51 = vadd.f32 %v1099_v49, %v2227_v9 }
 0x549   : > { %1104 = vst [vmem:[%s2275_s13 + $0x8] sm:$0xff] %v1102_v50 }
 0x54a   : > { %1103 = vst [vmem:[%s2275_s13] sm:$0xff] %v1101_v51 }
 0x54b   : > { %1839 = shalt.err (!%p1836_p12)
}
 0x54c   : > { %s1840_s13 = scalar_lea.hbm %s2324_s9, 256  ;;  %s1844_s25 = scalar_lea.hbm %s2439_s8, 2048 }
 0x54d   : > { %p1841_p1 = scmp.ne.s32.totalorder %s2324_s9, %s1840_s13  ;;  %p1845_p9 = scmp.lt.u32.totalorder %s2324_s9, %s2439_s8 }
 0x54e   : > { %p1846_p0 = scmp.lt.u32.totalorder %s1844_s25, %s1840_s13  ;;  %p1848_p10 = scmp.lt.u32.totalorder %s1840_s13, %s2324_s9 }
 0x54f   : > { %p1842_p2 = pnand %p1841_p1, %p2146_p8 }
 0x550   : > { %p1847_p4 = por %p1846_p0, %p1845_p9 }
 0x551   : > { %p1843_p5 = pneg %p1842_p2 }
 0x552   : > { %p1849_p6 = por %p1848_p10, %p1847_p4 }
 0x554   : > { %p1850_p11 = pnand %p1849_p6, %p1843_p5 }
 0x556   : > { %1853 = shalt.err (!%p1850_p11)
}
 0x557   : > { %s1938_s22 = smov 128   ;;  %s1939_s18 = smov 8  }
 0x558   : > { %1613 = dma.vmem_to_hbm [thread:$0]  (%p2146_p8), %s2326_s29, 256, %s2324_s9, %s1106_s4, %s1938_s22, %s1938_s22, %s1939_s18  }
 0x559 PF: > { %s2440_s12 = sld [smem:[#allocation18_spill]]  ;;  %s2441_s30 = sld [smem:[#allocation20_spill]] }
 0x55a   : > { %p1635_p13 = scmp.ge.s32.totalorder %s1928_s0, 2 }
 0x55f   : > { %s1136_s19 = sand.u32 1, %s2440_s12   ;;  %p2442_p3 = scmp.ne.s32.totalorder %s2441_s30, 0 }
 0x560   : > { %s1137_s15 = scalar_lea.sflag [#allocation10], %s1136_s19 }
 0x561   : > { %p1627_p7 = pnand %p1635_p13, %p2442_p3 }
 0x563   : > { %1895 = dma.done.wait (!%p1627_p7), %s1137_s15, 256  }
 0x564   : > { %1897 = vsyncadd (!%p1627_p7), %s1137_s15, 4294967040  ;;  %s28_s0 = sadd.s32 1, %s1928_s0   ;;  %s2443_s14 = sld [smem:[#allocation21_spill]] }
 0x565   : > { %p25_p12 = scmp.ge.s32.totalorder %s28_s0, 10   ;;  %s2444_s15 = smov %s1904_s16 }
 0x566   : > { %s2445_s16 = smov %s1908_s17  ;;  %s2446_s17 = smov %s2159_s2 }
 0x567   : > { %s2447_s18 = smov %s1920_s20  ;;  %s2448_s19 = smov %s1924_s21 }
 0x568   : > { %s2450_s21 = smov %s2456_s11  ;;  %27 = sbr.rel (!%p25_p12) target bundleno = 16 (0x10), region = 117 }
 0x56a   : > { %s2449_s20 = smov %s2443_s14 }
 0x56f   :  { %1142 = vsyncpa [#allocation9], 1 }
 0x570   :  { %1144 = vsyncpa [#allocation9 + $0x1], 1 }
 0x571   :  { %1145 = vsyncpa [#allocation12], 1 }
 0x572   :  { %1146 = vsyncpa [#allocation10], 1 }
 0x573   :  { %1148 = vsyncpa [#allocation10 + $0x1], 1 }

</bundles_post_ra>
